<compile_context>
chip_gen: v7x
topology: tpu7x:2x2x1
jax: 0.10.0
libtpu: 0.0.40
codegen_flags: <defaults>
</compile_context>

<pallas_src>
import functools
import numpy as np
import jax
import jax.numpy as jnp
from jax import lax
from jax.experimental import pallas as pl
from jax.experimental.pallas import tpu as pltpu


# --------------------------- fused Pallas kernel -----------------------------

def _fused_swattn_kernel(x_ref, wqkv_ref, bqkv_ref, wp_ref, bp_ref,
                         relbias_ref, mask_ref, o_ref, *, heads, head_dim):
    """One grid step = M tokens (= win_tile windows of one image).

    x_ref      : (M, C)            window tokens
    wqkv_ref   : (C, 3C)           fused qkv weight (scale folded into q part)
    bqkv_ref   : (1, 3C)           fused qkv bias
    wp_ref     : (C, C)            output projection weight
    bp_ref     : (1, C)            output projection bias
    relbias_ref: (heads, M, M)     block-diag rel-pos bias, off-window = -1e9
                                   (grid-invariant, VMEM resident)
    mask_ref   : (1, M, M)         block-diag shift-window mask (0 / -100),
                                   off-window = 0 (streamed per step)
    o_ref      : (M, C)            projected output tokens
    """
    f32 = jnp.float32
    cdt = x_ref.dtype                         # compute dtype (f32 or bf16)
    C = heads * head_dim

    x = x_ref[...]                            # (M, C)
    # single fused qkv projection (head_dim scale already folded into q cols)
    qkv = jnp.dot(x, wqkv_ref[...], preferred_element_type=f32) + bqkv_ref[...]
    q = qkv[:, :C]                            # (M, C) f32
    kc = qkv[:, C:2 * C].astype(cdt)          # (M, C)
    vc = qkv[:, 2 * C:].astype(cdt)           # (M, C)
    mask = mask_ref[0]                        # (M, M) shift mask, f32

    # channel -> head selection via 2-D iota (avoids in-kernel lane gathers)
    ch = lax.broadcasted_iota(jnp.int32, (1, C), 1)

    o_acc = jnp.zeros(o_ref.shape, f32)       # (M, C)
    for h in range(heads):                    # static unroll over heads
        lo, hi = h * head_dim, (h + 1) * head_dim
        sel = jnp.where((ch >= lo) & (ch < hi), 1.0, 0.0)        # (1, C) f32
        # zeroing the non-head channels of q makes the full-C contraction
        # equal the per-head contraction (same trick for v on the PV matmul).
        qh = (q * sel).astype(cdt)
        s = jnp.einsum('mc,nc->mn', qh, kc,
                       preferred_element_type=f32)               # (M, M)
        s = s + (relbias_ref[h] + mask)       # rel-pos bias + shift mask (+ -1e9 off-window)
        s = s - jnp.max(s, axis=-1, keepdims=True)
        p = jnp.exp(s)                        # off-window entries underflow to 0
        denom = jnp.sum(p, axis=-1, keepdims=True)                # >= 1
        inv = pl.reciprocal(denom, approx=True)
        inv = inv * (2.0 - denom * inv)       # one Newton step -> f32-accurate
        vh = vc * sel.astype(cdt)
        # deferred normalization: PV on unnormalized p, scale the (M, C) result
        oh = jnp.dot(p.astype(cdt), vh, preferred_element_type=f32)
        o_acc = o_acc + oh * inv
    y = jnp.dot(o_acc.astype(cdt), wp_ref[...],
                preferred_element_type=f32) + bp_ref[...]
    o_ref[...] = y.astype(o_ref.dtype)


# --------------------------- Module wrapper ----------------------------------

class ShiftWindowAttention:
    """JAX/Pallas port of the PyTorch ShiftWindowAttention (inference)."""

    def __init__(self, dim, heads, window_size, attn_drop, proj_drop,
                 shift_size, fmap_size, key, compute_dtype=jnp.float32):
        self.dim = dim
        self.heads = heads
        self.window_size = (window_size, window_size)
        self.shift_size = shift_size
        self.fmap_size = (fmap_size, fmap_size)
        assert dim % heads == 0
        self.head_dim = dim // heads
        self.scale = self.head_dim ** (-0.5)
        assert 0 < shift_size < min(self.window_size), 'wrong shift size.'
        # Use jnp.bfloat16 on v6e/v7x for the matmul operands (f32 accumulation
        # stays inside the kernel); f32 default keeps the 2e-4 check tight.
        self.compute_dtype = compute_dtype

        Wh, Ww = self.window_size
        ww = Wh * Ww
        C = dim
        k1, k2, k3, k4, k5 = jax.random.split(key, 5)
        # original-style parameters (consumed by the pure-JAX reference)
        self.qkv_w = (jax.random.normal(k1, (3 * dim, dim), jnp.float32)
                      * (1.0 / np.sqrt(dim)))                      # (3C, C)
        self.qkv_b = jax.random.normal(k2, (3 * dim,), jnp.float32) * 0.02
        self.proj_w = (jax.random.normal(k3, (dim, dim), jnp.float32)
                       * (1.0 / np.sqrt(dim)))                     # (C, C)
        self.proj_b = jax.random.normal(k4, (dim,), jnp.float32) * 0.02
        self.rpb_table = (jax.random.normal(
            k5, ((2 * Wh - 1) * (2 * Ww - 1), heads), jnp.float32) * 0.01)

        # relative_position_index (static, numpy)
        coords_h = np.arange(Wh)
        coords_w = np.arange(Ww)
        coords = np.stack(np.meshgrid(coords_h, coords_w, indexing='ij'))
        coords_flatten = coords.reshape(2, -1)
        rel = coords_flatten[:, :, None] - coords_flatten[:, None, :]
        rel = rel.transpose(1, 2, 0).copy()
        rel[:, :, 0] += Wh - 1
        rel[:, :, 1] += Ww - 1
        rel[:, :, 0] *= 2 * Ww - 1
        self.relative_position_index = rel.sum(-1)                 # (ww, ww)

        # ---- kernel-ready parameters ----
        # nn.Linear does y = x @ W.T + b; split the fused qkv weight, fold the
        # attention scale into the q part, then re-fuse as a single (C, 3C)
        # weight so the kernel does ONE qkv matmul.
        wq = self.qkv_w[:C].T * self.scale                         # (C, C)
        bq = self.qkv_b[:C] * self.scale
        wk = self.qkv_w[C:2 * C].T
        bk = self.qkv_b[C:2 * C]
        wv = self.qkv_w[2 * C:].T
        bv = self.qkv_b[2 * C:]
        self.wqkv = jnp.concatenate([wq, wk, wv], axis=1)          # (C, 3C)
        self.bqkv = jnp.concatenate([bq, bk, bv]).reshape(1, 3 * C)
        self.wp = self.proj_w.T                                    # (C, C)
        self.bp = self.proj_b.reshape(1, C)

        # relative position bias gather, precomputed once: (heads, ww, ww)
        self.rel_bias = (self.rpb_table[self.relative_position_index.reshape(-1)]
                         .reshape(ww, ww, heads).transpose(2, 0, 1))
        self._relbias_cache = {}   # win_tile        -> (heads, M, M) table
        self._mask_cache = {}      # (H, W, win_tile) -> (T, M, M) table

    # -------- shift-window mask (static, numpy) --------
    def _build_attn_mask(self, H, W):
        Wh, Ww = self.window_size
        s = self.shift_size
        img_mask = np.zeros((H, W), np.float32)
        h_slices = (slice(0, -Wh), slice(-Wh, -s), slice(-s, None))
        w_slices = (slice(0, -Ww), slice(-Ww, -s), slice(-s, None))
        cnt = 0
        for hs in h_slices:
            for ws in w_slices:
                img_mask[hs, ws] = cnt
                cnt += 1
        r1, r2 = H // Wh, W // Ww
        mask_windows = (img_mask.reshape(r1, Wh, r2, Ww)
                        .transpose(0, 2, 1, 3)
                        .reshape(r1 * r2, Wh * Ww))
        attn_mask = mask_windows[:, None, :] - mask_windows[:, :, None]
        attn_mask = np.where(attn_mask != 0, -100.0, 0.0).astype(np.float32)
        return attn_mask                                            # (nW, ww, ww)

    # -------- tiling: windows per grid step (token block capped at 128) --------
    def _choose_win_tile(self, nW, ww):
        cap = max(1, 128 // ww)
        wt = 1
        for d in range(1, nW + 1):
            if nW % d == 0 and d <= cap:
                wt = d
        return wt

    # -------- grid-invariant block-diagonal rel-pos bias, cached --------
    def _relbias_dense(self, win_tile):
        cached = self._relbias_cache.get(win_tile)
        if cached is not None:
            return cached
        Wh, Ww = self.window_size
        ww = Wh * Ww
        M = win_tile * ww
        eye = np.eye(win_tile, dtype=np.float32)
        off = np.float32(-1e9) * (np.float32(1.0) - eye)            # (wt, wt)
        rb = self.rel_bias                                          # (h, ww, ww)
        dense = (rb[:, None, :, None, :] * eye[None, :, None, :, None]
                 + off[None, :, None, :, None])        # (h, wt, ww, wt, ww)
        dense = dense.reshape(self.heads, M, M).astype(jnp.float32)
        self._relbias_cache[win_tile] = dense
        return dense

    # -------- per-step block-diagonal shift mask (head-independent), cached ----
    def _mask_dense(self, attn_mask_np, H, W, win_tile):
        key = (H, W, win_tile)
        cached = self._mask_cache.get(key)
        if cached is not None:
            return cached
        Wh, Ww = self.window_size
        ww = Wh * Ww
        nW = attn_mask_np.shape[0]
        T = nW // win_tile
        M = win_tile * ww
        eye = np.eye(win_tile, dtype=np.float32)
        am = attn_mask_np.reshape(T, win_tile, ww, ww)               # (T, wt, ww, ww)
        dense = am[:, :, :, None, :] * eye[None, :, None, :, None]  # (T, wt, ww, wt, ww)
        dense = jnp.asarray(dense.reshape(T, M, M).astype(np.float32))
        self._mask_cache[key] = dense
        return dense

    # -------- fused window attention (single pallas_call) --------
    def _local_attention(self, x, attn_mask_np):
        B, C, H, W = x.shape
        Wh, Ww = self.window_size
        r1, r2 = H // Wh, W // Ww
        nW, ww = r1 * r2, Wh * Ww
        cdt = self.compute_dtype

        # b c (r1 h1) (r2 w1) -> ((b r1 r2)(h1 w1)) c   token layout
        x_tot = (x.reshape(B, C, r1, Wh, r2, Ww)
                  .transpose(0, 2, 4, 3, 5, 1)
                  .reshape(B * nW * ww, C)).astype(cdt)

        win_tile = self._choose_win_tile(nW, ww)
        T = nW // win_tile
        M = win_tile * ww
        relbias_dense = self._relbias_dense(win_tile)                # (h, M, M)
        mask_dense = self._mask_dense(attn_mask_np, H, W, win_tile)  # (T, M, M)

        kernel = functools.partial(_fused_swattn_kernel,
                                   heads=self.heads, head_dim=self.head_dim)
        const2 = lambda b, t: (0, 0)
        tok_map = lambda b, t, T=T: (b * T + t, 0)
        out = pl.pallas_call(
            kernel,
            out_shape=jax.ShapeDtypeStruct((B * nW * ww, C), jnp.float32),
            grid=(B, T),
            in_specs=[
                pl.BlockSpec((M, C), tok_map),                       # tokens
                pl.BlockSpec((C, 3 * C), const2),                    # wqkv
                pl.BlockSpec((1, 3 * C), const2),                    # bqkv
                pl.BlockSpec((C, C), const2),                        # w_proj
                pl.BlockSpec((1, C), const2),                        # b_proj
                pl.BlockSpec((self.heads, M, M),
                             lambda b, t: (0, 0, 0)),                # rel-pos bias (resident)
                pl.BlockSpec((1, M, M), lambda b, t: (t, 0, 0)),     # shift mask (streamed)
            ],
            out_specs=pl.BlockSpec((M, C), tok_map),
            compiler_params=pltpu.CompilerParams(
                dimension_semantics=("parallel", "parallel"),
                vmem_limit_bytes=32 * 1024 * 1024),
        )(x_tot,
          self.wqkv.astype(cdt), self.bqkv,
          self.wp.astype(cdt), self.bp,
          relbias_dense, mask_dense)

        # ((b r1 r2)(h1 w1)) c -> b c (r1 h1) (r2 w1)
        out = (out.reshape(B, r1, r2, Wh, Ww, C)
                  .transpose(0, 5, 1, 3, 2, 4)
                  .reshape(B, C, H, W))
        return out

    def __call__(self, x):
        # x: (B, C, H, W) float32 (NCHW, like the PyTorch module)
        B, C, H, W = x.shape
        Wh, Ww = self.window_size
        # NOTE: mirrors the original PyTorch code exactly (the swapped outer
        # moduli are benign because the window is square).
        pad_r = (Ww - W % Ww) % Wh
        pad_b = (Wh - H % Wh) % Ww
        x = jnp.pad(x, ((0, 0), (0, 0), (0, pad_b), (0, pad_r)))
        H_ori, W_ori = H, W
        _, _, H, W = x.shape

        attn_mask = self._build_attn_mask(H, W)

        shifted_x = jnp.roll(x, shift=(-self.shift_size, -self.shift_size),
                             axis=(2, 3))
        sw_x = self._local_attention(shifted_x, attn_mask)
        out = jnp.roll(sw_x, shift=(self.shift_size, self.shift_size),
                       axis=(2, 3))
        if pad_r > 0 or pad_b > 0:
            out = out[:, :, :H_ori, :W_ori]
        return out, None, None


# --------------------------- pure-JAX reference -------------------------------

def reference_forward(mod: ShiftWindowAttention, x):
    B, C, H, W = x.shape
    Wh, Ww = mod.window_size
    pad_r = (Ww - W % Ww) % Wh
    pad_b = (Wh - H % Wh) % Ww
    x = jnp.pad(x, ((0, 0), (0, 0), (0, pad_b), (0, pad_r)))
    H_ori, W_ori = H, W
    _, _, H, W = x.shape
    attn_mask = jnp.asarray(mod._build_attn_mask(H, W))

    xs = jnp.roll(x, shift=(-mod.shift_size, -mod.shift_size), axis=(2, 3))
    r1, r2 = H // Wh, W // Ww
    ww = Wh * Ww
    nW = r1 * r2
    x_tot = (xs.reshape(B, C, r1, Wh, r2, Ww)
               .transpose(0, 2, 4, 3, 5, 1).reshape(B * nW, ww, C))
    qkv = x_tot @ mod.qkv_w.T + mod.qkv_b
    q, k, v = jnp.split(qkv, 3, axis=2)
    q = q * mod.scale
    sh = lambda t: t.reshape(B * nW, ww, mod.heads, mod.head_dim).transpose(0, 2, 1, 3)
    q, k, v = sh(q), sh(k), sh(v)
    attn = jnp.einsum('bhmc,bhnc->bhmn', q, k)
    bias = (mod.rpb_table[mod.relative_position_index.reshape(-1)]
            .reshape(ww, ww, mod.heads).transpose(2, 0, 1))
    attn = attn + bias[None]
    attn = attn + jnp.tile(attn_mask, (B, 1, 1))[:, None, :, :]
    attn = jax.nn.softmax(attn, axis=3)
    o = jnp.einsum('bhmn,bhnc->bhmc', attn, v)
    o = o.transpose(0, 2, 1, 3).reshape(B * nW, ww, C)
    o = o @ mod.proj_w.T + mod.proj_b
    o = (o.reshape(B, r1, r2, Wh, Ww, C)
          .transpose(0, 5, 1, 3, 2, 4).reshape(B, C, H, W))
    o = jnp.roll(o, shift=(mod.shift_size, mod.shift_size), axis=(2, 3))
    if pad_r > 0 or pad_b > 0:
        o = o[:, :, :H_ori, :W_ori]
    return o


# --------------------------------- main ---------------------------------------

if __name__ == "__main__":
    key = jax.random.PRNGKey(0)
    k_param, k_x = jax.random.split(key)

    B, C, H, W = 2, 32, 16, 16
    heads = 4
    window_size = 4
    shift_size = 2
    fmap_size = 16

    mod = ShiftWindowAttention(dim=C, heads=heads, window_size=window_size,
                               attn_drop=0.0, proj_drop=0.0,
                               shift_size=shift_size, fmap_size=fmap_size,
                               key=k_param, compute_dtype=jnp.float32)

    x = jax.random.normal(k_x, (B, C, H, W), jnp.float32)

    # jit the full forward so the surrounding roll / pad / window-partition
    # transposes fuse into as few HBM passes as possible around the kernel.
    fwd = jax.jit(lambda xx: mod(xx)[0])
    out = jax.block_until_ready(fwd(x))

    ref = jax.block_until_ready(reference_forward(mod, x))
    assert out.shape == (B, C, H, W)
    tol = 2e-4 if mod.compute_dtype == jnp.float32 else 2e-2
    assert np.allclose(np.asarray(out), np.asarray(ref), atol=tol, rtol=tol), \
        float(np.max(np.abs(np.asarray(out) - np.asarray(ref))))

    print("KERNEL_OK")
</pallas_src>

<mosaic_0001>
module attributes {stable_mosaic.version = 11 : i64} {
  func.func @_fused_swattn_kernel(%arg0: i32, %arg1: i32, %arg2: memref<128x32xf32, #tpu.memory_space<vmem>>, %arg3: memref<32x96xf32, #tpu.memory_space<vmem>>, %arg4: memref<1x96xf32, #tpu.memory_space<vmem>>, %arg5: memref<32x32xf32, #tpu.memory_space<vmem>>, %arg6: memref<1x32xf32, #tpu.memory_space<vmem>>, %arg7: memref<4x128x128xf32, #tpu.memory_space<vmem>>, %arg8: memref<1x128x128xf32, #tpu.memory_space<vmem>>, %arg9: memref<128x32xf32, #tpu.memory_space<vmem>>) attributes {dimension_semantics = [#tpu.dimension_semantics<parallel>, #tpu.dimension_semantics<parallel>], iteration_bounds = array<i64: 2, 2>, scalar_prefetch = 0 : i64, scratch_operands = 0 : i64, tpu.core_type = #tpu.core_type<tc>, window_params = [{transform_indices = @transform_0, window_bounds = array<i64: 128, 32>}, {pipeline_mode = #tpu.pipeline_mode<synchronous>, transform_indices = @transform_1, window_bounds = array<i64: 32, 96>}, {pipeline_mode = #tpu.pipeline_mode<synchronous>, transform_indices = @transform_2, window_bounds = array<i64: 1, 96>}, {pipeline_mode = #tpu.pipeline_mode<synchronous>, transform_indices = @transform_3, window_bounds = array<i64: 32, 32>}, {pipeline_mode = #tpu.pipeline_mode<synchronous>, transform_indices = @transform_4, window_bounds = array<i64: 1, 32>}, {pipeline_mode = #tpu.pipeline_mode<synchronous>, transform_indices = @transform_5, window_bounds = array<i64: 4, 128, 128>}, {transform_indices = @transform_6, window_bounds = array<i64: 1, 128, 128>}, {transform_indices = @transform_7, window_bounds = array<i64: 128, 32>}]} {
    %c0 = arith.constant 0 : index
    %c0_0 = arith.constant 0 : index
    %0 = vector.load %arg2[%c0, %c0_0] : memref<128x32xf32, #tpu.memory_space<vmem>>, vector<128x32xf32>
    %c0_1 = arith.constant 0 : index
    %c0_2 = arith.constant 0 : index
    %1 = vector.load %arg3[%c0_1, %c0_2] : memref<32x96xf32, #tpu.memory_space<vmem>>, vector<32x96xf32>
    %cst = arith.constant dense<0.000000e+00> : vector<128x96xf32>
    %2 = tpu.matmul %0, %1, %cst {dimension_numbers = #tpu.dot_dimension_numbers<[1], [0], [0], [1], [0, 0, 1, 1], [], []>} : vector<128x32xf32>, vector<32x96xf32>, vector<128x96xf32> -> vector<128x96xf32>
    %c0_3 = arith.constant 0 : index
    %c0_4 = arith.constant 0 : index
    %3 = vector.load %arg4[%c0_3, %c0_4] : memref<1x96xf32, #tpu.memory_space<vmem>>, vector<1x96xf32>
    %4 = vector.broadcast %3 : vector<1x96xf32> to vector<128x96xf32>
    %5 = arith.addf %2, %4 : vector<128x96xf32>
    %6 = vector.extract_strided_slice %5 {offsets = [0, 0], sizes = [128, 32], strides = [1, 1]} : vector<128x96xf32> to vector<128x32xf32>
    %7 = vector.extract_strided_slice %5 {offsets = [0, 32], sizes = [128, 32], strides = [1, 1]} : vector<128x96xf32> to vector<128x32xf32>
    %8 = vector.extract_strided_slice %5 {offsets = [0, 64], sizes = [128, 32], strides = [1, 1]} : vector<128x96xf32> to vector<128x32xf32>
    %c0_5 = arith.constant 0 : index
    %c0_6 = arith.constant 0 : index
    %c0_7 = arith.constant 0 : index
    %9 = vector.load %arg8[%c0_5, %c0_6, %c0_7] : memref<1x128x128xf32, #tpu.memory_space<vmem>>, vector<1x128x128xf32>
    %10 = vector.shape_cast %9 : vector<1x128x128xf32> to vector<128x128xf32>
    %11 = tpu.iota {dimensions = array<i32: 1>} : vector<1x32xi32>
    %cst_8 = arith.constant 0.000000e+00 : f32
    %12 = vector.broadcast %cst_8 : f32 to vector<128x32xf32>
    %c0_i32 = arith.constant 0 : i32
    %13 = vector.broadcast %c0_i32 : i32 to vector<1x32xi32>
    %14 = arith.cmpi sge, %11, %13 : vector<1x32xi32>
    %c8_i32 = arith.constant 8 : i32
    %15 = vector.broadcast %c8_i32 : i32 to vector<1x32xi32>
    %16 = arith.cmpi slt, %11, %15 : vector<1x32xi32>
    %17 = arith.andi %14, %16 : vector<1x32xi1>
    %cst_9 = arith.constant 1.000000e+00 : f32
    %cst_10 = arith.constant 0.000000e+00 : f32
    %18 = vector.broadcast %cst_9 : f32 to vector<1x32xf32>
    %19 = vector.broadcast %cst_10 : f32 to vector<1x32xf32>
    %20 = arith.select %17, %18, %19 : vector<1x32xi1>, vector<1x32xf32>
    %21 = vector.broadcast %20 : vector<1x32xf32> to vector<128x32xf32>
    %22 = arith.mulf %6, %21 : vector<128x32xf32>
    "tpu.trace_start"() <{level = 10 : i32, message = "mc,nc->mn"}> : () -> ()
    %cst_11 = arith.constant dense<0.000000e+00> : vector<128x128xf32>
    %23 = tpu.matmul %22, %7, %cst_11 {dimension_numbers = #tpu.dot_dimension_numbers<[1], [1], [0], [0], [0, 0, 1, 0], [], []>} : vector<128x32xf32>, vector<128x32xf32>, vector<128x128xf32> -> vector<128x128xf32>
    "tpu.trace_stop"() : () -> ()
    %c0_12 = arith.constant 0 : index
    %c0_13 = arith.constant 0 : index
    %c0_14 = arith.constant 0 : index
    %24 = vector.load %arg7[%c0_12, %c0_13, %c0_14] : memref<4x128x128xf32, #tpu.memory_space<vmem>>, vector<1x128x128xf32>
    %25 = vector.shape_cast %24 : vector<1x128x128xf32> to vector<128x128xf32>
    %26 = arith.addf %25, %10 : vector<128x128xf32>
    %27 = arith.addf %23, %26 : vector<128x128xf32>
    %cst_15 = arith.constant dense<0xFF800000> : vector<128xf32>
    %28 = vector.multi_reduction <maximumf>, %27, %cst_15 [1] : vector<128x128xf32> to vector<128xf32>
    %29 = vector.shape_cast %28 : vector<128xf32> to vector<128x1xf32>
    %30 = vector.broadcast %29 : vector<128x1xf32> to vector<128x128xf32>
    %31 = arith.subf %27, %30 : vector<128x128xf32>
    %32 = math.exp %31 : vector<128x128xf32>
    %cst_16 = arith.constant dense<0.000000e+00> : vector<128xf32>
    %33 = vector.multi_reduction <add>, %32, %cst_16 [1] : vector<128x128xf32> to vector<128xf32>
    %34 = vector.shape_cast %33 : vector<128xf32> to vector<128x1xf32>
    %35 = tpu.reciprocal %34 {approx = true} : vector<128x1xf32> -> vector<128x1xf32>
    %36 = arith.mulf %34, %35 : vector<128x1xf32>
    %cst_17 = arith.constant 2.000000e+00 : f32
    %37 = vector.broadcast %cst_17 : f32 to vector<128x1xf32>
    %38 = arith.subf %37, %36 : vector<128x1xf32>
    %39 = arith.mulf %35, %38 : vector<128x1xf32>
    %40 = vector.broadcast %20 : vector<1x32xf32> to vector<128x32xf32>
    %41 = arith.mulf %8, %40 : vector<128x32xf32>
    %cst_18 = arith.constant dense<0.000000e+00> : vector<128x32xf32>
    %42 = tpu.matmul %32, %41, %cst_18 {dimension_numbers = #tpu.dot_dimension_numbers<[1], [0], [0], [1], [0, 0, 1, 1], [], []>} : vector<128x128xf32>, vector<128x32xf32>, vector<128x32xf32> -> vector<128x32xf32>
    %43 = vector.broadcast %39 : vector<128x1xf32> to vector<128x32xf32>
    %44 = arith.mulf %42, %43 : vector<128x32xf32>
    %45 = arith.addf %12, %44 : vector<128x32xf32>
    %c8_i32_19 = arith.constant 8 : i32
    %46 = vector.broadcast %c8_i32_19 : i32 to vector<1x32xi32>
    %47 = arith.cmpi sge, %11, %46 : vector<1x32xi32>
    %c16_i32 = arith.constant 16 : i32
    %48 = vector.broadcast %c16_i32 : i32 to vector<1x32xi32>
    %49 = arith.cmpi slt, %11, %48 : vector<1x32xi32>
    %50 = arith.andi %47, %49 : vector<1x32xi1>
    %cst_20 = arith.constant 1.000000e+00 : f32
    %cst_21 = arith.constant 0.000000e+00 : f32
    %51 = vector.broadcast %cst_20 : f32 to vector<1x32xf32>
    %52 = vector.broadcast %cst_21 : f32 to vector<1x32xf32>
    %53 = arith.select %50, %51, %52 : vector<1x32xi1>, vector<1x32xf32>
    %54 = vector.broadcast %53 : vector<1x32xf32> to vector<128x32xf32>
    %55 = arith.mulf %6, %54 : vector<128x32xf32>
    "tpu.trace_start"() <{level = 10 : i32, message = "mc,nc->mn"}> : () -> ()
    %cst_22 = arith.constant dense<0.000000e+00> : vector<128x128xf32>
    %56 = tpu.matmul %55, %7, %cst_22 {dimension_numbers = #tpu.dot_dimension_numbers<[1], [1], [0], [0], [0, 0, 1, 0], [], []>} : vector<128x32xf32>, vector<128x32xf32>, vector<128x128xf32> -> vector<128x128xf32>
    "tpu.trace_stop"() : () -> ()
    %c1 = arith.constant 1 : index
    %c0_23 = arith.constant 0 : index
    %c0_24 = arith.constant 0 : index
    %57 = vector.load %arg7[%c1, %c0_23, %c0_24] : memref<4x128x128xf32, #tpu.memory_space<vmem>>, vector<1x128x128xf32>
    %58 = vector.shape_cast %57 : vector<1x128x128xf32> to vector<128x128xf32>
    %59 = arith.addf %58, %10 : vector<128x128xf32>
    %60 = arith.addf %56, %59 : vector<128x128xf32>
    %cst_25 = arith.constant dense<0xFF800000> : vector<128xf32>
    %61 = vector.multi_reduction <maximumf>, %60, %cst_25 [1] : vector<128x128xf32> to vector<128xf32>
    %62 = vector.shape_cast %61 : vector<128xf32> to vector<128x1xf32>
    %63 = vector.broadcast %62 : vector<128x1xf32> to vector<128x128xf32>
    %64 = arith.subf %60, %63 : vector<128x128xf32>
    %65 = math.exp %64 : vector<128x128xf32>
    %cst_26 = arith.constant dense<0.000000e+00> : vector<128xf32>
    %66 = vector.multi_reduction <add>, %65, %cst_26 [1] : vector<128x128xf32> to vector<128xf32>
    %67 = vector.shape_cast %66 : vector<128xf32> to vector<128x1xf32>
    %68 = tpu.reciprocal %67 {approx = true} : vector<128x1xf32> -> vector<128x1xf32>
    %69 = arith.mulf %67, %68 : vector<128x1xf32>
    %cst_27 = arith.constant 2.000000e+00 : f32
    %70 = vector.broadcast %cst_27 : f32 to vector<128x1xf32>
    %71 = arith.subf %70, %69 : vector<128x1xf32>
    %72 = arith.mulf %68, %71 : vector<128x1xf32>
    %73 = vector.broadcast %53 : vector<1x32xf32> to vector<128x32xf32>
    %74 = arith.mulf %8, %73 : vector<128x32xf32>
    %cst_28 = arith.constant dense<0.000000e+00> : vector<128x32xf32>
    %75 = tpu.matmul %65, %74, %cst_28 {dimension_numbers = #tpu.dot_dimension_numbers<[1], [0], [0], [1], [0, 0, 1, 1], [], []>} : vector<128x128xf32>, vector<128x32xf32>, vector<128x32xf32> -> vector<128x32xf32>
    %76 = vector.broadcast %72 : vector<128x1xf32> to vector<128x32xf32>
    %77 = arith.mulf %75, %76 : vector<128x32xf32>
    %78 = arith.addf %45, %77 : vector<128x32xf32>
    %c16_i32_29 = arith.constant 16 : i32
    %79 = vector.broadcast %c16_i32_29 : i32 to vector<1x32xi32>
    %80 = arith.cmpi sge, %11, %79 : vector<1x32xi32>
    %c24_i32 = arith.constant 24 : i32
    %81 = vector.broadcast %c24_i32 : i32 to vector<1x32xi32>
    %82 = arith.cmpi slt, %11, %81 : vector<1x32xi32>
    %83 = arith.andi %80, %82 : vector<1x32xi1>
    %cst_30 = arith.constant 1.000000e+00 : f32
    %cst_31 = arith.constant 0.000000e+00 : f32
    %84 = vector.broadcast %cst_30 : f32 to vector<1x32xf32>
    %85 = vector.broadcast %cst_31 : f32 to vector<1x32xf32>
    %86 = arith.select %83, %84, %85 : vector<1x32xi1>, vector<1x32xf32>
    %87 = vector.broadcast %86 : vector<1x32xf32> to vector<128x32xf32>
    %88 = arith.mulf %6, %87 : vector<128x32xf32>
    "tpu.trace_start"() <{level = 10 : i32, message = "mc,nc->mn"}> : () -> ()
    %cst_32 = arith.constant dense<0.000000e+00> : vector<128x128xf32>
    %89 = tpu.matmul %88, %7, %cst_32 {dimension_numbers = #tpu.dot_dimension_numbers<[1], [1], [0], [0], [0, 0, 1, 0], [], []>} : vector<128x32xf32>, vector<128x32xf32>, vector<128x128xf32> -> vector<128x128xf32>
    "tpu.trace_stop"() : () -> ()
    %c2 = arith.constant 2 : index
    %c0_33 = arith.constant 0 : index
    %c0_34 = arith.constant 0 : index
    %90 = vector.load %arg7[%c2, %c0_33, %c0_34] : memref<4x128x128xf32, #tpu.memory_space<vmem>>, vector<1x128x128xf32>
    %91 = vector.shape_cast %90 : vector<1x128x128xf32> to vector<128x128xf32>
    %92 = arith.addf %91, %10 : vector<128x128xf32>
    %93 = arith.addf %89, %92 : vector<128x128xf32>
    %cst_35 = arith.constant dense<0xFF800000> : vector<128xf32>
    %94 = vector.multi_reduction <maximumf>, %93, %cst_35 [1] : vector<128x128xf32> to vector<128xf32>
    %95 = vector.shape_cast %94 : vector<128xf32> to vector<128x1xf32>
    %96 = vector.broadcast %95 : vector<128x1xf32> to vector<128x128xf32>
    %97 = arith.subf %93, %96 : vector<128x128xf32>
    %98 = math.exp %97 : vector<128x128xf32>
    %cst_36 = arith.constant dense<0.000000e+00> : vector<128xf32>
    %99 = vector.multi_reduction <add>, %98, %cst_36 [1] : vector<128x128xf32> to vector<128xf32>
    %100 = vector.shape_cast %99 : vector<128xf32> to vector<128x1xf32>
    %101 = tpu.reciprocal %100 {approx = true} : vector<128x1xf32> -> vector<128x1xf32>
    %102 = arith.mulf %100, %101 : vector<128x1xf32>
    %cst_37 = arith.constant 2.000000e+00 : f32
    %103 = vector.broadcast %cst_37 : f32 to vector<128x1xf32>
    %104 = arith.subf %103, %102 : vector<128x1xf32>
    %105 = arith.mulf %101, %104 : vector<128x1xf32>
    %106 = vector.broadcast %86 : vector<1x32xf32> to vector<128x32xf32>
    %107 = arith.mulf %8, %106 : vector<128x32xf32>
    %cst_38 = arith.constant dense<0.000000e+00> : vector<128x32xf32>
    %108 = tpu.matmul %98, %107, %cst_38 {dimension_numbers = #tpu.dot_dimension_numbers<[1], [0], [0], [1], [0, 0, 1, 1], [], []>} : vector<128x128xf32>, vector<128x32xf32>, vector<128x32xf32> -> vector<128x32xf32>
    %109 = vector.broadcast %105 : vector<128x1xf32> to vector<128x32xf32>
    %110 = arith.mulf %108, %109 : vector<128x32xf32>
    %111 = arith.addf %78, %110 : vector<128x32xf32>
    %c24_i32_39 = arith.constant 24 : i32
    %112 = vector.broadcast %c24_i32_39 : i32 to vector<1x32xi32>
    %113 = arith.cmpi sge, %11, %112 : vector<1x32xi32>
    %c32_i32 = arith.constant 32 : i32
    %114 = vector.broadcast %c32_i32 : i32 to vector<1x32xi32>
    %115 = arith.cmpi slt, %11, %114 : vector<1x32xi32>
    %116 = arith.andi %113, %115 : vector<1x32xi1>
    %cst_40 = arith.constant 1.000000e+00 : f32
    %cst_41 = arith.constant 0.000000e+00 : f32
    %117 = vector.broadcast %cst_40 : f32 to vector<1x32xf32>
    %118 = vector.broadcast %cst_41 : f32 to vector<1x32xf32>
    %119 = arith.select %116, %117, %118 : vector<1x32xi1>, vector<1x32xf32>
    %120 = vector.broadcast %119 : vector<1x32xf32> to vector<128x32xf32>
    %121 = arith.mulf %6, %120 : vector<128x32xf32>
    "tpu.trace_start"() <{level = 10 : i32, message = "mc,nc->mn"}> : () -> ()
    %cst_42 = arith.constant dense<0.000000e+00> : vector<128x128xf32>
    %122 = tpu.matmul %121, %7, %cst_42 {dimension_numbers = #tpu.dot_dimension_numbers<[1], [1], [0], [0], [0, 0, 1, 0], [], []>} : vector<128x32xf32>, vector<128x32xf32>, vector<128x128xf32> -> vector<128x128xf32>
    "tpu.trace_stop"() : () -> ()
    %c3 = arith.constant 3 : index
    %c0_43 = arith.constant 0 : index
    %c0_44 = arith.constant 0 : index
    %123 = vector.load %arg7[%c3, %c0_43, %c0_44] : memref<4x128x128xf32, #tpu.memory_space<vmem>>, vector<1x128x128xf32>
    %124 = vector.shape_cast %123 : vector<1x128x128xf32> to vector<128x128xf32>
    %125 = arith.addf %124, %10 : vector<128x128xf32>
    %126 = arith.addf %122, %125 : vector<128x128xf32>
    %cst_45 = arith.constant dense<0xFF800000> : vector<128xf32>
    %127 = vector.multi_reduction <maximumf>, %126, %cst_45 [1] : vector<128x128xf32> to vector<128xf32>
    %128 = vector.shape_cast %127 : vector<128xf32> to vector<128x1xf32>
    %129 = vector.broadcast %128 : vector<128x1xf32> to vector<128x128xf32>
    %130 = arith.subf %126, %129 : vector<128x128xf32>
    %131 = math.exp %130 : vector<128x128xf32>
    %cst_46 = arith.constant dense<0.000000e+00> : vector<128xf32>
    %132 = vector.multi_reduction <add>, %131, %cst_46 [1] : vector<128x128xf32> to vector<128xf32>
    %133 = vector.shape_cast %132 : vector<128xf32> to vector<128x1xf32>
    %134 = tpu.reciprocal %133 {approx = true} : vector<128x1xf32> -> vector<128x1xf32>
    %135 = arith.mulf %133, %134 : vector<128x1xf32>
    %cst_47 = arith.constant 2.000000e+00 : f32
    %136 = vector.broadcast %cst_47 : f32 to vector<128x1xf32>
    %137 = arith.subf %136, %135 : vector<128x1xf32>
    %138 = arith.mulf %134, %137 : vector<128x1xf32>
    %139 = vector.broadcast %119 : vector<1x32xf32> to vector<128x32xf32>
    %140 = arith.mulf %8, %139 : vector<128x32xf32>
    %cst_48 = arith.constant dense<0.000000e+00> : vector<128x32xf32>
    %141 = tpu.matmul %131, %140, %cst_48 {dimension_numbers = #tpu.dot_dimension_numbers<[1], [0], [0], [1], [0, 0, 1, 1], [], []>} : vector<128x128xf32>, vector<128x32xf32>, vector<128x32xf32> -> vector<128x32xf32>
    %142 = vector.broadcast %138 : vector<128x1xf32> to vector<128x32xf32>
    %143 = arith.mulf %141, %142 : vector<128x32xf32>
    %144 = arith.addf %111, %143 : vector<128x32xf32>
    %c0_49 = arith.constant 0 : index
    %c0_50 = arith.constant 0 : index
    %145 = vector.load %arg5[%c0_49, %c0_50] : memref<32x32xf32, #tpu.memory_space<vmem>>, vector<32x32xf32>
    %cst_51 = arith.constant dense<0.000000e+00> : vector<128x32xf32>
    %146 = tpu.matmul %144, %145, %cst_51 {dimension_numbers = #tpu.dot_dimension_numbers<[1], [0], [0], [1], [0, 0, 1, 1], [], []>} : vector<128x32xf32>, vector<32x32xf32>, vector<128x32xf32> -> vector<128x32xf32>
    %c0_52 = arith.constant 0 : index
    %c0_53 = arith.constant 0 : index
    %147 = vector.load %arg6[%c0_52, %c0_53] : memref<1x32xf32, #tpu.memory_space<vmem>>, vector<1x32xf32>
    %148 = vector.broadcast %147 : vector<1x32xf32> to vector<128x32xf32>
    %149 = arith.addf %146, %148 : vector<128x32xf32>
    %c0_54 = arith.constant 0 : index
    %c0_55 = arith.constant 0 : index
    %150 = vector.load %arg9[%c0_54, %c0_55] : memref<128x32xf32, #tpu.memory_space<vmem>>, vector<128x32xf32>
    tpu.vector_store %arg9[%c0_54, %c0_55], %149 {strides = array<i32>} : memref<128x32xf32, #tpu.memory_space<vmem>>, vector<128x32xf32>,
    return
  }
  func.func @transform_0(%arg0: i32, %arg1: i32) -> (i32, i32) {
    %c2_i32 = arith.constant 2 : i32
    %0 = arith.muli %arg0, %c2_i32 : i32
    %1 = arith.addi %0, %arg1 : i32
    %c0_i32 = arith.constant 0 : i32
    %c0_i32_0 = arith.constant 0 : i32
    return %1, %c0_i32 : i32, i32
  }
  func.func @transform_1(%arg0: i32, %arg1: i32) -> (i32, i32) {
    %c0_i32 = arith.constant 0 : i32
    %c0_i32_0 = arith.constant 0 : i32
    %c0_i32_1 = arith.constant 0 : i32
    return %c0_i32, %c0_i32_0 : i32, i32
  }
  func.func @transform_2(%arg0: i32, %arg1: i32) -> (i32, i32) {
    %c0_i32 = arith.constant 0 : i32
    %c0_i32_0 = arith.constant 0 : i32
    %c0_i32_1 = arith.constant 0 : i32
    return %c0_i32, %c0_i32_0 : i32, i32
  }
  func.func @transform_3(%arg0: i32, %arg1: i32) -> (i32, i32) {
    %c0_i32 = arith.constant 0 : i32
    %c0_i32_0 = arith.constant 0 : i32
    %c0_i32_1 = arith.constant 0 : i32
    return %c0_i32, %c0_i32_0 : i32, i32
  }
  func.func @transform_4(%arg0: i32, %arg1: i32) -> (i32, i32) {
    %c0_i32 = arith.constant 0 : i32
    %c0_i32_0 = arith.constant 0 : i32
    %c0_i32_1 = arith.constant 0 : i32
    return %c0_i32, %c0_i32_0 : i32, i32
  }
  func.func @transform_5(%arg0: i32, %arg1: i32) -> (i32, i32, i32) {
    %c0_i32 = arith.constant 0 : i32
    %c0_i32_0 = arith.constant 0 : i32
    %c0_i32_1 = arith.constant 0 : i32
    %c0_i32_2 = arith.constant 0 : i32
    return %c0_i32, %c0_i32_0, %c0_i32_1 : i32, i32, i32
  }
  func.func @transform_6(%arg0: i32, %arg1: i32) -> (i32, i32, i32) {
    %c0_i32 = arith.constant 0 : i32
    %c0_i32_0 = arith.constant 0 : i32
    %c0_i32_1 = arith.constant 0 : i32
    return %arg1, %c0_i32, %c0_i32_0 : i32, i32, i32
  }
  func.func @transform_7(%arg0: i32, %arg1: i32) -> (i32, i32) {
    %c2_i32 = arith.constant 2 : i32
    %0 = arith.muli %arg0, %c2_i32 : i32
    %1 = arith.addi %0, %arg1 : i32
    %c0_i32 = arith.constant 0 : i32
    %c0_i32_0 = arith.constant 0 : i32
    return %1, %c0_i32 : i32, i32
  }
}

</mosaic_0001>

<bundles_post_ra>
// kernel: _lambda_.1
= control target key start
LH: loop header
LB: loop body
LE: loop exit
PB: predicated region body
PF: predicated region fallthrough
CT: control target
= control target key end

     0   :  { %s5682_s24 = smov 0   ;;  %s5684_s25 = smov 0   ;;  %s7530_s0 = inlined_call_operand.vmem [shape: f32[512,32], index: 0, kind: input, shape index: {}]   ;;  %s7531_s1 = inlined_call_operand.vmem [shape: f32[32,96], index: 1, kind: input, shape index: {}]   ;;  %s7532_s2 = inlined_call_operand.vmem [shape: f32[1,96], index: 2, kind: input, shape index: {}]   ;;  %s7533_s3 = inlined_call_operand.vmem [shape: f32[32,32], index: 3, kind: input, shape index: {}]   ;;  %s7534_s4 = inlined_call_operand.vmem [shape: f32[1,32], index: 4, kind: input, shape index: {}]   ;;  %s7535_s5 = inlined_call_operand.vmem [shape: f32[4,128,128], index: 5, kind: input, shape index: {}]   ;;  %s7536_s6 = inlined_call_operand.vmem [shape: f32[2,128,128], index: 6, kind: input, shape index: {}]   ;;  %s7537_s7 = inlined_call_operand.vmem [shape: f32[512,32], index: 7, kind: output, shape index: {}]  }
   0x1   :  { %s5686_s26 = smov 0   ;;  %s5688_s27 = smov 0  }
   0x2   :  { %s5690_s28 = smov 0  }
   0x3 LB: > { %s26_s29 = sadd.s32 1, %s5629_s26  ;;  %s29_s30 = sadd.s32 1, %s5633_s27  ;;  %s5637_s28 = sphi %s5690_s28, %s17_s28   ;;  %s5633_s27 = sphi %s5688_s27, %s7757_s27   ;;  %s5629_s26 = sphi %s5686_s26, %s7756_s26   ;;  %s5625_s25 = sphi %s5684_s25, %s7755_s25   ;;  %s5621_s24 = sphi %s5682_s24, %s7754_s24  }
   0x4   : > { %p27_p0 = scmp.ge.s32.totalorder %s26_s29, 2  ;;  %p3702_p1 = scmp.ge.s32.totalorder %s5637_s28, 1 }
   0x5   : > { %p272_p2 = scmp.lt.s32.totalorder %s5637_s28, 5 }
   0x6   : > { %s7759_s29 = smov (%p27_p0, %s26_s29), 0  ;;  %s7761_s30 = smov (!%p27_p0, %s29_s30), %s5633_s27 }
   0x7   : > { %p273_p3 = pnand %p3702_p1, %p272_p2  ;;  %p31_p4 = scmp.ge.s32.totalorder %s7761_s30, 2 }
   0x9   : > { %s7763_s30 = smov (%p31_p4, %s7761_s30), 0  ;;  %276 = sbr.rel (%p273_p3) target bundleno = 2666 (0xa6a), region = 48 }
  0x10   : > { %v354_v0 = vld [vmem:[%s7531_s1] sm:$0xff]  ;;  %v355_v1 = vld [vmem:[%s7531_s1 + $0x8] sm:$0xff]  ;;  %v356_v2 = vld [vmem:[%s7531_s1 + $0x10] sm:$0xff]  ;;  %s3703_s14 = sshll.u32 %s5625_s25, 1  ;;  %vm365_vm0 = vcmask 261120   ;;  %v575_v22 = vlaneseq  ;;  %v5639_v24 = vmov 0.0  }
  0x11   : > { %v4732_v3 = vpack.c.bf16 %v355_v1, %v354_v0  ;;  %v357_v4 = vld [vmem:[%s7531_s1 + $0x18] sm:$0xff]  ;;  %s314_s17 = sadd.s32 %s5621_s24, %s3703_s14  ;;  %v3711_v28 = vld [vmem:[%s7532_s2] ss:$0 sm:$0xff]  ;;  %s5640_s8 = smov 96   ;;  %vm5843_vm11 = vmpackc.low %vm365_vm0, %vm365_vm0 }
  0x12   : > { %v4736_v5 = vpack.c.bf16 %v357_v4, %v356_v2  ;;  %s3704_s18 = sshll.u32 %s314_s17, 4  ;;  %v576_v23 = vand.u32 127, %v575_v22  ;;  %s5641_s9 = smov 64  }
  0x13   : > { %4733 = vmatprep.subr.bf16.mxu0 %v4732_v3  ;;  %p316_p5 = scmp.lt.s32.totalorder %s3704_s18, 63  ;;  %p323_p6 = scmp.lt.s32.totalorder %s5621_s24, 1 }
  0x14   : > { %4735 = vmatpush3.bf16.msra.mxu0 %v4732_v3  ;;  %vm1339_vm1 = vcmp.ge.s32.totalorder %v576_v23, 8  ;;  %vm1340_vm2 = vcmp.lt.s32.totalorder %v576_v23, 16  ;;  %vm2022_vm3 = vcmp.ge.s32.totalorder %v576_v23, 16  ;;  %vm2023_vm4 = vcmp.lt.s32.totalorder %v576_v23, 24 }
  0x15   : > { %4737 = vmatprep.subr.bf16.mxu0 %v4736_v5  ;;  %s7765_s18 = smov (!%p316_p5, %s3704_s18), 63  ;;  %vm1341_vm5 = vmand %vm1339_vm1, %vm1340_vm2  ;;  %vm2705_vm6 = vcmp.ge.s32.totalorder %v576_v23, 24  ;;  %vm2706_vm7 = vcmp.lt.s32.totalorder %v576_v23, 32  ;;  %vm578_vm10 = vcmp.lt.s32.totalorder %v576_v23, 8  ;;  %s7767_s24 = smov (!%p323_p6, %s5621_s24), 1 }
  0x16   : > { %s3705_s19 = sshll.u32 %s7765_s18, 3  ;;  %v5769_v25 = vsel %vm1341_vm5, 1.0, %v5639_v24  ;;  %vm2024_vm8 = vmand %vm2022_vm3, %vm2023_vm4  ;;  %v5780_v32 = vsel %vm578_vm10, 1.0, %v5639_v24  ;;  %s3923_s10 = sshll.u32 %s7767_s24, 7 }
  0x17   : > { %s5735_s22 = scalar_lea.vmem %s7530_s0, %s3705_s19  ;;  %v5771_v26 = vsel %vm2024_vm8, 1.0, %v5639_v24  ;;  %vm2707_vm9 = vmand %vm2705_vm6, %vm2706_vm7  ;;  %s5993_s13 = scalar_lea.vmem %s7536_s6, %s3923_s10 }
  0x18   : > { %4739 = vmatpush3.bf16.msra.mxu0 %v4736_v5  ;;  %v338_v6 = vld [vmem:[%s5735_s22] sm:$0xff]  ;;  %v339_v7 = vld [vmem:[%s5735_s22 + $0x8] sm:$0xff]  ;;  %v340_v8 = vld [vmem:[%s5735_s22 + $0x10] sm:$0xff]  ;;  %7588 = vst [vmem:[#allocation2_spill] sm:$0xff] %v5771_v26  ;;  %v5773_v27 = vsel %vm2707_vm9, 1.0, %v5639_v24 }
  0x19   : > { %4228 = vmatprep.mubr.msk.f32.mxu0 %vm365_vm0, %v338_v6  ;;  %v341_v9 = vld [vmem:[%s5735_s22 + $0x18] sm:$0xff]  ;;  %v342_v10 = vld [vmem:[%s5735_s22 + $0x20] sm:$0xff]  ;;  %v343_v11 = vld [vmem:[%s5735_s22 + $0x28] sm:$0xff]  ;;  %7589 = vst [vmem:[#allocation3_spill] sm:$0xff] %v5773_v27 }
  0x1a   : > { %v344_v12 = vld [vmem:[%s5735_s22 + $0x30] sm:$0xff]  ;;  %v345_v13 = vld [vmem:[%s5735_s22 + $0x38] sm:$0xff]  ;;  %v346_v14 = vld [vmem:[%s5735_s22 + $0x40] sm:$0xff] }
  0x1b   : > { %4229 = vmatmul.mubr.msk.f32.vlgmr.msra.gmra.mrb[0].mxu0 %vm365_vm0, %v339_v7  ;;  %v347_v15 = vld [vmem:[%s5735_s22 + $0x48] sm:$0xff]  ;;  %v348_v16 = vld [vmem:[%s5735_s22 + $0x50] sm:$0xff]  ;;  %v349_v17 = vld [vmem:[%s5735_s22 + $0x58] sm:$0xff] }
  0x1c   : > { %4231 = vmatprep.mubr.msk.f32.mxu0 %vm365_vm0, %v340_v8  ;;  %v350_v18 = vld [vmem:[%s5735_s22 + $0x60] sm:$0xff]  ;;  %v351_v19 = vld [vmem:[%s5735_s22 + $0x68] sm:$0xff]  ;;  %v352_v20 = vld [vmem:[%s5735_s22 + $0x70] sm:$0xff] }
  0x1d   : > { %v353_v21 = vld [vmem:[%s5735_s22 + $0x78] sm:$0xff]  ;;  %v6112_v27 = vld [vmem:[%s5993_s13 + $0x50] sm:$0xff]  ;;  %v610_v26 = vld [vmem:[%s7535_s5 + $0x68] sm:$0xff] }
  0x1e   : > { %7595 = vst [vmem:[#allocation7_spill] sm:$0xff] %v6112_v27 }
  0x1f   : > { %4232 = vmatmul.mubr.msk.f32.gmra.mrb[2].mxu0 %vm365_vm0, %v341_v9 }
  0x20   : > { %4234 = vmatprep.mubr.msk.f32.mxu0 %vm365_vm0, %v342_v10 }
  0x23   : > { %4235 = vmatmul.mubr.msk.f32.gmra.mrb[4].mxu0 %vm365_vm0, %v343_v11 }
  0x24   : > { %4237 = vmatprep.mubr.msk.f32.mxu0 %vm365_vm0, %v344_v12 }
  0x27   : > { %4238 = vmatmul.mubr.msk.f32.gmra.mrb[6].mxu0 %vm365_vm0, %v345_v13 }
  0x28   : > { %4240 = vmatprep.mubr.msk.f32.mxu0 %vm365_vm0, %v346_v14 }
  0x2b   : > { %4241 = vmatmul.mubr.msk.f32.gmra.mrb[8].mxu0 %vm365_vm0, %v347_v15 }
  0x2c   : > { %4243 = vmatprep.mubr.msk.f32.mxu0 %vm365_vm0, %v348_v16 }
  0x2f   : > { %4244 = vmatmul.mubr.msk.f32.gmra.mrb[10].mxu0 %vm365_vm0, %v349_v17 }
  0x30   : > { %4246 = vmatprep.mubr.msk.f32.mxu0 %vm365_vm0, %v350_v18 }
  0x33   : > { %4247 = vmatmul.mubr.msk.f32.gmra.mrb[12].mxu0 %vm365_vm0, %v351_v19 }
  0x34   : > { %4249 = vmatprep.mubr.msk.f32.mxu0 %vm365_vm0, %v352_v20 }
  0x37   : > { %4250 = vmatmul.mubr.msk.f32.gmra.mrb[14].mxu0 %vm365_vm0, %v353_v21 }
  0xee   : > { %v4230_v29 = vpop.f32.mrb[0].mxu0 }
  0xef   : > { %v5778_v30 = vadd.f32 %v4230_v29, %v3711_v28  ;;  %v480_v31 = vpop.f32.mrb[1].mxu0 }
  0xf0   : > { %v5782_v33 = vadd.f32 %v3711_v28, %v480_v31 }
  0xf2   : > { %v5127_v34 = vpack.i.bf16 %v5778_v30, %v5782_v33  ;;  %v581_v35 = vmul.f32 %v5780_v32, %v5782_v33  ;;  %v4233_v36 = vpop.f32.mrb[2].mxu0 }
  0xf3   : > { %v5788_v37 = vadd.f32 %v4233_v36, %v3711_v28  ;;  %v490_v38 = vpop.f32.mrb[3].mxu0 }
  0xf4   : > { %5128 = vrot.lane.b32.xlu0 %v5127_v34, %s5640_s8  ;;  %4284 = vmatprep.mubr.msk.f32.mxu1 %vm365_vm0, %v581_v35  ;;  %v5792_v39 = vadd.f32 %v3711_v28, %v490_v38 }
  0xf6   : > { %v5132_v40 = vpack.i.bf16 %v5788_v37, %v5792_v39  ;;  %v4236_v41 = vpop.f32.mrb[4].mxu0 }
  0xf7   : > { %v5796_v42 = vadd.f32 %v4236_v41, %v3711_v28  ;;  %v500_v43 = vpop.f32.mrb[5].mxu0 }
  0xf8   : > { %5133 = vrot.lane.b32.xlu0 %v5132_v40, %s5640_s8  ;;  %v5799_v44 = vadd.f32 %v3711_v28, %v500_v43 }
  0xfa   : > { %v4239_v45 = vpop.f32.mrb[6].mxu0  ;;  %v5137_v46 = vpack.i.bf16 %v5796_v42, %v5799_v44 }
  0xfb   : > { %v5803_v47 = vadd.f32 %v4239_v45, %v3711_v28  ;;  %v510_v48 = vpop.f32.mrb[7].mxu0 }
  0xfc   : > { %v5805_v49 = vadd.f32 %v3711_v28, %v510_v48  ;;  %5138 = vrot.lane.b32.xlu1 %v5137_v46, %s5640_s8 }
  0xfe   : > { %v4242_v50 = vpop.f32.mrb[8].mxu0  ;;  %v5142_v51 = vpack.i.bf16 %v5803_v47, %v5805_v49 }
  0xff   : > { %v5810_v52 = vadd.f32 %v4242_v50, %v3711_v28  ;;  %v520_v53 = vpop.f32.mrb[9].mxu0 }
 0x100   : > { %v5812_v54 = vadd.f32 %v3711_v28, %v520_v53  ;;  %5143 = vrot.lane.b32.xlu1 %v5142_v51, %s5640_s8 }
 0x102   : > { %v4245_v55 = vpop.f32.mrb[10].mxu0  ;;  %v5147_v56 = vpack.i.bf16 %v5810_v52, %v5812_v54 }
 0x103   : > { %v5817_v57 = vadd.f32 %v4245_v55, %v3711_v28  ;;  %v530_v58 = vpop.f32.mrb[11].mxu0 }
 0x104   : > { %v5819_v59 = vadd.f32 %v3711_v28, %v530_v58  ;;  %5148 = vrot.lane.b32.xlu0 %v5147_v56, %s5640_s8 }
 0x106   : > { %v4248_v60 = vpop.f32.mrb[12].mxu0  ;;  %v5152_v61 = vpack.i.bf16 %v5817_v57, %v5819_v59 }
 0x107   : > { %v5824_v62 = vadd.f32 %v4248_v60, %v3711_v28  ;;  %v540_v63 = vpop.f32.mrb[13].mxu0 }
 0x108   : > { %v5826_v0 = vadd.f32 %v3711_v28, %v540_v63  ;;  %5153 = vrot.lane.b32.xlu1 %v5152_v61, %s5640_s8 }
 0x10a   : > { %v5157_v1 = vpack.i.bf16 %v5824_v62, %v5826_v0  ;;  %v4251_v2 = vpop.f32.mrb[14].mxu0 }
 0x10b   : > { %v5831_v3 = vadd.f32 %v4251_v2, %v3711_v28  ;;  %v550_v4 = vpop.f32.mrb[15].mxu0 }
 0x10c   : > { %5158 = vrot.lane.b32.xlu0 %v5157_v1, %s5640_s8  ;;  %v5834_v5 = vadd.f32 %v3711_v28, %v550_v4 }
 0x10e   : > { %v5162_v6 = vpack.i.bf16 %v5831_v3, %v5834_v5 }
 0x110   : > { %1079 = vrot.lane.b32.xlu0 %v5780_v32, %s5641_s9  ;;  %5163 = vrot.lane.b32.xlu1 %v5162_v6, %s5640_s8  ;;  %s7481_s8 = scalar_lea.vmem %s7537_s7, %s3705_s19 }
 0x166   : > { %v5129_v7 = vpop.permute.xlu0 %5128 }
 0x167   : > { %v5131_v8 = vunpack.i.h.bf16 %v5129_v7  ;;  %v5130_v9 = vunpack.i.l.bf16 %v5129_v7 }
 0x169   : > { %v5847_v11 = vpack.c.bf16 %v5131_v8, %v5130_v9 }
 0x16a   : > { %v5134_v12 = vpop.permute.xlu0 %5133 }
 0x16b   : > { %4742 = vmatprep.subr.msk.bf16.mxu1 %vm5843_vm11, %v5847_v11  ;;  %v5136_v13 = vunpack.i.h.bf16 %v5134_v12  ;;  %v5135_v14 = vunpack.i.l.bf16 %v5134_v12 }
 0x16c   : > { %4745 = vmatpush3.bf16.xpose.msk.msra.mxu1 %vm5843_vm11, %v5847_v11 }
 0x16d   : > { %v5855_v15 = vpack.c.bf16 %v5136_v13, %v5135_v14 }
 0x16e   : > { %v5139_v16 = vpop.permute.xlu1 %5138 }
 0x16f   : > { %4748 = vmatprep.subr.msk.bf16.mxu1 %vm5843_vm11, %v5855_v15  ;;  %v5141_v17 = vunpack.i.h.bf16 %v5139_v16  ;;  %v5140_v18 = vunpack.i.l.bf16 %v5139_v16 }
 0x171   : > { %v5860_v19 = vpack.c.bf16 %v5141_v17, %v5140_v18  ;;  %v582_v18 = vmul.f32 %v5780_v32, %v5778_v30 }
 0x172   : > { %v5144_v20 = vpop.permute.xlu1 %5143 }
 0x173   : > { %v5146_v21 = vunpack.i.h.bf16 %v5144_v20  ;;  %v5145_v22 = vunpack.i.l.bf16 %v5144_v20  ;;  %v583_v20 = vmul.f32 %v5780_v32, %v5792_v39 }
 0x174   : > { %4751 = vmatpush3.bf16.xpose.msk.msra.mxu1 %vm5843_vm11, %v5855_v15 }
 0x175   : > { %4754 = vmatprep.subr.msk.bf16.mxu1 %vm5843_vm11, %v5860_v19  ;;  %v5868_v24 = vpack.c.bf16 %v5146_v21, %v5145_v22  ;;  %v584_v21 = vmul.f32 %v5780_v32, %v5788_v37  ;;  %v585_v22 = vmul.f32 %v5780_v32, %v5799_v44 }
 0x176   : > { %v5149_v23 = vpop.permute.xlu0 %5148 }
 0x177   : > { %v5151_v28 = vunpack.i.h.bf16 %v5149_v23  ;;  %v5150_v29 = vunpack.i.l.bf16 %v5149_v23  ;;  %v586_v23 = vmul.f32 %v5780_v32, %v5796_v42 }
 0x179   : > { %v5876_v34 = vpack.c.bf16 %v5151_v28, %v5150_v29  ;;  %v587_v28 = vmul.f32 %v5780_v32, %v5805_v49  ;;  %v588_v29 = vmul.f32 %v5780_v32, %v5803_v47 }
 0x17a   : > { %v5154_v35 = vpop.permute.xlu1 %5153 }
 0x17b   : > { %v5156_v48 = vunpack.i.h.bf16 %v5154_v35  ;;  %v5155_v50 = vunpack.i.l.bf16 %v5154_v35  ;;  %v590_v35 = vmul.f32 %v5780_v32, %v5810_v52 }
 0x17c   : > { %4757 = vmatpush3.bf16.xpose.msk.msra.mxu1 %vm5843_vm11, %v5860_v19 }
 0x17d   : > { %4760 = vmatprep.subr.msk.bf16.mxu1 %vm5843_vm11, %v5868_v24  ;;  %v5904_v58 = vpack.c.bf16 %v5156_v48, %v5155_v50 }
 0x17e   : > { %v5159_v31 = vpop.permute.xlu0 %5158 }
 0x17f   : > { %v5161_v6 = vunpack.i.h.bf16 %v5159_v31  ;;  %v5160_v7 = vunpack.i.l.bf16 %v5159_v31  ;;  %v589_v31 = vmul.f32 %v5780_v32, %v5812_v54 }
 0x181   : > { %v5924_v12 = vpack.c.bf16 %v5161_v6, %v5160_v7 }
 0x182   : > { %v5878_v36 = vpop.permute.xlu0 %1079  ;;  %v5164_v13 = vpop.permute.xlu1 %5163 }
 0x183   : > { %v1084_v38 = vmul.f32 %v5878_v36, %v5792_v39  ;;  %v1085_v40 = vmul.f32 %v5878_v36, %v5788_v37  ;;  %v1082_v41 = vmul.f32 %v5878_v36, %v5782_v33  ;;  %v1083_v43 = vmul.f32 %v5878_v36, %v5778_v30 }
 0x184   : > { %4763 = vmatpush3.bf16.xpose.msk.msra.mxu1 %vm5843_vm11, %v5868_v24  ;;  %v1088_v45 = vmul.f32 %v5878_v36, %v5805_v49  ;;  %v1089_v46 = vmul.f32 %v5878_v36, %v5803_v47  ;;  %v1086_v55 = vmul.f32 %v5878_v36, %v5799_v44  ;;  %v1087_v56 = vmul.f32 %v5878_v36, %v5796_v42 }
 0x185   : > { %v5172_v51 = vpack.i.bf16 %v1085_v40, %v1084_v38  ;;  %v5167_v53 = vpack.i.bf16 %v1083_v43, %v1082_v41  ;;  %4766 = vmatprep.subr.msk.bf16.mxu1 %vm5843_vm11, %v5876_v34  ;;  %v1092_v60 = vmul.f32 %v5878_v36, %v5819_v59  ;;  %v1093_v61 = vmul.f32 %v5878_v36, %v5817_v57 }
 0x186   : > { %v5182_v63 = vpack.i.bf16 %v1089_v46, %v1088_v45  ;;  %v5177_v1 = vpack.i.bf16 %v1087_v56, %v1086_v55  ;;  %v1090_v2 = vmul.f32 %v5878_v36, %v5812_v54  ;;  %v1091_v4 = vmul.f32 %v5878_v36, %v5810_v52 }
 0x187   : > { %5173 = vrot.lane.b32.xlu0 %v5172_v51, %s5641_s9  ;;  %5168 = vrot.lane.b32.xlu1 %v5167_v53, %s5641_s9  ;;  %v5192_v8 = vpack.i.bf16 %v1093_v61, %v1092_v60  ;;  %v5166_v14 = vunpack.i.h.bf16 %v5164_v13  ;;  %v5165_v16 = vunpack.i.l.bf16 %v5164_v13  ;;  %v591_v38 = vmul.f32 %v5780_v32, %v5819_v59 }
 0x188   : > { %v5187_v9 = vpack.i.bf16 %v1091_v4, %v1090_v2  ;;  %v592_v40 = vmul.f32 %v5780_v32, %v5817_v57  ;;  %v593_v41 = vmul.f32 %v5780_v32, %v5826_v0  ;;  %v594_v43 = vmul.f32 %v5780_v32, %v5824_v62 }
 0x189   : > { %v5932_v17 = vpack.c.bf16 %v5166_v14, %v5165_v16  ;;  %v595_v45 = vmul.f32 %v5780_v32, %v5834_v5  ;;  %v596_v46 = vmul.f32 %v5780_v32, %v5831_v3 }
 0x18b   : > { %5183 = vrot.lane.b32.xlu0 %v5182_v63, %s5641_s9  ;;  %5178 = vrot.lane.b32.xlu1 %v5177_v1, %s5641_s9 }
 0x18c   : > { %4769 = vmatpush3.bf16.xpose.msk.msra.mxu1 %vm5843_vm11, %v5876_v34 }
 0x18d   : > { %4772 = vmatprep.subr.msk.bf16.mxu1 %vm5843_vm11, %v5904_v58 }
 0x18f   : > { %5193 = vrot.lane.b32.xlu0 %v5192_v8, %s5641_s9  ;;  %5188 = vrot.lane.b32.xlu1 %v5187_v9, %s5641_s9 }
 0x194   : > { %4775 = vmatpush3.bf16.xpose.msk.msra.mxu1 %vm5843_vm11, %v5904_v58 }
 0x195   : > { %4778 = vmatprep.subr.msk.bf16.mxu1 %vm5843_vm11, %v5924_v12 }
 0x19c   : > { %4781 = vmatpush3.bf16.xpose.msk.msra.mxu1 %vm5843_vm11, %v5924_v12 }
 0x19d   : > { %4784 = vmatprep.subr.msk.bf16.mxu1 %vm5843_vm11, %v5932_v17 }
 0x1a4   : > { %4787 = vmatpush3.bf16.xpose.msk.msra.mxu1 %vm5843_vm11, %v5932_v17 }
 0x1ab   : > { %4285 = vmatmul.mubr.msk.f32.vlgmr.msra.gmra.mrb[0].mxu1 %vm365_vm0, %v582_v18 }
 0x1ac   : > { %4287 = vmatprep.mubr.msk.f32.mxu1 %vm365_vm0, %v583_v20 }
 0x1af   : > { %4288 = vmatmul.mubr.msk.f32.gmra.mrb[2].mxu1 %vm365_vm0, %v584_v21 }
 0x1b0   : > { %4290 = vmatprep.mubr.msk.f32.mxu1 %vm365_vm0, %v585_v22 }
 0x1b3   : > { %4291 = vmatmul.mubr.msk.f32.gmra.mrb[4].mxu1 %vm365_vm0, %v586_v23  ;;  %v5996_v23 = vld [vmem:[%s5993_s13 + $0x8] sm:$0xff] }
 0x1b4   : > { %4293 = vmatprep.mubr.msk.f32.mxu1 %vm365_vm0, %v587_v28  ;;  %v598_v28 = vld [vmem:[%s7535_s5 + $0x8] sm:$0xff] }
 0x1b7   : > { %4294 = vmatmul.mubr.msk.f32.gmra.mrb[6].mxu1 %vm365_vm0, %v588_v29  ;;  %v6002_v29 = vld [vmem:[%s5993_s13] sm:$0xff] }
 0x1b8   : > { %4296 = vmatprep.mubr.msk.f32.mxu1 %vm365_vm0, %v589_v31  ;;  %v597_v31 = vld [vmem:[%s7535_s5] sm:$0xff] }
 0x1bb   : > { %4297 = vmatmul.mubr.msk.f32.gmra.mrb[8].mxu1 %vm365_vm0, %v590_v35  ;;  %v614_v35 = vadd.f32 %v598_v28, %v5996_v23  ;;  %v6048_v28 = vld [vmem:[%s5993_s13 + $0x28] sm:$0xff] }
 0x1bc   : > { %4299 = vmatprep.mubr.msk.f32.mxu1 %vm365_vm0, %v591_v38  ;;  %v613_v38 = vadd.f32 %v597_v31, %v6002_v29  ;;  %v602_v31 = vld [vmem:[%s7535_s5 + $0x28] sm:$0xff] }
 0x1bf   : > { %4300 = vmatmul.mubr.msk.f32.gmra.mrb[10].mxu1 %vm365_vm0, %v592_v40 }
 0x1c0   : > { %4302 = vmatprep.mubr.msk.f32.mxu1 %vm365_vm0, %v593_v41 }
 0x1c3   : > { %4303 = vmatmul.mubr.msk.f32.gmra.mrb[12].mxu1 %vm365_vm0, %v594_v43 }
 0x1c4   : > { %4305 = vmatprep.mubr.msk.f32.mxu1 %vm365_vm0, %v595_v45 }
 0x1c7   : > { %4306 = vmatmul.mubr.msk.f32.gmra.mrb[14].mxu1 %vm365_vm0, %v596_v46 }
 0x1f9   : > { %v5174_v48 = vpop.permute.xlu0 %5173  ;;  %v5169_v50 = vpop.permute.xlu1 %5168 }
 0x1fa   : > { %v5176_v51 = vunpack.i.h.bf16 %v5174_v48  ;;  %v5175_v53 = vunpack.i.l.bf16 %v5174_v48  ;;  %v5171_v55 = vunpack.i.h.bf16 %v5169_v50  ;;  %v5170_v56 = vunpack.i.l.bf16 %v5169_v50 }
 0x1fc   : > { %v4788_v60 = vpack.c.bf16 %v5171_v55, %v5170_v56  ;;  %v4792_v2 = vpack.c.bf16 %v5176_v51, %v5175_v53  ;;  %v1094_v56 = vmul.f32 %v5878_v36, %v5826_v0 }
 0x1fd   : > { %v5179_v61 = vpop.permute.xlu1 %5178  ;;  %v5184_v4 = vpop.permute.xlu0 %5183 }
 0x1fe   : > { %v5181_v63 = vunpack.i.h.bf16 %v5179_v61  ;;  %v5180_v1 = vunpack.i.l.bf16 %v5179_v61  ;;  %4789 = vmatprep.subr.bf16.mxu0 %v4788_v60  ;;  %v5186_v6 = vunpack.i.h.bf16 %v5184_v4  ;;  %v5185_v7 = vunpack.i.l.bf16 %v5184_v4 }
 0x1ff   : > { %4791 = vmatpush3.bf16.msra.mxu0 %v4788_v60  ;;  %v1095_v60 = vmul.f32 %v5878_v36, %v5824_v62  ;;  %v1096_v4 = vmul.f32 %v5878_v36, %v5834_v5 }
 0x200   : > { %4793 = vmatprep.subr.bf16.mxu0 %v4792_v2  ;;  %v4796_v32 = vpack.c.bf16 %v5181_v63, %v5180_v1  ;;  %v4800_v14 = vpack.c.bf16 %v5186_v6, %v5185_v7  ;;  %v1097_v6 = vmul.f32 %v5878_v36, %v5831_v3  ;;  %v599_v36 = vld [vmem:[%s7535_s5 + $0x10] sm:$0xff] }
 0x201   : > { %v5189_v8 = vpop.permute.xlu1 %5188  ;;  %v5194_v16 = vpop.permute.xlu0 %5193  ;;  %v5197_v1 = vpack.i.bf16 %v1095_v60, %v1094_v56 }
 0x202   : > { %v5191_v9 = vunpack.i.h.bf16 %v5189_v8  ;;  %v5190_v13 = vunpack.i.l.bf16 %v5189_v8  ;;  %v5196_v18 = vunpack.i.h.bf16 %v5194_v16  ;;  %v5195_v20 = vunpack.i.l.bf16 %v5194_v16  ;;  %v6034_v16 = vld [vmem:[%s5993_s13 + $0x10] sm:$0xff] }
 0x203   : > { %4795 = vmatpush3.bf16.msra.mxu0 %v4792_v2  ;;  %v5202_v8 = vpack.i.bf16 %v1097_v6, %v1096_v4  ;;  %v604_v4 = vld [vmem:[%s7535_s5 + $0x38] sm:$0xff]  ;;  %v6072_v6 = vld [vmem:[%s5993_s13 + $0x30] sm:$0xff] }
 0x204   : > { %4797 = vmatprep.subr.bf16.mxu0 %v4796_v32  ;;  %v4804_v21 = vpack.c.bf16 %v5191_v9, %v5190_v13  ;;  %v4808_v22 = vpack.c.bf16 %v5196_v18, %v5195_v20  ;;  %v6040_v18 = vld [vmem:[%s5993_s13 + $0x18] sm:$0xff] }
 0x205   : > { %v600_v20 = vld [vmem:[%s7535_s5 + $0x18] sm:$0xff] }
 0x207   : > { %4799 = vmatpush3.bf16.msra.mxu0 %v4796_v32 }
 0x208   : > { %4801 = vmatprep.subr.bf16.mxu0 %v4800_v14 }
 0x20b   : > { %4803 = vmatpush3.bf16.msra.mxu0 %v4800_v14 }
 0x20c   : > { %4805 = vmatprep.subr.bf16.mxu0 %v4804_v21 }
 0x20f   : > { %4807 = vmatpush3.bf16.msra.mxu0 %v4804_v21  ;;  %v615_v21 = vadd.f32 %v599_v36, %v6034_v16 }
 0x210   : > { %4809 = vmatprep.subr.bf16.mxu0 %v4808_v22 }
 0x213   : > { %4811 = vmatpush3.bf16.msra.mxu0 %v4808_v22  ;;  %v616_v22 = vadd.f32 %v600_v20, %v6040_v18 }
 0x27e   : > { %v4286_v40 = vpop.f32.mrb[0].mxu1 }
 0x27f   : > { %v6009_v41 = vadd.f32 %v4286_v40, %v614_v35  ;;  %v823_v43 = vpop.f32.mrb[1].mxu1  ;;  %v6054_v35 = vld [vmem:[%s5993_s13 + $0x20] sm:$0xff] }
 0x280   : > { %v6011_v45 = vadd.f32 %v823_v43, %v613_v38  ;;  %v601_v38 = vld [vmem:[%s7535_s5 + $0x20] sm:$0xff]  ;;  %v618_v43 = vadd.f32 %v602_v31, %v6048_v28 }
 0x281   : > { %904 = vmax.xlane.f32.xlu1 %v6009_v41  ;;  %v617_v60 = vadd.f32 %v601_v38, %v6054_v35  ;;  %v6092_v31 = vld [vmem:[%s5993_s13 + $0x40] sm:$0xff] }
 0x282   : > { %v4289_v46 = vpop.f32.mrb[2].mxu1  ;;  %902 = vmax.xlane.f32.xlu0 %v6011_v45 }
 0x283   : > { %v833_v48 = vpop.f32.mrb[3].mxu1  ;;  %v6062_v56 = vadd.f32 %v4289_v46, %v616_v22  ;;  %v606_v22 = vld [vmem:[%s7535_s5 + $0x48] sm:$0xff] }
 0x284   : > { %v6059_v40 = vadd.f32 %v833_v48, %v615_v21  ;;  %v603_v48 = vld [vmem:[%s7535_s5 + $0x30] sm:$0xff]  ;;  %v6086_v21 = vld [vmem:[%s5993_s13 + $0x48] sm:$0xff] }
 0x285   : > { %v619_v20 = vadd.f32 %v603_v48, %v6072_v6  ;;  %7593 = vst [vmem:[#allocation5_spill] sm:$0xff] %v6086_v21  ;;  %v622_v38 = vadd.f32 %v606_v22, %v6086_v21  ;;  %v608_v48 = vld [vmem:[%s7535_s5 + $0x58] sm:$0xff]  ;;  %v6132_v21 = vld [vmem:[%s5993_s13 + $0x60] sm:$0xff] }
 0x286   : > { %v4292_v50 = vpop.f32.mrb[4].mxu1  ;;  %7597 = vst [vmem:[#allocation9_spill] sm:$0xff] %v6132_v21 }
 0x287   : > { %v843_v51 = vpop.f32.mrb[5].mxu1  ;;  %v6079_v46 = vadd.f32 %v4292_v50, %v618_v43  ;;  %v605_v50 = vld [vmem:[%s7535_s5 + $0x40] sm:$0xff] }
 0x288   : > { %v6082_v36 = vadd.f32 %v843_v51, %v617_v60  ;;  %v621_v60 = vadd.f32 %v605_v50, %v6092_v31  ;;  %v6126_v50 = vld [vmem:[%s5993_s13 + $0x68] sm:$0xff] }
 0x289   : > { %7596 = vst [vmem:[#allocation8_spill] sm:$0xff] %v6126_v50 }
 0x28a   : > { %v4295_v53 = vpop.f32.mrb[6].mxu1 }
 0x28b   : > { %v853_v55 = vpop.f32.mrb[7].mxu1 }
 0x28c   : > { %v6102_v43 = vadd.f32 %v853_v55, %v619_v20 }
 0x28e   : > { %v4298_v61 = vpop.f32.mrb[8].mxu1 }
 0x28f   : > { %v863_v63 = vpop.f32.mrb[9].mxu1  ;;  %v6119_v55 = vadd.f32 %v4298_v61, %v622_v38  ;;  %v609_v61 = vld [vmem:[%s7535_s5 + $0x60] sm:$0xff]  ;;  %v626_v38 = vadd.f32 %v610_v26, %v6126_v50 }
 0x290   : > { %v6122_v20 = vadd.f32 %v863_v63, %v621_v60 }
 0x292   : > { %5198 = vrot.lane.b32.xlu1 %v5197_v1, %s5641_s9  ;;  %v4301_v2 = vpop.f32.mrb[10].mxu1  ;;  %v6066_v1 = vld [vmem:[%s5993_s13 + $0x38] sm:$0xff] }
 0x293   : > { %v873_v7 = vpop.f32.mrb[11].mxu1  ;;  %7592 = vst [vmem:[#allocation4_spill] sm:$0xff] %v6066_v1 }
 0x296   : > { %v6024_v32 = vpop.f32.mrb[12].mxu1 }
 0x297   : > { %v6026_v9 = vpop.f32.mrb[13].mxu1  ;;  %v6160_v26 = vadd.f32 %v6024_v32, %v626_v38 }
 0x298   : > { %5203 = vrot.lane.b32.xlu0 %v5202_v8, %s5641_s9  ;;  %v620_v8 = vadd.f32 %v604_v4, %v6066_v1  ;;  %v6106_v4 = vld [vmem:[%s5993_s13 + $0x58] sm:$0xff]  ;;  %v611_v1 = vld [vmem:[%s7535_s5 + $0x70] sm:$0xff] }
 0x299   : > { %7594 = vst [vmem:[#allocation6_spill] sm:$0xff] %v6106_v4 }
 0x29a   : > { %v6029_v13 = vpop.f32.mrb[14].mxu1  ;;  %v6099_v51 = vadd.f32 %v4295_v53, %v620_v8  ;;  %v607_v53 = vld [vmem:[%s7535_s5 + $0x50] sm:$0xff]  ;;  %v624_v8 = vadd.f32 %v608_v48, %v6106_v4  ;;  %v625_v48 = vadd.f32 %v609_v61, %v6132_v21  ;;  %v612_v4 = vld [vmem:[%s7535_s5 + $0x78] sm:$0xff] }
 0x29b   : > { %v6031_v14 = vpop.f32.mrb[15].mxu1  ;;  %v623_v22 = vadd.f32 %v607_v53, %v6112_v27  ;;  %v6146_v53 = vld [vmem:[%s5993_s13 + $0x78] sm:$0xff]  ;;  %v6152_v27 = vld [vmem:[%s5993_s13 + $0x70] sm:$0xff] }
 0x29c   : > { %v6139_v63 = vadd.f32 %v4301_v2, %v624_v8  ;;  %7598 = vst [vmem:[#allocation10_spill] sm:$0xff] %v6146_v53  ;;  %7599 = vst [vmem:[#allocation11_spill] sm:$0xff] %v6152_v27  ;;  %v628_v2 = vadd.f32 %v612_v4, %v6146_v53  ;;  %v627_v8 = vadd.f32 %v611_v1, %v6152_v27 }
 0x29d   : > { %v6142_v60 = vadd.f32 %v873_v7, %v623_v22  ;;  %v6164_v7 = vadd.f32 %v6026_v9, %v625_v48 }
 0x29e   : > { %v6170_v22 = vadd.f32 %v6029_v13, %v628_v2  ;;  %v6173_v61 = vadd.f32 %v6031_v14, %v627_v8 }
 0x2b6   : > { %906 = vmax.xlane.f32.xlu1 %v6059_v40 }
 0x2b7   : > { %908 = vmax.xlane.f32.xlu0 %v6062_v56 }
 0x2ba   : > { %912 = vmax.xlane.f32.xlu1 %v6079_v46 }
 0x2bb   : > { %910 = vmax.xlane.f32.xlu0 %v6082_v36 }
 0x2be   : > { %916 = vmax.xlane.f32.xlu1 %v6099_v51 }
 0x2bf   : > { %914 = vmax.xlane.f32.xlu0 %v6102_v43 }
 0x2c2   : > { %920 = vmax.xlane.f32.xlu1 %v6119_v55 }
 0x2c3   : > { %918 = vmax.xlane.f32.xlu0 %v6122_v20 }
 0x2c6   : > { %924 = vmax.xlane.f32.xlu1 %v6139_v63 }
 0x2c7   : > { %922 = vmax.xlane.f32.xlu0 %v6142_v60 }
 0x2ca   : > { %928 = vmax.xlane.f32.xlu1 %v6160_v26 }
 0x2cb   : > { %926 = vmax.xlane.f32.xlu0 %v6164_v7 }
 0x2ce   : > { %932 = vmax.xlane.f32.xlu1 %v6170_v22 }
 0x2cf   : > { %930 = vmax.xlane.f32.xlu0 %v6173_v61 }
 0x2e5   : > { %1762 = vrot.lane.b32.xlu0 %v5769_v25, %s5641_s9 }
 0x30e   : > { %v905_v32 = vpop.xlane.xlu1 %904 }
 0x30f   : > { %v935_v9 = vsub.f32 %v6009_v41, %v905_v32  ;;  %v903_v1 = vpop.xlane.xlu0 %902 }
 0x310   : > { %v934_v4 = vsub.f32 %v6011_v45, %v903_v1 }
 0x311   : > { %v952_v38 = vmul.f32 1.442695, %v935_v9 }
 0x312   : > { %v950_v48 = vmul.f32 1.442695, %v934_v4  ;;  %v5199_v13 = vpop.permute.xlu1 %5198 }
 0x313   : > { %v5201_v2 = vunpack.i.h.bf16 %v5199_v13  ;;  %v5200_v53 = vunpack.i.l.bf16 %v5199_v13  ;;  %v5204_v14 = vpop.permute.xlu0 %5203 }
 0x314   : > { %5327 = vpow2.f32 %v950_v48  ;;  %v5206_v8 = vunpack.i.h.bf16 %v5204_v14  ;;  %v5205_v50 = vunpack.i.l.bf16 %v5204_v14 }
 0x315   : > { %5329 = vpow2.f32 %v952_v38  ;;  %v4812_v27 = vpack.c.bf16 %v5201_v2, %v5200_v53 }
 0x316   : > { %v4816_v21 = vpack.c.bf16 %v5206_v8, %v5205_v50 }
 0x317   : > { %4813 = vmatprep.subr.bf16.mxu0 %v4812_v27 }
 0x318   : > { %4815 = vmatpush3.bf16.msra.mxu0 %v4812_v27 }
 0x319   : > { %4817 = vmatprep.subr.bf16.mxu0 %v4816_v21 }
 0x31c   : > { %4819 = vmatpush3.bf16.msra.mxu0 %v4816_v21 }
 0x31d   : > { %4822 = vmatprep.subr.msk.bf16.mxu0 %vm5843_vm11, %v5847_v11 }
 0x31e   : > { %v6184_v41 = vpop.eup %5327 }
 0x31f   : > { %7600 = vst [vmem:[#allocation12_spill] sm:$0xff] %v6184_v41  ;;  %v6186_v45 = vpop.eup %5329  ;;  %4340 = vmatprep.mubr.f32.mxu0 %v6184_v41  ;;  %v3823_v41 = vld [vmem:[%s7535_s5 + $0x178] sm:$0xff] }
 0x320   : > { %7601 = vst [vmem:[#allocation13_spill] sm:$0xff] %v6186_v45  ;;  %4341 = vmatmul.mubr.f32.vlgmr.msra.gmra.mrb[16].mxu0 %v6186_v45  ;;  %v3821_v45 = vld [vmem:[%s7535_s5 + $0x168] sm:$0xff] }
 0x325   : > { %4825 = vmatpush3.bf16.xpose.msk.msra.mxu0 %vm5843_vm11, %v5847_v11 }
 0x326   : > { %4828 = vmatprep.subr.msk.bf16.mxu0 %vm5843_vm11, %v5855_v15 }
 0x32d   : > { %4831 = vmatpush3.bf16.xpose.msk.msra.mxu0 %vm5843_vm11, %v5855_v15 }
 0x32e   : > { %4834 = vmatprep.subr.msk.bf16.mxu0 %vm5843_vm11, %v5860_v19 }
 0x335   : > { %4837 = vmatpush3.bf16.xpose.msk.msra.mxu0 %vm5843_vm11, %v5860_v19 }
 0x336   : > { %4840 = vmatprep.subr.msk.bf16.mxu0 %vm5843_vm11, %v5868_v24 }
 0x33d   : > { %4843 = vmatpush3.bf16.xpose.msk.msra.mxu0 %vm5843_vm11, %v5868_v24 }
 0x33e   : > { %4846 = vmatprep.subr.msk.bf16.mxu0 %vm5843_vm11, %v5876_v34 }
 0x343   : > { %v907_v27 = vpop.xlane.xlu1 %906 }
 0x344   : > { %v936_v21 = vsub.f32 %v6059_v40, %v907_v27  ;;  %v909_v50 = vpop.xlane.xlu0 %908 }
 0x345   : > { %v937_v53 = vsub.f32 %v6062_v56, %v909_v50  ;;  %4849 = vmatpush3.bf16.xpose.msk.msra.mxu0 %vm5843_vm11, %v5876_v34 }
 0x346   : > { %v954_v32 = vmul.f32 1.442695, %v936_v21  ;;  %4852 = vmatprep.subr.msk.bf16.mxu0 %vm5843_vm11, %v5904_v58 }
 0x347   : > { %v956_v9 = vmul.f32 1.442695, %v937_v53  ;;  %v913_v1 = vpop.xlane.xlu1 %912 }
 0x348   : > { %5331 = vpow2.f32 %v954_v32  ;;  %v939_v4 = vsub.f32 %v6079_v46, %v913_v1  ;;  %v911_v38 = vpop.xlane.xlu0 %910 }
 0x349   : > { %5333 = vpow2.f32 %v956_v9  ;;  %v938_v40 = vsub.f32 %v6082_v36, %v911_v38 }
 0x34a   : > { %v960_v48 = vmul.f32 1.442695, %v939_v4 }
 0x34b   : > { %v958_v56 = vmul.f32 1.442695, %v938_v40  ;;  %v917_v13 = vpop.xlane.xlu1 %916 }
 0x34c   : > { %v941_v2 = vsub.f32 %v6099_v51, %v917_v13  ;;  %v915_v14 = vpop.xlane.xlu0 %914 }
 0x34d   : > { %5335 = vpow2.f32 %v958_v56  ;;  %v940_v8 = vsub.f32 %v6102_v43, %v915_v14  ;;  %4855 = vmatpush3.bf16.xpose.msk.msra.mxu0 %vm5843_vm11, %v5904_v58 }
 0x34e   : > { %5337 = vpow2.f32 %v960_v48  ;;  %v964_v27 = vmul.f32 1.442695, %v941_v2  ;;  %4858 = vmatprep.subr.msk.bf16.mxu0 %vm5843_vm11, %v5924_v12 }
 0x34f   : > { %v962_v46 = vmul.f32 1.442695, %v940_v8  ;;  %v921_v36 = vpop.xlane.xlu1 %920 }
 0x350   : > { %v943_v21 = vsub.f32 %v6119_v55, %v921_v36  ;;  %v919_v50 = vpop.xlane.xlu0 %918 }
 0x351   : > { %5339 = vpow2.f32 %v962_v46  ;;  %v942_v51 = vsub.f32 %v6122_v20, %v919_v50 }
 0x352   : > { %v6234_v53 = vpop.eup %5331  ;;  %5341 = vpow2.f32 %v964_v27  ;;  %v968_v43 = vmul.f32 1.442695, %v943_v21 }
 0x353   : > { %7602 = vst [vmem:[#allocation14_spill] sm:$0xff] %v6234_v53  ;;  %v6236_v32 = vpop.eup %5333  ;;  %v966_v9 = vmul.f32 1.442695, %v942_v51  ;;  %v925_v1 = vpop.xlane.xlu1 %924  ;;  %4343 = vmatprep.mubr.f32.mxu0 %v6234_v53  ;;  %v3819_v53 = vld [vmem:[%s7535_s5 + $0x158] sm:$0xff] }
 0x354   : > { %7603 = vst [vmem:[#allocation15_spill] sm:$0xff] %v6236_v32  ;;  %v945_v4 = vsub.f32 %v6139_v63, %v925_v1  ;;  %v923_v38 = vpop.xlane.xlu0 %922  ;;  %4344 = vmatmul.mubr.f32.gmra.mrb[18].mxu0 %v6236_v32 }
 0x355   : > { %5343 = vpow2.f32 %v966_v9  ;;  %v944_v55 = vsub.f32 %v6142_v60, %v923_v38  ;;  %4861 = vmatpush3.bf16.xpose.msk.msra.mxu0 %vm5843_vm11, %v5924_v12 }
 0x356   : > { %5345 = vpow2.f32 %v968_v43  ;;  %v972_v20 = vmul.f32 1.442695, %v945_v4  ;;  %4864 = vmatprep.subr.msk.bf16.mxu0 %vm5843_vm11, %v5932_v17 }
 0x357   : > { %v6248_v40 = vpop.eup %5335  ;;  %v970_v48 = vmul.f32 1.442695, %v944_v55  ;;  %v929_v63 = vpop.xlane.xlu1 %928 }
 0x358   : > { %7604 = vst [vmem:[#allocation16_spill] sm:$0xff] %v6248_v40  ;;  %v6250_v56 = vpop.eup %5337  ;;  %v947_v13 = vsub.f32 %v6160_v26, %v929_v63  ;;  %v927_v2 = vpop.xlane.xlu0 %926  ;;  %4346 = vmatprep.mubr.f32.mxu0 %v6248_v40  ;;  %v3815_v40 = vld [vmem:[%s7535_s5 + $0x138] sm:$0xff] }
 0x359   : > { %7605 = vst [vmem:[#allocation17_spill] sm:$0xff] %v6250_v56  ;;  %5347 = vpow2.f32 %v970_v48  ;;  %v946_v60 = vsub.f32 %v6164_v7, %v927_v2  ;;  %4347 = vmatmul.mubr.f32.gmra.mrb[20].mxu0 %v6250_v56  ;;  %v6812_v56 = vld [vmem:[%s5993_s13 + $0x28] sm:$0xff] }
 0x35a   : > { %5349 = vpow2.f32 %v972_v20  ;;  %v976_v14 = vmul.f32 1.442695, %v947_v13 }
 0x35b   : > { %v6256_v8 = vpop.eup %5339  ;;  %v974_v27 = vmul.f32 1.442695, %v946_v60  ;;  %v933_v46 = vpop.xlane.xlu1 %932 }
 0x35c   : > { %7606 = vst [vmem:[#allocation18_spill] sm:$0xff] %v6256_v8  ;;  %v6258_v36 = vpop.eup %5341  ;;  %v949_v21 = vsub.f32 %v6170_v22, %v933_v46  ;;  %v931_v50 = vpop.xlane.xlu0 %930  ;;  %4349 = vmatprep.mubr.f32.mxu0 %v6256_v8 }
 0x35d   : > { %7607 = vst [vmem:[#allocation19_spill] sm:$0xff] %v6258_v36  ;;  %5351 = vpow2.f32 %v974_v27  ;;  %v948_v26 = vsub.f32 %v6173_v61, %v931_v50  ;;  %4350 = vmatmul.mubr.f32.gmra.mrb[22].mxu0 %v6258_v36  ;;  %v6796_v36 = vld [vmem:[%s5993_s13 + $0x10] sm:$0xff] }
 0x35e   : > { %5353 = vpow2.f32 %v976_v14  ;;  %v980_v7 = vmul.f32 1.442695, %v949_v21  ;;  %4867 = vmatpush3.bf16.xpose.msk.msra.mxu0 %vm5843_vm11, %v5932_v17 }
 0x35f   : > { %v6267_v51 = vpop.eup %5343  ;;  %v978_v43 = vmul.f32 1.442695, %v948_v26 }
 0x360   : > { %7608 = vst [vmem:[#allocation20_spill] sm:$0xff] %v6267_v51  ;;  %v6269_v9 = vpop.eup %5345  ;;  %v6271_v22 = vpop.permute.xlu0 %1762  ;;  %4352 = vmatprep.mubr.f32.mxu0 %v6267_v51 }
 0x361   : > { %7609 = vst [vmem:[#allocation21_spill] sm:$0xff] %v6269_v9  ;;  %5355 = vpow2.f32 %v978_v43  ;;  %4353 = vmatmul.mubr.f32.gmra.mrb[24].mxu0 %v6269_v9  ;;  %v1769_v61 = vmul.f32 %v6271_v22, %v5799_v44  ;;  %v1770_v1 = vmul.f32 %v6271_v22, %v5796_v42  ;;  %v1765_v4 = vmul.f32 %v6271_v22, %v5782_v33 }
 0x362   : > { %5357 = vpow2.f32 %v980_v7  ;;  %v1766_v38 = vmul.f32 %v6271_v22, %v5778_v30  ;;  %v1771_v48 = vmul.f32 %v6271_v22, %v5805_v49  ;;  %v1772_v63 = vmul.f32 %v6271_v22, %v5803_v47 }
 0x363   : > { %v6283_v55 = vpop.eup %5347  ;;  %v5217_v20 = vpack.i.bf16 %v1770_v1, %v1769_v61  ;;  %v1767_v60 = vmul.f32 %v6271_v22, %v5792_v39  ;;  %v1768_v14 = vmul.f32 %v6271_v22, %v5788_v37  ;;  %v1773_v26 = vmul.f32 %v6271_v22, %v5812_v54 }
 0x364   : > { %7610 = vst [vmem:[#allocation22_spill] sm:$0xff] %v6283_v55  ;;  %v6289_v13 = vpop.eup %5349  ;;  %4355 = vmatprep.mubr.f32.mxu0 %v6283_v55  ;;  %v5207_v2 = vpack.i.bf16 %v1766_v38, %v1765_v4  ;;  %v5222_v46 = vpack.i.bf16 %v1772_v63, %v1771_v48  ;;  %v1774_v7 = vmul.f32 %v6271_v22, %v5810_v52 }
 0x365   : > { %7611 = vst [vmem:[#allocation23_spill] sm:$0xff] %v6289_v13  ;;  %5218 = vrot.lane.b32.xlu0 %v5217_v20, %s5641_s9  ;;  %4356 = vmatmul.mubr.f32.gmra.mrb[26].mxu0 %v6289_v13  ;;  %v5212_v50 = vpack.i.bf16 %v1768_v14, %v1767_v60  ;;  %v1343_v4 = vmul.f32 %v5769_v25, %v5782_v33 }
 0x366   : > { %5208 = vrot.lane.b32.xlu1 %v5207_v2, %s5641_s9  ;;  %v5227_v1 = vpack.i.bf16 %v1774_v7, %v1773_v26  ;;  %v1775_v38 = vmul.f32 %v6271_v22, %v5819_v59  ;;  %v1776_v20 = vmul.f32 %v6271_v22, %v5817_v57  ;;  %v1344_v48 = vmul.f32 %v5769_v25, %v5778_v30 }
 0x367   : > { %v6299_v27 = vpop.eup %5351  ;;  %v1345_v2 = vmul.f32 %v5769_v25, %v5792_v39  ;;  %v1346_v60 = vmul.f32 %v5769_v25, %v5788_v37  ;;  %v1347_v14 = vmul.f32 %v5769_v25, %v5799_v44  ;;  %v1350_v26 = vmul.f32 %v5769_v25, %v5803_v47 }
 0x368   : > { %7612 = vst [vmem:[#allocation24_spill] sm:$0xff] %v6299_v27  ;;  %v6301_v21 = vpop.eup %5353  ;;  %4358 = vmatprep.mubr.f32.mxu0 %v6299_v27  ;;  %v5232_v63 = vpack.i.bf16 %v1776_v20, %v1775_v38  ;;  %v1351_v7 = vmul.f32 %v5769_v25, %v5812_v54  ;;  %v1354_v38 = vmul.f32 %v5769_v25, %v5817_v57 }
 0x369   : > { %7613 = vst [vmem:[#allocation25_spill] sm:$0xff] %v6301_v21  ;;  %5223 = vrot.lane.b32.xlu0 %v5222_v46, %s5641_s9  ;;  %4359 = vmatmul.mubr.f32.gmra.mrb[28].mxu0 %v6301_v21  ;;  %v1348_v46 = vmul.f32 %v5769_v25, %v5796_v42  ;;  %v1355_v20 = vmul.f32 %v5769_v25, %v5826_v0 }
 0x36a   : > { %5213 = vrot.lane.b32.xlu1 %v5212_v50, %s5641_s9  ;;  %v1349_v50 = vmul.f32 %v5769_v25, %v5805_v49 }
 0x36b   : > { %v6311_v43 = vpop.eup %5355 }
 0x36c   : > { %7614 = vst [vmem:[#allocation26_spill] sm:$0xff] %v6311_v43  ;;  %v6313_v61 = vpop.eup %5357  ;;  %4361 = vmatprep.mubr.f32.mxu0 %v6311_v43 }
 0x36d   : > { %7615 = vst [vmem:[#allocation27_spill] sm:$0xff] %v6313_v61  ;;  %4362 = vmatmul.mubr.f32.gmra.mrb[30].mxu0 %v6313_v61 }
 0x36e   : > { %5228 = vrot.lane.b32.xlu1 %v5227_v1, %s5641_s9  ;;  %4396 = vmatprep.mubr.msk.f32.mxu0 %vm365_vm0, %v1343_v4  ;;  %v1352_v1 = vmul.f32 %v5769_v25, %v5810_v52  ;;  %v1353_v4 = vmul.f32 %v5769_v25, %v5819_v59 }
 0x371   : > { %4397 = vmatmul.mubr.msk.f32.vlgmr.msra.gmra.mrb[32].mxu0 %vm365_vm0, %v1344_v48  ;;  %v1356_v48 = vmul.f32 %v5769_v25, %v5824_v62 }
 0x372   : > { %5233 = vrot.lane.b32.xlu1 %v5232_v63, %s5641_s9  ;;  %4399 = vmatprep.mubr.msk.f32.mxu0 %vm365_vm0, %v1345_v2  ;;  %v1357_v63 = vmul.f32 %v5769_v25, %v5834_v5  ;;  %v1358_v2 = vmul.f32 %v5769_v25, %v5831_v3 }
 0x375   : > { %4400 = vmatmul.mubr.msk.f32.gmra.mrb[34].mxu0 %vm365_vm0, %v1346_v60 }
 0x376   : > { %4402 = vmatprep.mubr.msk.f32.mxu0 %vm365_vm0, %v1347_v14 }
 0x379   : > { %4403 = vmatmul.mubr.msk.f32.gmra.mrb[36].mxu0 %vm365_vm0, %v1348_v46 }
 0x37a   : > { %4405 = vmatprep.mubr.msk.f32.mxu0 %vm365_vm0, %v1349_v50 }
 0x37d   : > { %4406 = vmatmul.mubr.msk.f32.gmra.mrb[38].mxu0 %vm365_vm0, %v1350_v26 }
 0x37e   : > { %4408 = vmatprep.mubr.msk.f32.mxu0 %vm365_vm0, %v1351_v7 }
 0x381   : > { %4409 = vmatmul.mubr.msk.f32.gmra.mrb[40].mxu0 %vm365_vm0, %v1352_v1 }
 0x382   : > { %4411 = vmatprep.mubr.msk.f32.mxu0 %vm365_vm0, %v1353_v4 }
 0x385   : > { %4412 = vmatmul.mubr.msk.f32.gmra.mrb[42].mxu0 %vm365_vm0, %v1354_v38 }
 0x386   : > { %4414 = vmatprep.mubr.msk.f32.mxu0 %vm365_vm0, %v1355_v20 }
 0x389   : > { %4415 = vmatmul.mubr.msk.f32.gmra.mrb[44].mxu0 %vm365_vm0, %v1356_v48 }
 0x38a   : > { %4417 = vmatprep.mubr.msk.f32.mxu0 %vm365_vm0, %v1357_v63 }
 0x38d   : > { %4418 = vmatmul.mubr.msk.f32.gmra.mrb[46].mxu0 %vm365_vm0, %v1358_v2 }
 0x3d7   : > { %v5219_v60 = vpop.permute.xlu0 %5218 }
 0x3d8   : > { %v5209_v14 = vpop.permute.xlu1 %5208  ;;  %v5221_v1 = vunpack.i.h.bf16 %v5219_v60  ;;  %v5220_v4 = vunpack.i.l.bf16 %v5219_v60 }
 0x3d9   : > { %v5211_v46 = vunpack.i.h.bf16 %v5209_v14  ;;  %v5210_v50 = vunpack.i.l.bf16 %v5209_v14 }
 0x3da   : > { %v4876_v25 = vpack.c.bf16 %v5221_v1, %v5220_v4 }
 0x3db   : > { %v4868_v26 = vpack.c.bf16 %v5211_v46, %v5210_v50  ;;  %v5224_v61 = vpop.permute.xlu0 %5223 }
 0x3dc   : > { %v5214_v7 = vpop.permute.xlu1 %5213  ;;  %v5226_v43 = vunpack.i.h.bf16 %v5224_v61  ;;  %v5225_v21 = vunpack.i.l.bf16 %v5224_v61 }
 0x3dd   : > { %v5216_v38 = vunpack.i.h.bf16 %v5214_v7  ;;  %v5215_v20 = vunpack.i.l.bf16 %v5214_v7  ;;  %4869 = vmatprep.subr.bf16.mxu1 %v4868_v26 }
 0x3de   : > { %4871 = vmatpush3.bf16.msra.mxu1 %v4868_v26  ;;  %v4880_v14 = vpack.c.bf16 %v5226_v43, %v5225_v21 }
 0x3df   : > { %v4872_v48 = vpack.c.bf16 %v5216_v38, %v5215_v20 }
 0x3e0   : > { %v5229_v63 = vpop.permute.xlu1 %5228 }
 0x3e1   : > { %4873 = vmatprep.subr.bf16.mxu1 %v4872_v48  ;;  %v5231_v2 = vunpack.i.h.bf16 %v5229_v63  ;;  %v5230_v27 = vunpack.i.l.bf16 %v5229_v63 }
 0x3e2   : > { %4875 = vmatpush3.bf16.msra.mxu1 %v4872_v48 }
 0x3e3   : > { %4877 = vmatprep.subr.bf16.mxu1 %v4876_v25  ;;  %v4884_v7 = vpack.c.bf16 %v5231_v2, %v5230_v27 }
 0x3e4   : > { %v5234_v46 = vpop.permute.xlu1 %5233 }
 0x3e5   : > { %v5236_v60 = vunpack.i.h.bf16 %v5234_v46  ;;  %v5235_v50 = vunpack.i.l.bf16 %v5234_v46 }
 0x3e6   : > { %4879 = vmatpush3.bf16.msra.mxu1 %v4876_v25 }
 0x3e7   : > { %4881 = vmatprep.subr.bf16.mxu1 %v4880_v14  ;;  %v4888_v26 = vpack.c.bf16 %v5236_v60, %v5235_v50  ;;  %v3761_v60 = vld [vmem:[%s7535_s5 + $0x88] sm:$0xff]  ;;  %v3760_v50 = vld [vmem:[%s7535_s5 + $0x80] sm:$0xff] }
 0x3ea   : > { %4883 = vmatpush3.bf16.msra.mxu1 %v4880_v14 }
 0x3eb   : > { %4885 = vmatprep.subr.bf16.mxu1 %v4884_v7 }
 0x3ee   : > { %4887 = vmatpush3.bf16.msra.mxu1 %v4884_v7 }
 0x3ef   : > { %4889 = vmatprep.subr.bf16.mxu1 %v4888_v26 }
 0x3f2   : > { %4891 = vmatpush3.bf16.msra.mxu1 %v4888_v26 }
 0x3f3   : > { %v6371_v61 = vpop.f32.mrb[16].mxu0 }
 0x3f4   : > { %7616 = vst [vmem:[#allocation28_spill] sm:$0xff] %v6371_v61  ;;  %v6373_v1 = vpop.f32.mrb[17].mxu0 }
 0x3f5   : > { %7617 = vst [vmem:[#allocation29_spill] sm:$0xff] %v6373_v1 }
 0x427   : > { %v6375_v4 = vpop.f32.mrb[18].mxu0 }
 0x428   : > { %7618 = vst [vmem:[#allocation30_spill] sm:$0xff] %v6375_v4  ;;  %v6377_v38 = vpop.f32.mrb[19].mxu0 }
 0x429   : > { %7619 = vst [vmem:[#allocation31_spill] sm:$0xff] %v6377_v38 }
 0x42c   : > { %v6379_v21 = vpop.f32.mrb[20].mxu0 }
 0x42d   : > { %7620 = vst [vmem:[#allocation32_spill] sm:$0xff] %v6379_v21  ;;  %v6381_v43 = vpop.f32.mrb[21].mxu0 }
 0x42e   : > { %7621 = vst [vmem:[#allocation33_spill] sm:$0xff] %v6381_v43 }
 0x430   : > { %v6383_v20 = vpop.f32.mrb[22].mxu0 }
 0x431   : > { %7622 = vst [vmem:[#allocation34_spill] sm:$0xff] %v6383_v20  ;;  %v6385_v27 = vpop.f32.mrb[23].mxu0 }
 0x432   : > { %7623 = vst [vmem:[#allocation35_spill] sm:$0xff] %v6385_v27 }
 0x434   : > { %v6387_v48 = vpop.f32.mrb[24].mxu0 }
 0x435   : > { %7624 = vst [vmem:[#allocation36_spill] sm:$0xff] %v6387_v48  ;;  %v6389_v63 = vpop.f32.mrb[25].mxu0 }
 0x436   : > { %7625 = vst [vmem:[#allocation37_spill] sm:$0xff] %v6389_v63 }
 0x438   : > { %v6391_v25 = vpop.f32.mrb[26].mxu0 }
 0x439   : > { %7626 = vst [vmem:[#allocation38_spill] sm:$0xff] %v6391_v25  ;;  %v6393_v2 = vpop.f32.mrb[27].mxu0  ;;  %v1377_v25 = vadd.f32 %v3761_v60, %v5996_v23  ;;  %v1779_v23 = vmul.f32 %v6271_v22, %v5834_v5  ;;  %v1778_v60 = vmul.f32 %v6271_v22, %v5824_v62 }
 0x43a   : > { %7627 = vst [vmem:[#allocation39_spill] sm:$0xff] %v6393_v2  ;;  %v1376_v2 = vadd.f32 %v3760_v50, %v6002_v29  ;;  %v1780_v29 = vmul.f32 %v6271_v22, %v5831_v3 }
 0x43c   : > { %v6395_v14 = vpop.f32.mrb[28].mxu0 }
 0x43d   : > { %7628 = vst [vmem:[#allocation40_spill] sm:$0xff] %v6395_v14  ;;  %v6397_v46 = vpop.f32.mrb[29].mxu0 }
 0x43e   : > { %7629 = vst [vmem:[#allocation41_spill] sm:$0xff] %v6397_v46 }
 0x440   : > { %v6405_v7 = vpop.f32.mrb[30].mxu0 }
 0x441   : > { %7630 = vst [vmem:[#allocation42_spill] sm:$0xff] %v6405_v7  ;;  %v6407_v26 = vpop.f32.mrb[31].mxu0 }
 0x442   : > { %7631 = vst [vmem:[#allocation43_spill] sm:$0xff] %v6407_v26 }
 0x444   : > { %v4398_v48 = vpop.f32.mrb[32].mxu0 }
 0x445   : > { %v6411_v14 = vadd.f32 %v4398_v48, %v1377_v25  ;;  %v1506_v46 = vpop.f32.mrb[33].mxu0 }
 0x446   : > { %v6413_v63 = vadd.f32 %v1506_v46, %v1376_v2  ;;  %v5242_v2 = vpack.i.bf16 %v1780_v29, %v1779_v23  ;;  %v1777_v46 = vmul.f32 %v6271_v22, %v5826_v0  ;;  %v3762_v23 = vld [vmem:[%s7535_s5 + $0x90] sm:$0xff]  ;;  %v3763_v29 = vld [vmem:[%s7535_s5 + $0x98] sm:$0xff] }
 0x447   : > { %1587 = vmax.xlane.f32.xlu0 %v6411_v14  ;;  %v1378_v22 = vadd.f32 %v3762_v23, %v6034_v16  ;;  %v1379_v9 = vadd.f32 %v3763_v29, %v6040_v18  ;;  %v3765_v16 = vld [vmem:[%s7535_s5 + $0xa8] sm:$0xff]  ;;  %v3768_v23 = vld [vmem:[%s7535_s5 + $0xc0] sm:$0xff] }
 0x448   : > { %v4401_v20 = vpop.f32.mrb[34].mxu0  ;;  %1585 = vmax.xlane.f32.xlu1 %v6413_v63  ;;  %v5237_v38 = vpack.i.bf16 %v1778_v60, %v1777_v46 }
 0x449   : > { %v1516_v27 = vpop.f32.mrb[35].mxu0  ;;  %v6444_v51 = vadd.f32 %v4401_v20, %v1379_v9  ;;  %v3770_v20 = vld [vmem:[%s7535_s5 + $0xd0] sm:$0xff] }
 0x44a   : > { %v6441_v46 = vadd.f32 %v1516_v27, %v1378_v22  ;;  %v1381_v27 = vadd.f32 %v3765_v16, %v6048_v28  ;;  %v7632_v28 = vld [vmem:[#allocation4_spill] sm:$0xff]  ;;  %v7634_v16 = vld [vmem:[#allocation5_spill] sm:$0xff] }
 0x44c   : > { %v4404_v21 = vpop.f32.mrb[36].mxu0 }
 0x44d   : > { %v1526_v7 = vpop.f32.mrb[37].mxu0  ;;  %v6469_v22 = vadd.f32 %v4404_v21, %v1381_v27  ;;  %v7635_v27 = vld [vmem:[#allocation9_spill] sm:$0xff] }
 0x450   : > { %v4407_v43 = vpop.f32.mrb[38].mxu0 }
 0x451   : > { %v1536_v26 = vpop.f32.mrb[39].mxu0 }
 0x454   : > { %v4410_v48 = vpop.f32.mrb[40].mxu0 }
 0x455   : > { %v1546_v25 = vpop.f32.mrb[41].mxu0 }
 0x458   : > { %v4413_v50 = vpop.f32.mrb[42].mxu0 }
 0x459   : > { %v1556_v4 = vpop.f32.mrb[43].mxu0  ;;  %5243 = vrot.lane.b32.xlu1 %v5242_v2, %s5641_s9  ;;  %v3764_v2 = vld [vmem:[%s7535_s5 + $0xa0] sm:$0xff] }
 0x45a   : > { %v1380_v60 = vadd.f32 %v3764_v2, %v6054_v35  ;;  %v3767_v35 = vld [vmem:[%s7535_s5 + $0xb8] sm:$0xff]  ;;  %v3769_v2 = vld [vmem:[%s7535_s5 + $0xc8] sm:$0xff] }
 0x45c   : > { %v4416_v61 = vpop.f32.mrb[44].mxu0  ;;  %v6456_v29 = vadd.f32 %v1526_v7, %v1380_v60  ;;  %v1383_v7 = vadd.f32 %v3767_v35, %v7632_v28  ;;  %v3772_v60 = vld [vmem:[%s7535_s5 + $0xe0] sm:$0xff] }
 0x45d   : > { %5238 = vrot.lane.b32.xlu0 %v5237_v38, %s5641_s9  ;;  %v1566_v1 = vpop.f32.mrb[45].mxu0  ;;  %v3766_v38 = vld [vmem:[%s7535_s5 + $0xb0] sm:$0xff]  ;;  %v1388_v35 = vadd.f32 %v3772_v60, %v7635_v27 }
 0x45e   : > { %v1382_v18 = vadd.f32 %v3766_v38, %v6072_v6  ;;  %v1384_v6 = vadd.f32 %v3768_v23, %v6092_v31  ;;  %v7633_v38 = vld [vmem:[#allocation7_spill] sm:$0xff]  ;;  %v6483_v21 = vadd.f32 %v4407_v43, %v1383_v7  ;;  %v3771_v23 = vld [vmem:[%s7535_s5 + $0xd8] sm:$0xff]  ;;  %v7638_v60 = vld [vmem:[#allocation8_spill] sm:$0xff] }
 0x45f   : > { %v1386_v31 = vadd.f32 %v3770_v20, %v7633_v38  ;;  %v7636_v20 = vld [vmem:[#allocation6_spill] sm:$0xff]  ;;  %v3773_v7 = vld [vmem:[%s7535_s5 + $0xe8] sm:$0xff] }
 0x460   : > { %v4419_v13 = vpop.f32.mrb[46].mxu0  ;;  %v6461_v9 = vadd.f32 %v1536_v26, %v1382_v18  ;;  %v6475_v26 = vadd.f32 %v1546_v25, %v1384_v6  ;;  %v1385_v18 = vadd.f32 %v3769_v2, %v7634_v16  ;;  %v3774_v6 = vld [vmem:[%s7535_s5 + $0xf0] sm:$0xff]  ;;  %v1387_v28 = vadd.f32 %v3771_v23, %v7636_v20  ;;  %v7637_v2 = vld [vmem:[#allocation11_spill] sm:$0xff]  ;;  %v7639_v23 = vld [vmem:[#allocation10_spill] sm:$0xff] }
 0x461   : > { %v1576_v55 = vpop.f32.mrb[47].mxu0  ;;  %v6489_v25 = vadd.f32 %v1556_v4, %v1386_v31  ;;  %v6503_v4 = vadd.f32 %v1566_v1, %v1388_v35  ;;  %v1390_v38 = vadd.f32 %v3774_v6, %v7637_v2  ;;  %v1389_v16 = vadd.f32 %v3773_v7, %v7638_v60  ;;  %v7640_v35 = vld [vmem:[#allocation2_spill] sm:$0xff] }
 0x462   : > { %v6497_v43 = vadd.f32 %v4410_v48, %v1385_v18  ;;  %v6508_v31 = vadd.f32 %v4413_v50, %v1387_v28  ;;  %v3775_v48 = vld [vmem:[%s7535_s5 + $0xf8] sm:$0xff] }
 0x463   : > { %v6514_v18 = vadd.f32 %v1576_v55, %v1390_v38  ;;  %v6518_v1 = vadd.f32 %v4416_v61, %v1389_v16  ;;  %v1391_v27 = vadd.f32 %v3775_v48, %v7639_v23 }
 0x465   : > { %v6522_v50 = vadd.f32 %v4419_v13, %v1391_v27 }
 0x47c   : > { %1589 = vmax.xlane.f32.xlu0 %v6441_v46 }
 0x47d   : > { %1591 = vmax.xlane.f32.xlu1 %v6444_v51 }
 0x480   : > { %1593 = vmax.xlane.f32.xlu0 %v6456_v29 }
 0x481   : > { %1597 = vmax.xlane.f32.xlu1 %v6461_v9 }
 0x484   : > { %1595 = vmax.xlane.f32.xlu0 %v6469_v22 }
 0x485   : > { %1601 = vmax.xlane.f32.xlu1 %v6475_v26 }
 0x488   : > { %1599 = vmax.xlane.f32.xlu0 %v6483_v21 }
 0x489   : > { %1605 = vmax.xlane.f32.xlu1 %v6489_v25 }
 0x48c   : > { %1603 = vmax.xlane.f32.xlu0 %v6497_v43 }
 0x48d   : > { %1609 = vmax.xlane.f32.xlu1 %v6503_v4 }
 0x490   : > { %1607 = vmax.xlane.f32.xlu0 %v6508_v31 }
 0x491   : > { %1613 = vmax.xlane.f32.xlu1 %v6514_v18 }
 0x494   : > { %1611 = vmax.xlane.f32.xlu0 %v6518_v1 }
 0x498   : > { %1615 = vmax.xlane.f32.xlu0 %v6522_v50 }
 0x4a2   : > { %2445 = vrot.lane.b32.xlu1 %v7640_v35, %s5641_s9 }
 0x4d4   : > { %v1588_v6 = vpop.xlane.xlu0 %1587 }
 0x4d5   : > { %v1618_v55 = vsub.f32 %v6411_v14, %v1588_v6  ;;  %v1586_v20 = vpop.xlane.xlu1 %1585 }
 0x4d6   : > { %v1617_v28 = vsub.f32 %v6413_v63, %v1586_v20 }
 0x4d7   : > { %v1635_v7 = vmul.f32 1.442695, %v1618_v55 }
 0x4d8   : > { %v1633_v61 = vmul.f32 1.442695, %v1617_v28  ;;  %v5239_v2 = vpop.permute.xlu0 %5238 }
 0x4d9   : > { %v5241_v38 = vunpack.i.h.bf16 %v5239_v2  ;;  %v5240_v60 = vunpack.i.l.bf16 %v5239_v2  ;;  %v5244_v16 = vpop.permute.xlu1 %5243 }
 0x4da   : > { %5359 = vpow2.f32 %v1633_v61  ;;  %v5246_v13 = vunpack.i.h.bf16 %v5244_v16  ;;  %v5245_v48 = vunpack.i.l.bf16 %v5244_v16 }
 0x4db   : > { %5361 = vpow2.f32 %v1635_v7  ;;  %v4892_v23 = vpack.c.bf16 %v5241_v38, %v5240_v60 }
 0x4dc   : > { %v4896_v27 = vpack.c.bf16 %v5246_v13, %v5245_v48 }
 0x4dd   : > { %4893 = vmatprep.subr.bf16.mxu1 %v4892_v23 }
 0x4de   : > { %4895 = vmatpush3.bf16.msra.mxu1 %v4892_v23 }
 0x4df   : > { %4897 = vmatprep.subr.bf16.mxu1 %v4896_v27 }
 0x4e2   : > { %4899 = vmatpush3.bf16.msra.mxu1 %v4896_v27 }
 0x4e3   : > { %4902 = vmatprep.subr.msk.bf16.mxu1 %vm5843_vm11, %v5847_v11 }
 0x4e4   : > { %v6532_v63 = vpop.eup %5359 }
 0x4e5   : > { %7641 = vst [vmem:[#allocation4_spill] sm:$0xff] %v6532_v63  ;;  %v6534_v14 = vpop.eup %5361  ;;  %4452 = vmatprep.mubr.f32.mxu1 %v6532_v63 }
 0x4e6   : > { %7642 = vst [vmem:[#allocation7_spill] sm:$0xff] %v6534_v14  ;;  %4453 = vmatmul.mubr.f32.vlgmr.msra.gmra.mrb[16].mxu1 %v6534_v14 }
 0x4eb   : > { %4905 = vmatpush3.bf16.xpose.msk.msra.mxu1 %vm5843_vm11, %v5847_v11 }
 0x4ec   : > { %4908 = vmatprep.subr.msk.bf16.mxu1 %vm5843_vm11, %v5855_v15 }
 0x4f3   : > { %4911 = vmatpush3.bf16.xpose.msk.msra.mxu1 %vm5843_vm11, %v5855_v15 }
 0x4f4   : > { %4914 = vmatprep.subr.msk.bf16.mxu1 %vm5843_vm11, %v5860_v19 }
 0x4fb   : > { %4917 = vmatpush3.bf16.xpose.msk.msra.mxu1 %vm5843_vm11, %v5860_v19 }
 0x4fc   : > { %4920 = vmatprep.subr.msk.bf16.mxu1 %vm5843_vm11, %v5868_v24 }
 0x503   : > { %4923 = vmatpush3.bf16.xpose.msk.msra.mxu1 %vm5843_vm11, %v5868_v24 }
 0x504   : > { %4926 = vmatprep.subr.msk.bf16.mxu1 %vm5843_vm11, %v5876_v34 }
 0x509   : > { %v1590_v6 = vpop.xlane.xlu0 %1589 }
 0x50a   : > { %v1619_v55 = vsub.f32 %v6441_v46, %v1590_v6  ;;  %v1592_v20 = vpop.xlane.xlu1 %1591 }
 0x50b   : > { %v1620_v28 = vsub.f32 %v6444_v51, %v1592_v20  ;;  %4929 = vmatpush3.bf16.xpose.msk.msra.mxu1 %vm5843_vm11, %v5876_v34 }
 0x50c   : > { %v1637_v7 = vmul.f32 1.442695, %v1619_v55  ;;  %4932 = vmatprep.subr.msk.bf16.mxu1 %vm5843_vm11, %v5904_v58 }
 0x50d   : > { %v1639_v61 = vmul.f32 1.442695, %v1620_v28  ;;  %v1594_v2 = vpop.xlane.xlu0 %1593 }
 0x50e   : > { %5363 = vpow2.f32 %v1637_v7  ;;  %v1621_v38 = vsub.f32 %v6456_v29, %v1594_v2  ;;  %v1598_v60 = vpop.xlane.xlu1 %1597 }
 0x50f   : > { %5365 = vpow2.f32 %v1639_v61  ;;  %v1623_v46 = vsub.f32 %v6461_v9, %v1598_v60 }
 0x510   : > { %v1641_v16 = vmul.f32 1.442695, %v1621_v38 }
 0x511   : > { %v1596_v51 = vpop.xlane.xlu0 %1595  ;;  %v1645_v23 = vmul.f32 1.442695, %v1623_v46 }
 0x512   : > { %5367 = vpow2.f32 %v1641_v16  ;;  %v1622_v13 = vsub.f32 %v6469_v22, %v1596_v51  ;;  %v1602_v48 = vpop.xlane.xlu1 %1601 }
 0x513   : > { %v1625_v27 = vsub.f32 %v6475_v26, %v1602_v48  ;;  %4935 = vmatpush3.bf16.xpose.msk.msra.mxu1 %vm5843_vm11, %v5904_v58 }
 0x514   : > { %v1643_v6 = vmul.f32 1.442695, %v1622_v13  ;;  %4938 = vmatprep.subr.msk.bf16.mxu1 %vm5843_vm11, %v5924_v12 }
 0x515   : > { %v1600_v29 = vpop.xlane.xlu0 %1599  ;;  %v1649_v22 = vmul.f32 1.442695, %v1625_v27 }
 0x516   : > { %5369 = vpow2.f32 %v1643_v6  ;;  %v1624_v9 = vsub.f32 %v6483_v21, %v1600_v29  ;;  %v1606_v55 = vpop.xlane.xlu1 %1605 }
 0x517   : > { %5371 = vpow2.f32 %v1645_v23  ;;  %v1627_v20 = vsub.f32 %v6489_v25, %v1606_v55 }
 0x518   : > { %v6582_v28 = vpop.eup %5363  ;;  %v1647_v26 = vmul.f32 1.442695, %v1624_v9 }
 0x519   : > { %7643 = vst [vmem:[#allocation5_spill] sm:$0xff] %v6582_v28  ;;  %v6584_v7 = vpop.eup %5365  ;;  %v1604_v61 = vpop.xlane.xlu0 %1603  ;;  %4455 = vmatprep.mubr.f32.mxu1 %v6582_v28  ;;  %v1653_v21 = vmul.f32 1.442695, %v1627_v20 }
 0x51a   : > { %7644 = vst [vmem:[#allocation9_spill] sm:$0xff] %v6584_v7  ;;  %5373 = vpow2.f32 %v1647_v26  ;;  %v1626_v2 = vsub.f32 %v6497_v43, %v1604_v61  ;;  %v1610_v38 = vpop.xlane.xlu1 %1609  ;;  %4456 = vmatmul.mubr.f32.gmra.mrb[18].mxu1 %v6584_v7  ;;  %v3817_v7 = vld [vmem:[%s7535_s5 + $0x148] sm:$0xff] }
 0x51b   : > { %5375 = vpow2.f32 %v1649_v22  ;;  %v1629_v60 = vsub.f32 %v6503_v4, %v1610_v38  ;;  %4941 = vmatpush3.bf16.xpose.msk.msra.mxu1 %vm5843_vm11, %v5924_v12 }
 0x51c   : > { %v6593_v25 = vpop.eup %5367  ;;  %v1651_v46 = vmul.f32 1.442695, %v1626_v2  ;;  %4944 = vmatprep.subr.msk.bf16.mxu1 %vm5843_vm11, %v5932_v17 }
 0x51d   : > { %7645 = vst [vmem:[#allocation6_spill] sm:$0xff] %v6593_v25  ;;  %v1657_v16 = vmul.f32 1.442695, %v1629_v60  ;;  %v1608_v43 = vpop.xlane.xlu0 %1607  ;;  %4458 = vmatprep.mubr.f32.mxu1 %v6593_v25  ;;  %v6818_v25 = vld [vmem:[%s5993_s13 + $0x20] sm:$0xff] }
 0x51e   : > { %5377 = vpow2.f32 %v1651_v46  ;;  %v1628_v51 = vsub.f32 %v6508_v31, %v1608_v43  ;;  %v1614_v13 = vpop.xlane.xlu1 %1613 }
 0x51f   : > { %5379 = vpow2.f32 %v1653_v21  ;;  %v1631_v4 = vsub.f32 %v6514_v18, %v1614_v13 }
 0x520   : > { %v6601_v48 = vpop.eup %5369  ;;  %v1655_v23 = vmul.f32 1.442695, %v1628_v51  ;;  %5381 = vpow2.f32 %v1657_v16 }
 0x521   : > { %7646 = vst [vmem:[#allocation11_spill] sm:$0xff] %v6601_v48  ;;  %v6603_v27 = vpop.eup %5371  ;;  %v1612_v6 = vpop.xlane.xlu0 %1611  ;;  %4459 = vmatmul.mubr.f32.gmra.mrb[20].mxu1 %v6601_v48  ;;  %v1661_v31 = vmul.f32 1.442695, %v1631_v4 }
 0x522   : > { %7647 = vst [vmem:[#allocation8_spill] sm:$0xff] %v6603_v27  ;;  %5383 = vpow2.f32 %v1655_v23  ;;  %v1630_v29 = vsub.f32 %v6518_v1, %v1612_v6  ;;  %v6607_v9 = vpop.permute.xlu1 %2445  ;;  %4461 = vmatprep.mubr.f32.mxu1 %v6603_v27  ;;  %v3812_v27 = vld [vmem:[%s7535_s5 + $0x120] sm:$0xff] }
 0x523   : > { %4947 = vmatpush3.bf16.xpose.msk.msra.mxu1 %vm5843_vm11, %v5932_v17  ;;  %v2450_v18 = vmul.f32 %v6607_v9, %v5792_v39  ;;  %v2451_v55 = vmul.f32 %v6607_v9, %v5788_v37  ;;  %v2448_v22 = vmul.f32 %v6607_v9, %v5782_v33  ;;  %v2449_v26 = vmul.f32 %v6607_v9, %v5778_v30 }
 0x524   : > { %v6619_v20 = vpop.eup %5373  ;;  %v1659_v1 = vmul.f32 1.442695, %v1630_v29  ;;  %v2452_v21 = vmul.f32 %v6607_v9, %v5799_v44  ;;  %v2453_v60 = vmul.f32 %v6607_v9, %v5796_v42  ;;  %v2454_v46 = vmul.f32 %v6607_v9, %v5805_v49 }
 0x525   : > { %7648 = vst [vmem:[#allocation10_spill] sm:$0xff] %v6619_v20  ;;  %v6623_v61 = vpop.eup %5375  ;;  %v1616_v2 = vpop.xlane.xlu0 %1615  ;;  %4462 = vmatmul.mubr.f32.gmra.mrb[22].mxu1 %v6619_v20  ;;  %v5252_v38 = vpack.i.bf16 %v2451_v55, %v2450_v18  ;;  %v5247_v43 = vpack.i.bf16 %v2449_v26, %v2448_v22  ;;  %v2455_v51 = vmul.f32 %v6607_v9, %v5803_v47  ;;  %v3813_v20 = vld [vmem:[%s7535_s5 + $0x128] sm:$0xff] }
 0x526   : > { %7649 = vst [vmem:[#allocation2_spill] sm:$0xff] %v6623_v61  ;;  %5385 = vpow2.f32 %v1659_v1  ;;  %v1632_v16 = vsub.f32 %v6522_v50, %v1616_v2  ;;  %4464 = vmatprep.mubr.f32.mxu1 %v6623_v61  ;;  %v5257_v6 = vpack.i.bf16 %v2453_v60, %v2452_v21  ;;  %v2456_v50 = vmul.f32 %v6607_v9, %v5812_v54 }
 0x527   : > { %5387 = vpow2.f32 %v1661_v31  ;;  %5253 = vrot.lane.b32.xlu1 %v5252_v38, %s5641_s9  ;;  %5248 = vrot.lane.b32.xlu0 %v5247_v43, %s5641_s9  ;;  %v2457_v29 = vmul.f32 %v6607_v9, %v5810_v52  ;;  %v5262_v31 = vpack.i.bf16 %v2455_v51, %v2454_v46  ;;  %v2458_v18 = vmul.f32 %v6607_v9, %v5819_v59 }
 0x528   : > { %v6637_v13 = vpop.eup %5377  ;;  %v1663_v4 = vmul.f32 1.442695, %v1632_v16  ;;  %v2459_v55 = vmul.f32 %v6607_v9, %v5817_v57  ;;  %v2026_v46 = vmul.f32 %v7640_v35, %v5782_v33  ;;  %v2027_v16 = vmul.f32 %v7640_v35, %v5778_v30 }
 0x529   : > { %7650 = vst [vmem:[#allocation44_spill] sm:$0xff] %v6637_v13  ;;  %v6640_v23 = vpop.eup %5379  ;;  %4465 = vmatmul.mubr.f32.gmra.mrb[24].mxu1 %v6637_v13  ;;  %v5267_v26 = vpack.i.bf16 %v2457_v29, %v2456_v50  ;;  %v2028_v43 = vmul.f32 %v7640_v35, %v5792_v39  ;;  %v2029_v51 = vmul.f32 %v7640_v35, %v5788_v37 }
 0x52a   : > { %7651 = vst [vmem:[#allocation45_spill] sm:$0xff] %v6640_v23  ;;  %5389 = vpow2.f32 %v1663_v4  ;;  %4467 = vmatprep.mubr.f32.mxu1 %v6640_v23  ;;  %v6652_v22 = vpop.eup %5381  ;;  %v5272_v2 = vpack.i.bf16 %v2459_v55, %v2458_v18  ;;  %v2030_v4 = vmul.f32 %v7640_v35, %v5799_v44  ;;  %v2032_v50 = vmul.f32 %v7640_v35, %v5805_v49 }
 0x52b   : > { %7652 = vst [vmem:[#allocation46_spill] sm:$0xff] %v6652_v22  ;;  %5258 = vrot.lane.b32.xlu1 %v5257_v6, %s5641_s9  ;;  %5263 = vrot.lane.b32.xlu0 %v5262_v31, %s5641_s9  ;;  %v2031_v6 = vmul.f32 %v7640_v35, %v5796_v42  ;;  %v2033_v29 = vmul.f32 %v7640_v35, %v5803_v47 }
 0x52c   : > { %v6655_v1 = vpop.eup %5383  ;;  %v2034_v31 = vmul.f32 %v7640_v35, %v5812_v54  ;;  %v2035_v18 = vmul.f32 %v7640_v35, %v5810_v52  ;;  %v2036_v55 = vmul.f32 %v7640_v35, %v5819_v59 }
 0x52d   : > { %7653 = vst [vmem:[#allocation47_spill] sm:$0xff] %v6655_v1  ;;  %4468 = vmatmul.mubr.f32.gmra.mrb[26].mxu1 %v6655_v1 }
 0x52e   : > { %4470 = vmatprep.mubr.f32.mxu1 %v6652_v22 }
 0x52f   : > { %5268 = vrot.lane.b32.xlu1 %v5267_v26, %s5641_s9  ;;  %5273 = vrot.lane.b32.xlu0 %v5272_v2, %s5641_s9  ;;  %v2037_v26 = vmul.f32 %v7640_v35, %v5817_v57  ;;  %v2038_v2 = vmul.f32 %v7640_v35, %v5826_v0 }
 0x530   : > { %v6661_v38 = vpop.eup %5385 }
 0x531   : > { %7654 = vst [vmem:[#allocation48_spill] sm:$0xff] %v6661_v38  ;;  %v6664_v21 = vpop.eup %5387  ;;  %4471 = vmatmul.mubr.f32.gmra.mrb[28].mxu1 %v6661_v38 }
 0x532   : > { %7655 = vst [vmem:[#allocation49_spill] sm:$0xff] %v6664_v21  ;;  %4473 = vmatprep.mubr.f32.mxu1 %v6664_v21 }
 0x534   : > { %v6668_v60 = vpop.eup %5389 }
 0x535   : > { %7656 = vst [vmem:[#allocation50_spill] sm:$0xff] %v6668_v60  ;;  %4474 = vmatmul.mubr.f32.gmra.mrb[30].mxu1 %v6668_v60 }
 0x536   : > { %4508 = vmatprep.mubr.msk.f32.mxu1 %vm365_vm0, %v2026_v46  ;;  %v2039_v46 = vmul.f32 %v7640_v35, %v5824_v62 }
 0x539   : > { %4509 = vmatmul.mubr.msk.f32.vlgmr.msra.gmra.mrb[32].mxu1 %vm365_vm0, %v2027_v16  ;;  %v2040_v16 = vmul.f32 %v7640_v35, %v5834_v5 }
 0x53a   : > { %4511 = vmatprep.mubr.msk.f32.mxu1 %vm365_vm0, %v2028_v43  ;;  %v2041_v43 = vmul.f32 %v7640_v35, %v5831_v3 }
 0x53d   : > { %4512 = vmatmul.mubr.msk.f32.gmra.mrb[34].mxu1 %vm365_vm0, %v2029_v51 }
 0x53e   : > { %4514 = vmatprep.mubr.msk.f32.mxu1 %vm365_vm0, %v2030_v4 }
 0x541   : > { %4515 = vmatmul.mubr.msk.f32.gmra.mrb[36].mxu1 %vm365_vm0, %v2031_v6 }
 0x542   : > { %4517 = vmatprep.mubr.msk.f32.mxu1 %vm365_vm0, %v2032_v50 }
 0x545   : > { %4518 = vmatmul.mubr.msk.f32.gmra.mrb[38].mxu1 %vm365_vm0, %v2033_v29 }
 0x546   : > { %4520 = vmatprep.mubr.msk.f32.mxu1 %vm365_vm0, %v2034_v31 }
 0x549   : > { %4521 = vmatmul.mubr.msk.f32.gmra.mrb[40].mxu1 %vm365_vm0, %v2035_v18 }
 0x54a   : > { %4523 = vmatprep.mubr.msk.f32.mxu1 %vm365_vm0, %v2036_v55 }
 0x54d   : > { %4524 = vmatmul.mubr.msk.f32.gmra.mrb[42].mxu1 %vm365_vm0, %v2037_v26 }
 0x54e   : > { %4526 = vmatprep.mubr.msk.f32.mxu1 %vm365_vm0, %v2038_v2 }
 0x551   : > { %4527 = vmatmul.mubr.msk.f32.gmra.mrb[44].mxu1 %vm365_vm0, %v2039_v46 }
 0x552   : > { %4529 = vmatprep.mubr.msk.f32.mxu1 %vm365_vm0, %v2040_v16 }
 0x555   : > { %4530 = vmatmul.mubr.msk.f32.gmra.mrb[46].mxu1 %vm365_vm0, %v2041_v43 }
 0x599   : > { %v5254_v51 = vpop.permute.xlu1 %5253  ;;  %v5249_v4 = vpop.permute.xlu0 %5248 }
 0x59a   : > { %v5256_v6 = vunpack.i.h.bf16 %v5254_v51  ;;  %v5255_v50 = vunpack.i.l.bf16 %v5254_v51  ;;  %v5251_v29 = vunpack.i.h.bf16 %v5249_v4  ;;  %v5250_v31 = vunpack.i.l.bf16 %v5249_v4 }
 0x59c   : > { %v4948_v55 = vpack.c.bf16 %v5251_v29, %v5250_v31  ;;  %v4952_v60 = vpack.c.bf16 %v5256_v6, %v5255_v50 }
 0x59d   : > { %v5259_v18 = vpop.permute.xlu1 %5258  ;;  %v5264_v46 = vpop.permute.xlu0 %5263 }
 0x59e   : > { %v5261_v26 = vunpack.i.h.bf16 %v5259_v18  ;;  %v5260_v2 = vunpack.i.l.bf16 %v5259_v18  ;;  %4949 = vmatprep.subr.bf16.mxu0 %v4948_v55  ;;  %v5266_v16 = vunpack.i.h.bf16 %v5264_v46  ;;  %v5265_v21 = vunpack.i.l.bf16 %v5264_v46 }
 0x59f   : > { %4951 = vmatpush3.bf16.msra.mxu0 %v4948_v55 }
 0x5a0   : > { %4953 = vmatprep.subr.bf16.mxu0 %v4952_v60  ;;  %v4956_v35 = vpack.c.bf16 %v5261_v26, %v5260_v2  ;;  %v4960_v51 = vpack.c.bf16 %v5266_v16, %v5265_v21 }
 0x5a1   : > { %v5269_v38 = vpop.permute.xlu1 %5268  ;;  %v5274_v1 = vpop.permute.xlu0 %5273 }
 0x5a2   : > { %v5271_v43 = vunpack.i.h.bf16 %v5269_v38  ;;  %v5270_v22 = vunpack.i.l.bf16 %v5269_v38  ;;  %v5276_v4 = vunpack.i.h.bf16 %v5274_v1  ;;  %v5275_v29 = vunpack.i.l.bf16 %v5274_v1 }
 0x5a3   : > { %4955 = vmatpush3.bf16.msra.mxu0 %v4952_v60 }
 0x5a4   : > { %4957 = vmatprep.subr.bf16.mxu0 %v4956_v35  ;;  %v4964_v31 = vpack.c.bf16 %v5271_v43, %v5270_v22  ;;  %v4968_v6 = vpack.c.bf16 %v5276_v4, %v5275_v29  ;;  %v3808_v4 = vld [vmem:[%s7535_s5 + $0x100] sm:$0xff] }
 0x5a7   : > { %4959 = vmatpush3.bf16.msra.mxu0 %v4956_v35 }
 0x5a8   : > { %4961 = vmatprep.subr.bf16.mxu0 %v4960_v51 }
 0x5ab   : > { %4963 = vmatpush3.bf16.msra.mxu0 %v4960_v51  ;;  %v3809_v51 = vld [vmem:[%s7535_s5 + $0x108] sm:$0xff] }
 0x5ac   : > { %4965 = vmatprep.subr.bf16.mxu0 %v4964_v31 }
 0x5af   : > { %4967 = vmatpush3.bf16.msra.mxu0 %v4964_v31 }
 0x5b0   : > { %4969 = vmatprep.subr.bf16.mxu0 %v4968_v6 }
 0x5b3   : > { %4971 = vmatpush3.bf16.msra.mxu0 %v4968_v6  ;;  %v6758_v6 = vld [vmem:[%s5993_s13 + $0x8] sm:$0xff] }
 0x5b9   : > { %v6719_v50 = vpop.f32.mrb[16].mxu1 }
 0x5ba   : > { %7657 = vst [vmem:[#allocation51_spill] sm:$0xff] %v6719_v50  ;;  %v6721_v18 = vpop.f32.mrb[17].mxu1  ;;  %v2463_v50 = vmul.f32 %v6607_v9, %v5831_v3 }
 0x5bb   : > { %7658 = vst [vmem:[#allocation52_spill] sm:$0xff] %v6721_v18 }
 0x5ed   : > { %v6723_v60 = vpop.f32.mrb[18].mxu1 }
 0x5ee   : > { %7659 = vst [vmem:[#allocation53_spill] sm:$0xff] %v6723_v60  ;;  %v6725_v38 = vpop.f32.mrb[19].mxu1  ;;  %v2460_v60 = vmul.f32 %v6607_v9, %v5826_v0 }
 0x5ef   : > { %7660 = vst [vmem:[#allocation54_spill] sm:$0xff] %v6725_v38  ;;  %v2462_v38 = vmul.f32 %v6607_v9, %v5834_v5 }
 0x5f1   : > { %v5282_v13 = vpack.i.bf16 %v2463_v50, %v2462_v38  ;;  %v6800_v38 = vld [vmem:[%s5993_s13 + $0x18] sm:$0xff] }
 0x5f4   : > { %v6727_v21 = vpop.f32.mrb[20].mxu1 }
 0x5f5   : > { %7661 = vst [vmem:[#allocation55_spill] sm:$0xff] %v6727_v21  ;;  %v6729_v1 = vpop.f32.mrb[21].mxu1 }
 0x5f6   : > { %7662 = vst [vmem:[#allocation56_spill] sm:$0xff] %v6729_v1 }
 0x5f8   : > { %v6731_v22 = vpop.f32.mrb[22].mxu1 }
 0x5f9   : > { %7663 = vst [vmem:[#allocation57_spill] sm:$0xff] %v6731_v22  ;;  %v6733_v55 = vpop.f32.mrb[23].mxu1 }
 0x5fa   : > { %7664 = vst [vmem:[#allocation58_spill] sm:$0xff] %v6733_v55 }
 0x5fc   : > { %v6735_v26 = vpop.f32.mrb[24].mxu1 }
 0x5fd   : > { %7665 = vst [vmem:[#allocation59_spill] sm:$0xff] %v6735_v26  ;;  %v6737_v2 = vpop.f32.mrb[25].mxu1 }
 0x5fe   : > { %7666 = vst [vmem:[#allocation60_spill] sm:$0xff] %v6737_v2 }
 0x600   : > { %v6739_v46 = vpop.f32.mrb[26].mxu1 }
 0x601   : > { %7667 = vst [vmem:[#allocation61_spill] sm:$0xff] %v6739_v46  ;;  %v6741_v16 = vpop.f32.mrb[27].mxu1  ;;  %v2060_v46 = vadd.f32 %v6758_v6, %v3809_v51 }
 0x602   : > { %7668 = vst [vmem:[#allocation62_spill] sm:$0xff] %v6741_v16  ;;  %v6762_v16 = vld [vmem:[%s5993_s13] sm:$0xff] }
 0x604   : > { %v6743_v35 = vpop.f32.mrb[28].mxu1 }
 0x605   : > { %7669 = vst [vmem:[#allocation63_spill] sm:$0xff] %v6743_v35  ;;  %v6745_v43 = vpop.f32.mrb[29].mxu1  ;;  %v2059_v35 = vadd.f32 %v6762_v16, %v3808_v4 }
 0x606   : > { %7670 = vst [vmem:[#allocation64_spill] sm:$0xff] %v6745_v43 }
 0x608   : > { %v6753_v29 = vpop.f32.mrb[30].mxu1 }
 0x609   : > { %7671 = vst [vmem:[#allocation65_spill] sm:$0xff] %v6753_v29  ;;  %v6755_v31 = vpop.f32.mrb[31].mxu1 }
 0x60a   : > { %7672 = vst [vmem:[#allocation66_spill] sm:$0xff] %v6755_v31 }
 0x60c   : > { %v4510_v43 = vpop.f32.mrb[32].mxu1 }
 0x60d   : > { %v6765_v26 = vadd.f32 %v4510_v43, %v2060_v46  ;;  %v2189_v2 = vpop.f32.mrb[33].mxu1  ;;  %v2461_v46 = vmul.f32 %v6607_v9, %v5824_v62  ;;  %v3811_v9 = vld [vmem:[%s7535_s5 + $0x118] sm:$0xff] }
 0x60e   : > { %v6767_v22 = vadd.f32 %v2189_v2, %v2059_v35 }
 0x60f   : > { %2270 = vmax.xlane.f32.xlu1 %v6765_v26  ;;  %v5277_v35 = vpack.i.bf16 %v2461_v46, %v2460_v60 }
 0x610   : > { %v4513_v55 = vpop.f32.mrb[34].mxu1  ;;  %2268 = vmax.xlane.f32.xlu0 %v6767_v22 }
 0x611   : > { %v2199_v29 = vpop.f32.mrb[35].mxu1 }
 0x614   : > { %v4516_v31 = vpop.f32.mrb[36].mxu1 }
 0x615   : > { %v2209_v21 = vpop.f32.mrb[37].mxu1 }
 0x618   : > { %v4519_v1 = vpop.f32.mrb[38].mxu1 }
 0x619   : > { %v2219_v51 = vpop.f32.mrb[39].mxu1 }
 0x61c   : > { %v4522_v43 = vpop.f32.mrb[40].mxu1 }
 0x61d   : > { %v2229_v2 = vpop.f32.mrb[41].mxu1 }
 0x620   : > { %5278 = vrot.lane.b32.xlu1 %v5277_v35, %s5641_s9  ;;  %v4525_v4 = vpop.f32.mrb[42].mxu1  ;;  %v3810_v35 = vld [vmem:[%s7535_s5 + $0x110] sm:$0xff] }
 0x621   : > { %v2239_v18 = vpop.f32.mrb[43].mxu1  ;;  %v2061_v50 = vadd.f32 %v6796_v36, %v3810_v35  ;;  %v2064_v35 = vadd.f32 %v6812_v56, %v3813_v20 }
 0x623   : > { %v6809_v8 = vadd.f32 %v2199_v29, %v2061_v50  ;;  %v3814_v29 = vld [vmem:[%s7535_s5 + $0x130] sm:$0xff]  ;;  %v6829_v20 = vadd.f32 %v4516_v31, %v2064_v35  ;;  %v3816_v31 = vld [vmem:[%s7535_s5 + $0x140] sm:$0xff] }
 0x624   : > { %v6780_v23 = vpop.f32.mrb[44].mxu1 }
 0x625   : > { %v6782_v61 = vpop.f32.mrb[45].mxu1 }
 0x626   : > { %5283 = vrot.lane.b32.xlu0 %v5282_v13, %s5641_s9  ;;  %v2062_v13 = vadd.f32 %v6800_v38, %v3811_v9  ;;  %v2063_v9 = vadd.f32 %v6818_v25, %v3812_v27 }
 0x628   : > { %v6785_v60 = vpop.f32.mrb[46].mxu1  ;;  %v6815_v48 = vadd.f32 %v4513_v55, %v2062_v13  ;;  %v6832_v55 = vld [vmem:[%s5993_s13 + $0x38] sm:$0xff]  ;;  %v6835_v50 = vadd.f32 %v2209_v21, %v2063_v9  ;;  %v6838_v13 = vld [vmem:[%s5993_s13 + $0x30] sm:$0xff]  ;;  %v6852_v21 = vld [vmem:[%s5993_s13 + $0x48] sm:$0xff] }
 0x629   : > { %v6787_v46 = vpop.f32.mrb[47].mxu1  ;;  %v2066_v27 = vadd.f32 %v6832_v55, %v3815_v40  ;;  %7673 = vst [vmem:[#allocation67_spill] sm:$0xff] %v6838_v13  ;;  %v2065_v32 = vadd.f32 %v6838_v13, %v3814_v29  ;;  %v2068_v35 = vadd.f32 %v6852_v21, %v3817_v7  ;;  %v6858_v29 = vld [vmem:[%s5993_s13 + $0x40] sm:$0xff]  ;;  %v6872_v7 = vld [vmem:[%s5993_s13 + $0x58] sm:$0xff] }
 0x62a   : > { %7674 = vst [vmem:[#allocation68_spill] sm:$0xff] %v6858_v29  ;;  %v2067_v28 = vadd.f32 %v6858_v29, %v3816_v31  ;;  %7675 = vst [vmem:[#allocation69_spill] sm:$0xff] %v6872_v7  ;;  %v6878_v31 = vld [vmem:[%s5993_s13 + $0x50] sm:$0xff] }
 0x62b   : > { %v6849_v40 = vadd.f32 %v4519_v1, %v2066_v27  ;;  %v6855_v9 = vadd.f32 %v2219_v51, %v2065_v32  ;;  %v3818_v1 = vld [vmem:[%s7535_s5 + $0x150] sm:$0xff]  ;;  %v6869_v32 = vadd.f32 %v4522_v43, %v2068_v35  ;;  %v2070_v51 = vadd.f32 %v6872_v7, %v3819_v53  ;;  %7676 = vst [vmem:[#allocation70_spill] sm:$0xff] %v6878_v31  ;;  %v3820_v43 = vld [vmem:[%s7535_s5 + $0x160] sm:$0xff] }
 0x62c   : > { %v6875_v27 = vadd.f32 %v2229_v2, %v2067_v28  ;;  %v2069_v14 = vadd.f32 %v6878_v31, %v3818_v1  ;;  %v6892_v28 = vld [vmem:[%s5993_s13 + $0x68] sm:$0xff]  ;;  %v6898_v1 = vld [vmem:[%s5993_s13 + $0x60] sm:$0xff]  ;;  %v3822_v31 = vld [vmem:[%s7535_s5 + $0x170] sm:$0xff] }
 0x62d   : > { %v6889_v53 = vadd.f32 %v4525_v4, %v2070_v51  ;;  %7677 = vst [vmem:[#allocation71_spill] sm:$0xff] %v6892_v28  ;;  %v2072_v2 = vadd.f32 %v6892_v28, %v3821_v45  ;;  %7678 = vst [vmem:[#allocation72_spill] sm:$0xff] %v6898_v1  ;;  %v2071_v63 = vadd.f32 %v6898_v1, %v3820_v43  ;;  %v6920_v51 = vld [vmem:[%s5993_s13 + $0x70] sm:$0xff] }
 0x62e   : > { %v6895_v35 = vadd.f32 %v2239_v18, %v2069_v14  ;;  %v6913_v14 = vld [vmem:[%s5993_s13 + $0x78] sm:$0xff]  ;;  %7680 = vst [vmem:[#allocation74_spill] sm:$0xff] %v6920_v51  ;;  %v2073_v43 = vadd.f32 %v6920_v51, %v3822_v31 }
 0x62f   : > { %v6910_v45 = vadd.f32 %v6780_v23, %v2072_v2  ;;  %7679 = vst [vmem:[#allocation73_spill] sm:$0xff] %v6913_v14  ;;  %v2074_v18 = vadd.f32 %v6913_v14, %v3823_v41  ;;  %v6917_v4 = vadd.f32 %v6782_v61, %v2071_v63  ;;  %v7681_v41 = vld [vmem:[#allocation3_spill] sm:$0xff] }
 0x630   : > { %v6929_v23 = vadd.f32 %v6787_v46, %v2073_v43 }
 0x631   : > { %v6926_v28 = vadd.f32 %v6785_v60, %v2074_v18 }
 0x644   : > { %2272 = vmax.xlane.f32.xlu1 %v6809_v8 }
 0x645   : > { %2274 = vmax.xlane.f32.xlu0 %v6815_v48 }
 0x648   : > { %2278 = vmax.xlane.f32.xlu1 %v6829_v20 }
 0x649   : > { %2276 = vmax.xlane.f32.xlu0 %v6835_v50 }
 0x64c   : > { %2282 = vmax.xlane.f32.xlu1 %v6849_v40 }
 0x64d   : > { %2280 = vmax.xlane.f32.xlu0 %v6855_v9 }
 0x650   : > { %2286 = vmax.xlane.f32.xlu1 %v6869_v32 }
 0x651   : > { %2284 = vmax.xlane.f32.xlu0 %v6875_v27 }
 0x654   : > { %2290 = vmax.xlane.f32.xlu1 %v6889_v53 }
 0x655   : > { %2288 = vmax.xlane.f32.xlu0 %v6895_v35 }
 0x658   : > { %2294 = vmax.xlane.f32.xlu1 %v6910_v45 }
 0x659   : > { %2292 = vmax.xlane.f32.xlu0 %v6917_v4 }
 0x65c   : > { %2298 = vmax.xlane.f32.xlu1 %v6926_v28 }
 0x65d   : > { %2296 = vmax.xlane.f32.xlu0 %v6929_v23 }
 0x673   : > { %3128 = vrot.lane.b32.xlu0 %v7681_v41, %s5641_s9 }
 0x69c   : > { %v2271_v63 = vpop.xlane.xlu1 %2270 }
 0x69d   : > { %v2301_v61 = vsub.f32 %v6765_v26, %v2271_v63  ;;  %v2269_v31 = vpop.xlane.xlu0 %2268 }
 0x69e   : > { %v2300_v2 = vsub.f32 %v6767_v22, %v2269_v31 }
 0x69f   : > { %v2318_v51 = vmul.f32 1.442695, %v2301_v61 }
 0x6a0   : > { %v2316_v14 = vmul.f32 1.442695, %v2300_v2  ;;  %v5279_v60 = vpop.permute.xlu1 %5278 }
 0x6a1   : > { %v5281_v18 = vunpack.i.h.bf16 %v5279_v60  ;;  %v5280_v1 = vunpack.i.l.bf16 %v5279_v60  ;;  %v5284_v46 = vpop.permute.xlu0 %5283 }
 0x6a2   : > { %5391 = vpow2.f32 %v2316_v14  ;;  %v5286_v43 = vunpack.i.h.bf16 %v5284_v46  ;;  %v5285_v7 = vunpack.i.l.bf16 %v5284_v46 }
 0x6a3   : > { %5393 = vpow2.f32 %v2318_v51  ;;  %v4972_v29 = vpack.c.bf16 %v5281_v18, %v5280_v1 }
 0x6a4   : > { %v4976_v13 = vpack.c.bf16 %v5286_v43, %v5285_v7 }
 0x6a5   : > { %4973 = vmatprep.subr.bf16.mxu0 %v4972_v29 }
 0x6a6   : > { %4975 = vmatpush3.bf16.msra.mxu0 %v4972_v29 }
 0x6a7   : > { %4977 = vmatprep.subr.bf16.mxu0 %v4976_v13 }
 0x6aa   : > { %4979 = vmatpush3.bf16.msra.mxu0 %v4976_v13 }
 0x6ab   : > { %4982 = vmatprep.subr.msk.bf16.mxu0 %vm5843_vm11, %v5847_v11 }
 0x6ac   : > { %v6940_v22 = vpop.eup %5391 }
 0x6ad   : > { %v6942_v26 = vpop.eup %5393  ;;  %4564 = vmatprep.mubr.f32.mxu0 %v6940_v22 }
 0x6ae   : > { %4565 = vmatmul.mubr.f32.vlgmr.msra.gmra.mrb[48].mxu0 %v6942_v26 }
 0x6b3   : > { %4985 = vmatpush3.bf16.xpose.msk.msra.mxu0 %vm5843_vm11, %v5847_v11 }
 0x6b4   : > { %4988 = vmatprep.subr.msk.bf16.mxu0 %vm5843_vm11, %v5855_v15 }
 0x6bb   : > { %4991 = vmatpush3.bf16.xpose.msk.msra.mxu0 %vm5843_vm11, %v5855_v15 }
 0x6bc   : > { %4994 = vmatprep.subr.msk.bf16.mxu0 %vm5843_vm11, %v5860_v19 }
 0x6c3   : > { %4997 = vmatpush3.bf16.xpose.msk.msra.mxu0 %vm5843_vm11, %v5860_v19 }
 0x6c4   : > { %5000 = vmatprep.subr.msk.bf16.mxu0 %vm5843_vm11, %v5868_v24 }
 0x6cb   : > { %5003 = vmatpush3.bf16.xpose.msk.msra.mxu0 %vm5843_vm11, %v5868_v24 }
 0x6cc   : > { %5006 = vmatprep.subr.msk.bf16.mxu0 %vm5843_vm11, %v5876_v34 }
 0x6d1   : > { %v2273_v11 = vpop.xlane.xlu1 %2272 }
 0x6d2   : > { %v2302_v15 = vsub.f32 %v6809_v8, %v2273_v11  ;;  %v2275_v13 = vpop.xlane.xlu0 %2274 }
 0x6d3   : > { %v2303_v29 = vsub.f32 %v6815_v48, %v2275_v13  ;;  %5009 = vmatpush3.bf16.xpose.msk.msra.mxu0 %vm5843_vm11, %v5876_v34 }
 0x6d4   : > { %v2320_v19 = vmul.f32 1.442695, %v2302_v15  ;;  %5012 = vmatprep.subr.msk.bf16.mxu0 %vm5843_vm11, %v5904_v58 }
 0x6d5   : > { %v2322_v24 = vmul.f32 1.442695, %v2303_v29  ;;  %v2279_v7 = vpop.xlane.xlu1 %2278 }
 0x6d6   : > { %5395 = vpow2.f32 %v2320_v19  ;;  %v2305_v1 = vsub.f32 %v6829_v20, %v2279_v7  ;;  %v2277_v14 = vpop.xlane.xlu0 %2276 }
 0x6d7   : > { %5397 = vpow2.f32 %v2322_v24  ;;  %v2304_v8 = vsub.f32 %v6835_v50, %v2277_v14 }
 0x6d8   : > { %v2326_v51 = vmul.f32 1.442695, %v2305_v1 }
 0x6d9   : > { %v2324_v48 = vmul.f32 1.442695, %v2304_v8  ;;  %v2283_v63 = vpop.xlane.xlu1 %2282 }
 0x6da   : > { %v2307_v61 = vsub.f32 %v6849_v40, %v2283_v63  ;;  %v2281_v34 = vpop.xlane.xlu0 %2280 }
 0x6db   : > { %5399 = vpow2.f32 %v2324_v48  ;;  %v2306_v31 = vsub.f32 %v6855_v9, %v2281_v34  ;;  %5015 = vmatpush3.bf16.xpose.msk.msra.mxu0 %vm5843_vm11, %v5904_v58 }
 0x6dc   : > { %5401 = vpow2.f32 %v2326_v51  ;;  %v2330_v2 = vmul.f32 1.442695, %v2307_v61  ;;  %5018 = vmatprep.subr.msk.bf16.mxu0 %vm5843_vm11, %v5924_v12 }
 0x6dd   : > { %v2328_v20 = vmul.f32 1.442695, %v2306_v31  ;;  %v2287_v50 = vpop.xlane.xlu1 %2286 }
 0x6de   : > { %v2309_v60 = vsub.f32 %v6869_v32, %v2287_v50  ;;  %v2285_v18 = vpop.xlane.xlu0 %2284 }
 0x6df   : > { %5403 = vpow2.f32 %v2328_v20  ;;  %v2308_v40 = vsub.f32 %v6875_v27, %v2285_v18 }
 0x6e0   : > { %v6990_v46 = vpop.eup %5395  ;;  %5405 = vpow2.f32 %v2330_v2  ;;  %v2334_v9 = vmul.f32 1.442695, %v2309_v60 }
 0x6e1   : > { %v6992_v43 = vpop.eup %5397  ;;  %v2332_v58 = vmul.f32 1.442695, %v2308_v40  ;;  %v2291_v11 = vpop.xlane.xlu1 %2290  ;;  %4567 = vmatprep.mubr.f32.mxu0 %v6990_v46 }
 0x6e2   : > { %v2311_v15 = vsub.f32 %v6889_v53, %v2291_v11  ;;  %v2289_v13 = vpop.xlane.xlu0 %2288  ;;  %4568 = vmatmul.mubr.f32.gmra.mrb[50].mxu0 %v6992_v43 }
 0x6e3   : > { %5407 = vpow2.f32 %v2332_v58  ;;  %v2310_v32 = vsub.f32 %v6895_v35, %v2289_v13  ;;  %5021 = vmatpush3.bf16.xpose.msk.msra.mxu0 %vm5843_vm11, %v5924_v12 }
 0x6e4   : > { %5409 = vpow2.f32 %v2334_v9  ;;  %v2338_v27 = vmul.f32 1.442695, %v2311_v15  ;;  %5024 = vmatprep.subr.msk.bf16.mxu0 %vm5843_vm11, %v5932_v17 }
 0x6e5   : > { %v7004_v29 = vpop.eup %5399  ;;  %v2336_v19 = vmul.f32 1.442695, %v2310_v32  ;;  %v2295_v53 = vpop.xlane.xlu1 %2294 }
 0x6e6   : > { %v7006_v24 = vpop.eup %5401  ;;  %v2313_v7 = vsub.f32 %v6910_v45, %v2295_v53  ;;  %v2293_v1 = vpop.xlane.xlu0 %2292  ;;  %4570 = vmatprep.mubr.f32.mxu0 %v7004_v29 }
 0x6e7   : > { %5411 = vpow2.f32 %v2336_v19  ;;  %v2312_v12 = vsub.f32 %v6917_v4, %v2293_v1  ;;  %4571 = vmatmul.mubr.f32.gmra.mrb[52].mxu0 %v7006_v24 }
 0x6e8   : > { %5413 = vpow2.f32 %v2338_v27  ;;  %v2342_v35 = vmul.f32 1.442695, %v2313_v7 }
 0x6e9   : > { %v7012_v14 = vpop.eup %5403  ;;  %v2340_v8 = vmul.f32 1.442695, %v2312_v12  ;;  %v2299_v51 = vpop.xlane.xlu1 %2298 }
 0x6ea   : > { %v7014_v48 = vpop.eup %5405  ;;  %v2315_v63 = vsub.f32 %v6926_v28, %v2299_v51  ;;  %v2297_v61 = vpop.xlane.xlu0 %2296  ;;  %4573 = vmatprep.mubr.f32.mxu0 %v7012_v14 }
 0x6eb   : > { %5415 = vpow2.f32 %v2340_v8  ;;  %v2314_v45 = vsub.f32 %v6929_v23, %v2297_v61  ;;  %4574 = vmatmul.mubr.f32.gmra.mrb[54].mxu0 %v7014_v48 }
 0x6ec   : > { %5417 = vpow2.f32 %v2342_v35  ;;  %v2346_v4 = vmul.f32 1.442695, %v2315_v63  ;;  %5027 = vmatpush3.bf16.xpose.msk.msra.mxu0 %vm5843_vm11, %v5932_v17 }
 0x6ed   : > { %v7023_v34 = vpop.eup %5407  ;;  %v2344_v31 = vmul.f32 1.442695, %v2314_v45 }
 0x6ee   : > { %v7025_v2 = vpop.eup %5409  ;;  %v7027_v28 = vpop.permute.xlu0 %3128  ;;  %4576 = vmatprep.mubr.f32.mxu0 %v7023_v34 }
 0x6ef   : > { %5419 = vpow2.f32 %v2344_v31  ;;  %4577 = vmatmul.mubr.f32.gmra.mrb[56].mxu0 %v7025_v2  ;;  %v3133_v23 = vmul.f32 %v7027_v28, %v5792_v39  ;;  %v3134_v20 = vmul.f32 %v7027_v28, %v5788_v37  ;;  %v3131_v10 = vmul.f32 %v7027_v28, %v5782_v33 }
 0x6f0   : > { %5421 = vpow2.f32 %v2346_v4  ;;  %v3132_v17 = vmul.f32 %v7027_v28, %v5778_v30  ;;  %v3135_v18 = vmul.f32 %v7027_v28, %v5799_v44  ;;  %v3136_v40 = vmul.f32 %v7027_v28, %v5796_v42 }
 0x6f1   : > { %v7039_v50 = vpop.eup %5411  ;;  %v5292_v60 = vpack.i.bf16 %v3134_v20, %v3133_v23  ;;  %v3137_v11 = vmul.f32 %v7027_v28, %v5805_v49  ;;  %v3138_v15 = vmul.f32 %v7027_v28, %v5803_v47  ;;  %v3139_v27 = vmul.f32 %v7027_v28, %v5812_v54 }
 0x6f2   : > { %v7045_v9 = vpop.eup %5413  ;;  %4579 = vmatprep.mubr.f32.mxu0 %v7039_v50  ;;  %v5287_v58 = vpack.i.bf16 %v3132_v17, %v3131_v10  ;;  %v5297_v32 = vpack.i.bf16 %v3136_v40, %v3135_v18  ;;  %v3140_v19 = vmul.f32 %v7027_v28, %v5810_v52  ;;  %v3141_v1 = vmul.f32 %v7027_v28, %v5819_v59 }
 0x6f3   : > { %5293 = vrot.lane.b32.xlu0 %v5292_v60, %s5641_s9  ;;  %4580 = vmatmul.mubr.f32.gmra.mrb[58].mxu0 %v7045_v9  ;;  %v5302_v7 = vpack.i.bf16 %v3138_v15, %v3137_v11  ;;  %v3142_v12 = vmul.f32 %v7027_v28, %v5817_v57  ;;  %v3143_v51 = vmul.f32 %v7027_v28, %v5826_v0 }
 0x6f4   : > { %5288 = vrot.lane.b32.xlu1 %v5287_v58, %s5641_s9  ;;  %v5307_v8 = vpack.i.bf16 %v3140_v19, %v3139_v27  ;;  %v3144_v63 = vmul.f32 %v7027_v28, %v5824_v62  ;;  %v2709_v4 = vmul.f32 %v7681_v41, %v5782_v33  ;;  %v2710_v23 = vmul.f32 %v7681_v41, %v5778_v30 }
 0x6f5   : > { %v7055_v13 = vpop.eup %5415  ;;  %v5312_v45 = vpack.i.bf16 %v3142_v12, %v3141_v1  ;;  %v2711_v20 = vmul.f32 %v7681_v41, %v5792_v39  ;;  %v2712_v33 = vmul.f32 %v7681_v41, %v5788_v37  ;;  %v2713_v10 = vmul.f32 %v7681_v41, %v5799_v44 }
 0x6f6   : > { %v7061_v53 = vpop.eup %5417  ;;  %4582 = vmatprep.mubr.f32.mxu0 %v7055_v13  ;;  %v5317_v31 = vpack.i.bf16 %v3144_v63, %v3143_v51  ;;  %v2714_v30 = vmul.f32 %v7681_v41, %v5796_v42  ;;  %v2715_v39 = vmul.f32 %v7681_v41, %v5805_v49  ;;  %v2716_v37 = vmul.f32 %v7681_v41, %v5803_v47 }
 0x6f7   : > { %5298 = vrot.lane.b32.xlu0 %v5297_v32, %s5641_s9  ;;  %4583 = vmatmul.mubr.f32.gmra.mrb[60].mxu0 %v7061_v53  ;;  %v2717_v44 = vmul.f32 %v7681_v41, %v5812_v54  ;;  %v2718_v42 = vmul.f32 %v7681_v41, %v5810_v52  ;;  %v2719_v49 = vmul.f32 %v7681_v41, %v5819_v59 }
 0x6f8   : > { %5303 = vrot.lane.b32.xlu1 %v5302_v7, %s5641_s9  ;;  %v2720_v47 = vmul.f32 %v7681_v41, %v5817_v57  ;;  %v2721_v54 = vmul.f32 %v7681_v41, %v5826_v0  ;;  %v2722_v52 = vmul.f32 %v7681_v41, %v5824_v62  ;;  %v2723_v59 = vmul.f32 %v7681_v41, %v5834_v5 }
 0x6f9   : > { %v7071_v35 = vpop.eup %5419  ;;  %v2724_v57 = vmul.f32 %v7681_v41, %v5831_v3 }
 0x6fa   : > { %v7077_v61 = vpop.eup %5421  ;;  %4585 = vmatprep.mubr.f32.mxu0 %v7071_v35 }
 0x6fb   : > { %5308 = vrot.lane.b32.xlu0 %v5307_v8, %s5641_s9  ;;  %4586 = vmatmul.mubr.f32.gmra.mrb[62].mxu0 %v7077_v61 }
 0x6fc   : > { %5313 = vrot.lane.b32.xlu1 %v5312_v45, %s5641_s9  ;;  %4620 = vmatprep.mubr.msk.f32.mxu0 %vm365_vm0, %v2709_v4 }
 0x6ff   : > { %5318 = vrot.lane.b32.xlu0 %v5317_v31, %s5641_s9  ;;  %4621 = vmatmul.mubr.msk.f32.vlgmr.msra.gmra.mrb[64].mxu0 %vm365_vm0, %v2710_v23 }
 0x700   : > { %4623 = vmatprep.mubr.msk.f32.mxu0 %vm365_vm0, %v2711_v20 }
 0x703   : > { %4624 = vmatmul.mubr.msk.f32.gmra.mrb[66].mxu0 %vm365_vm0, %v2712_v33 }
 0x704   : > { %4626 = vmatprep.mubr.msk.f32.mxu0 %vm365_vm0, %v2713_v10 }
 0x707   : > { %4627 = vmatmul.mubr.msk.f32.gmra.mrb[68].mxu0 %vm365_vm0, %v2714_v30 }
 0x708   : > { %4629 = vmatprep.mubr.msk.f32.mxu0 %vm365_vm0, %v2715_v39 }
 0x70b   : > { %4630 = vmatmul.mubr.msk.f32.gmra.mrb[70].mxu0 %vm365_vm0, %v2716_v37 }
 0x70c   : > { %4632 = vmatprep.mubr.msk.f32.mxu0 %vm365_vm0, %v2717_v44 }
 0x70f   : > { %4633 = vmatmul.mubr.msk.f32.gmra.mrb[72].mxu0 %vm365_vm0, %v2718_v42 }
 0x710   : > { %4635 = vmatprep.mubr.msk.f32.mxu0 %vm365_vm0, %v2719_v49 }
 0x713   : > { %4636 = vmatmul.mubr.msk.f32.gmra.mrb[74].mxu0 %vm365_vm0, %v2720_v47 }
 0x714   : > { %4638 = vmatprep.mubr.msk.f32.mxu0 %vm365_vm0, %v2721_v54 }
 0x717   : > { %4639 = vmatmul.mubr.msk.f32.gmra.mrb[76].mxu0 %vm365_vm0, %v2722_v52 }
 0x718   : > { %4641 = vmatprep.mubr.msk.f32.mxu0 %vm365_vm0, %v2723_v59 }
 0x71b   : > { %4642 = vmatmul.mubr.msk.f32.gmra.mrb[78].mxu0 %vm365_vm0, %v2724_v57 }
 0x765   : > { %v5294_v0 = vpop.permute.xlu0 %5293 }
 0x766   : > { %v5289_v17 = vpop.permute.xlu1 %5288  ;;  %v5296_v60 = vunpack.i.h.bf16 %v5294_v0  ;;  %v5295_v18 = vunpack.i.l.bf16 %v5294_v0 }
 0x767   : > { %v5291_v40 = vunpack.i.h.bf16 %v5289_v17  ;;  %v5290_v58 = vunpack.i.l.bf16 %v5289_v17 }
 0x768   : > { %v5032_v15 = vpack.c.bf16 %v5296_v60, %v5295_v18 }
 0x769   : > { %v5028_v11 = vpack.c.bf16 %v5291_v40, %v5290_v58  ;;  %v5299_v62 = vpop.permute.xlu0 %5298  ;;  %v3857_v58 = vld [vmem:[%s7535_s5 + $0x188] sm:$0xff] }
 0x76a   : > { %v5301_v32 = vunpack.i.h.bf16 %v5299_v62  ;;  %v5300_v27 = vunpack.i.l.bf16 %v5299_v62  ;;  %v5304_v19 = vpop.permute.xlu1 %5303 }
 0x76b   : > { %5029 = vmatprep.subr.bf16.mxu0 %v5028_v11  ;;  %5068 = vmatprep.subr.bf16.mxu1 %v5028_v11  ;;  %v5306_v7 = vunpack.i.h.bf16 %v5304_v19  ;;  %v5305_v1 = vunpack.i.l.bf16 %v5304_v19  ;;  %v3859_v19 = vld [vmem:[%s7535_s5 + $0x198] sm:$0xff] }
 0x76c   : > { %5031 = vmatpush3.bf16.msra.mxu0 %v5028_v11  ;;  %5076 = vmatpush3.bf16.msra.mxu1 %v5028_v11  ;;  %v5036_v41 = vpack.c.bf16 %v5301_v32, %v5300_v27  ;;  %v3856_v11 = vld [vmem:[%s7535_s5 + $0x180] sm:$0xff]  ;;  %v2743_v32 = vadd.f32 %v6758_v6, %v3857_v58 }
 0x76d   : > { %5033 = vmatprep.subr.bf16.mxu0 %v5032_v15  ;;  %5069 = vmatprep.subr.bf16.mxu1 %v5032_v15  ;;  %v5309_v12 = vpop.permute.xlu0 %5308  ;;  %v5040_v8 = vpack.c.bf16 %v5306_v7, %v5305_v1  ;;  %v2742_v27 = vadd.f32 %v6762_v16, %v3856_v11  ;;  %v3858_v16 = vld [vmem:[%s7535_s5 + $0x190] sm:$0xff] }
 0x76e   : > { %v5311_v51 = vunpack.i.h.bf16 %v5309_v12  ;;  %v5310_v63 = vunpack.i.l.bf16 %v5309_v12  ;;  %v5314_v45 = vpop.permute.xlu1 %5313  ;;  %v2745_v12 = vadd.f32 %v6800_v38, %v3859_v19 }
 0x76f   : > { %v5316_v31 = vunpack.i.h.bf16 %v5314_v45  ;;  %v5315_v23 = vunpack.i.l.bf16 %v5314_v45 }
 0x770   : > { %5035 = vmatpush3.bf16.msra.mxu0 %v5032_v15  ;;  %5077 = vmatpush3.bf16.msra.mxu1 %v5032_v15  ;;  %v5044_v4 = vpack.c.bf16 %v5311_v51, %v5310_v63  ;;  %v3861_v51 = vld [vmem:[%s7535_s5 + $0x1a8] sm:$0xff] }
 0x771   : > { %5037 = vmatprep.subr.bf16.mxu0 %v5036_v41  ;;  %5070 = vmatprep.subr.bf16.mxu1 %v5036_v41  ;;  %v5319_v20 = vpop.permute.xlu0 %5318  ;;  %v5048_v33 = vpack.c.bf16 %v5316_v31, %v5315_v23  ;;  %v2747_v38 = vadd.f32 %v6812_v56, %v3861_v51  ;;  %v3860_v31 = vld [vmem:[%s7535_s5 + $0x1a0] sm:$0xff]  ;;  %v3865_v56 = vld [vmem:[%s7535_s5 + $0x1c8] sm:$0xff] }
 0x772   : > { %v5321_v10 = vunpack.i.h.bf16 %v5319_v20  ;;  %v5320_v30 = vunpack.i.l.bf16 %v5319_v20  ;;  %v2751_v11 = vadd.f32 %v6852_v21, %v3865_v56  ;;  %v7682_v51 = vld [vmem:[#allocation67_spill] sm:$0xff]  ;;  %v3864_v21 = vld [vmem:[%s7535_s5 + $0x1c0] sm:$0xff]  ;;  %v7684_v56 = vld [vmem:[#allocation69_spill] sm:$0xff] }
 0x774   : > { %5039 = vmatpush3.bf16.msra.mxu0 %v5036_v41  ;;  %5078 = vmatpush3.bf16.msra.mxu1 %v5036_v41  ;;  %v5052_v39 = vpack.c.bf16 %v5321_v10, %v5320_v30  ;;  %v2746_v30 = vadd.f32 %v6818_v25, %v3860_v31  ;;  %v3867_v31 = vld [vmem:[%s7535_s5 + $0x1d8] sm:$0xff] }
 0x775   : > { %5041 = vmatprep.subr.bf16.mxu0 %v5040_v8  ;;  %5071 = vmatprep.subr.bf16.mxu1 %v5040_v8 }
 0x778   : > { %5043 = vmatpush3.bf16.msra.mxu0 %v5040_v8  ;;  %5079 = vmatpush3.bf16.msra.mxu1 %v5040_v8 }
 0x779   : > { %5045 = vmatprep.subr.bf16.mxu0 %v5044_v4  ;;  %5072 = vmatprep.subr.bf16.mxu1 %v5044_v4 }
 0x77c   : > { %5047 = vmatpush3.bf16.msra.mxu0 %v5044_v4  ;;  %5080 = vmatpush3.bf16.msra.mxu1 %v5044_v4  ;;  %v2744_v4 = vadd.f32 %v6796_v36, %v3858_v16  ;;  %v3863_v36 = vld [vmem:[%s7535_s5 + $0x1b8] sm:$0xff] }
 0x77d   : > { %5049 = vmatprep.subr.bf16.mxu0 %v5048_v33  ;;  %5073 = vmatprep.subr.bf16.mxu1 %v5048_v33  ;;  %v2749_v25 = vadd.f32 %v6832_v55, %v3863_v36  ;;  %v2753_v36 = vadd.f32 %v7684_v56, %v3867_v31  ;;  %v7687_v31 = vld [vmem:[#allocation71_spill] sm:$0xff] }
 0x780   : > { %5051 = vmatpush3.bf16.msra.mxu0 %v5048_v33  ;;  %5081 = vmatpush3.bf16.msra.mxu1 %v5048_v33 }
 0x781   : > { %5053 = vmatprep.subr.bf16.mxu0 %v5052_v39  ;;  %5074 = vmatprep.subr.bf16.mxu1 %v5052_v39  ;;  %v7132_v37 = vpop.f32.mrb[48].mxu0 }
 0x782   : > { %v7134_v44 = vpop.f32.mrb[49].mxu0 }
 0x784   : > { %5055 = vmatpush3.bf16.msra.mxu0 %v5052_v39  ;;  %5082 = vmatpush3.bf16.msra.mxu1 %v5052_v39 }
 0x7b5   : > { %v7136_v42 = vpop.f32.mrb[50].mxu0 }
 0x7b6   : > { %v7138_v49 = vpop.f32.mrb[51].mxu0 }
 0x7ba   : > { %v7140_v47 = vpop.f32.mrb[52].mxu0 }
 0x7bb   : > { %v7142_v54 = vpop.f32.mrb[53].mxu0 }
 0x7be   : > { %v7144_v52 = vpop.f32.mrb[54].mxu0 }
 0x7bf   : > { %v7146_v59 = vpop.f32.mrb[55].mxu0 }
 0x7c2   : > { %v7148_v57 = vpop.f32.mrb[56].mxu0 }
 0x7c3   : > { %v7150_v0 = vpop.f32.mrb[57].mxu0 }
 0x7c6   : > { %v7152_v17 = vpop.f32.mrb[58].mxu0 }
 0x7c7   : > { %v7154_v60 = vpop.f32.mrb[59].mxu0 }
 0x7ca   : > { %v7156_v18 = vpop.f32.mrb[60].mxu0 }
 0x7cb   : > { %v7158_v40 = vpop.f32.mrb[61].mxu0 }
 0x7ce   : > { %v7166_v62 = vpop.f32.mrb[62].mxu0 }
 0x7cf   : > { %v7168_v15 = vpop.f32.mrb[63].mxu0 }
 0x7d2   : > { %v4622_v41 = vpop.f32.mrb[64].mxu0 }
 0x7d3   : > { %v7175_v7 = vadd.f32 %v4622_v41, %v2743_v32  ;;  %v2872_v1 = vpop.f32.mrb[65].mxu0 }
 0x7d4   : > { %v7178_v8 = vadd.f32 %v2872_v1, %v2742_v27  ;;  %v3862_v27 = vld [vmem:[%s7535_s5 + $0x1b0] sm:$0xff] }
 0x7d5   : > { %2953 = vmax.xlane.f32.xlu0 %v7175_v7  ;;  %v2748_v16 = vadd.f32 %v7682_v51, %v3862_v27  ;;  %v7685_v27 = vld [vmem:[#allocation70_spill] sm:$0xff] }
 0x7d6   : > { %v4625_v6 = vpop.f32.mrb[66].mxu0  ;;  %2951 = vmax.xlane.f32.xlu1 %v7178_v8  ;;  %v3868_v51 = vld [vmem:[%s7535_s5 + $0x1e0] sm:$0xff] }
 0x7d7   : > { %v7188_v63 = vadd.f32 %v4625_v6, %v2745_v12  ;;  %v2882_v45 = vpop.f32.mrb[67].mxu0 }
 0x7d8   : > { %v7198_v10 = vadd.f32 %v2882_v45, %v2744_v4 }
 0x7da   : > { %v4628_v23 = vpop.f32.mrb[68].mxu0  ;;  %2957 = vmax.xlane.f32.xlu1 %v7188_v63 }
 0x7db   : > { %v7196_v20 = vadd.f32 %v4628_v23, %v2747_v38  ;;  %v2892_v33 = vpop.f32.mrb[69].mxu0  ;;  %v7683_v38 = vld [vmem:[#allocation68_spill] sm:$0xff] }
 0x7dc   : > { %v7210_v32 = vadd.f32 %v2892_v33, %v2746_v30  ;;  %v2750_v4 = vadd.f32 %v7683_v38, %v3864_v21  ;;  %v3869_v38 = vld [vmem:[%s7535_s5 + $0x1e8] sm:$0xff] }
 0x7dd   : > { %2961 = vmax.xlane.f32.xlu0 %v7196_v20  ;;  %v2755_v56 = vadd.f32 %v7687_v31, %v3869_v38  ;;  %v7696_v31 = vld [vmem:[#allocation9_spill] sm:$0xff] }
 0x7de   : > { %v4631_v39 = vpop.f32.mrb[70].mxu0  ;;  %2955 = vmax.xlane.f32.xlu1 %v7198_v10 }
 0x7df   : > { %v2902_v58 = vpop.f32.mrb[71].mxu0  ;;  %v7219_v12 = vadd.f32 %v4631_v39, %v2749_v25  ;;  %v3866_v39 = vld [vmem:[%s7535_s5 + $0x1d0] sm:$0xff] }
 0x7e0   : > { %v7227_v45 = vadd.f32 %v2902_v58, %v2748_v16  ;;  %v7686_v16 = vld [vmem:[#allocation72_spill] sm:$0xff] }
 0x7e1   : > { %v2754_v21 = vadd.f32 %v7686_v16, %v3868_v51  ;;  %v7691_v51 = vld [vmem:[#allocation13_spill] sm:$0xff]  ;;  %v3870_v16 = vld [vmem:[%s7535_s5 + $0x1f0] sm:$0xff] }
 0x7e2   : > { %v4634_v19 = vpop.f32.mrb[72].mxu0  ;;  %2959 = vmax.xlane.f32.xlu1 %v7210_v32 }
 0x7e3   : > { %v7217_v41 = vadd.f32 %v4634_v19, %v2751_v11  ;;  %v2912_v1 = vpop.f32.mrb[73].mxu0  ;;  %v2752_v19 = vadd.f32 %v7685_v27, %v3866_v39 }
 0x7e4   : > { %v7234_v30 = vadd.f32 %v2912_v1, %v2750_v4  ;;  %v3146_v4 = vmul.f32 %v7027_v28, %v5831_v3 }
 0x7e5   : > { %2969 = vmax.xlane.f32.xlu0 %v7217_v41 }
 0x7e6   : > { %v4637_v55 = vpop.f32.mrb[74].mxu0  ;;  %2965 = vmax.xlane.f32.xlu1 %v7219_v12 }
 0x7e7   : > { %v2922_v6 = vpop.f32.mrb[75].mxu0  ;;  %v7241_v25 = vadd.f32 %v4637_v55, %v2753_v36  ;;  %v3145_v55 = vmul.f32 %v7027_v28, %v5834_v5  ;;  %v7688_v5 = vld [vmem:[#allocation73_spill] sm:$0xff]  ;;  %v7689_v28 = vld [vmem:[#allocation12_spill] sm:$0xff] }
 0x7e8   : > { %v7248_v1 = vadd.f32 %v2922_v6, %v2752_v19  ;;  %v3871_v6 = vld [vmem:[%s7535_s5 + $0x1f8] sm:$0xff] }
 0x7e9   : > { %v5322_v39 = vpack.i.bf16 %v3146_v4, %v3145_v55  ;;  %v2757_v19 = vadd.f32 %v7688_v5, %v3871_v6  ;;  %v7694_v55 = vld [vmem:[#allocation14_spill] sm:$0xff]  ;;  %v7695_v4 = vld [vmem:[#allocation5_spill] sm:$0xff]  ;;  %v7698_v6 = vld [vmem:[#allocation16_spill] sm:$0xff] }
 0x7ea   : > { %v4640_v23 = vpop.f32.mrb[76].mxu0  ;;  %2963 = vmax.xlane.f32.xlu1 %v7227_v45  ;;  %v7703_v5 = vld [vmem:[#allocation8_spill] sm:$0xff] }
 0x7eb   : > { %v2932_v33 = vpop.f32.mrb[77].mxu0  ;;  %v7267_v27 = vadd.f32 %v4640_v23, %v2755_v56  ;;  %v7692_v23 = vld [vmem:[#allocation7_spill] sm:$0xff] }
 0x7ec   : > { %v7260_v36 = vadd.f32 %v2932_v33, %v2754_v21  ;;  %v7690_v33 = vld [vmem:[#allocation4_spill] sm:$0xff]  ;;  %v7693_v21 = vld [vmem:[#allocation74_spill] sm:$0xff]  ;;  %v7697_v56 = vld [vmem:[#allocation15_spill] sm:$0xff] }
 0x7ed   : > { %v2756_v38 = vadd.f32 %v7693_v21, %v3870_v16  ;;  %v7712_v16 = vld [vmem:[#allocation47_spill] sm:$0xff]  ;;  %v7716_v21 = vld [vmem:[#allocation48_spill] sm:$0xff] }
 0x7ee   : > { %v4643_v58 = vpop.f32.mrb[78].mxu0  ;;  %2967 = vmax.xlane.f32.xlu1 %v7234_v30 }
 0x7ef   : > { %v2942_v11 = vpop.f32.mrb[79].mxu0  ;;  %v7271_v3 = vadd.f32 %v4643_v58, %v2757_v19  ;;  %v7704_v19 = vld [vmem:[#allocation10_spill] sm:$0xff] }
 0x7f0   : > { %v7283_v58 = vadd.f32 %v2942_v11, %v2756_v38  ;;  %v7700_v11 = vld [vmem:[#allocation11_spill] sm:$0xff] }
 0x7f2   : > { %2973 = vmax.xlane.f32.xlu1 %v7241_v25 }
 0x7f6   : > { %2971 = vmax.xlane.f32.xlu1 %v7248_v1 }
 0x7fa   : > { %2975 = vmax.xlane.f32.xlu1 %v7260_v36 }
 0x7fb   : > { %5323 = vrot.lane.b32.xlu0 %v5322_v39, %s5641_s9  ;;  %v7701_v39 = vld [vmem:[#allocation17_spill] sm:$0xff] }
 0x7fe   : > { %2977 = vmax.xlane.f32.xlu1 %v7267_v27 }
 0x802   : > { %2981 = vmax.xlane.f32.xlu1 %v7271_v3 }
 0x806   : > { %982 = vadd.xlane.f32.xlu1 %v7689_v28  ;;  %v7707_v28 = vld [vmem:[#allocation2_spill] sm:$0xff] }
 0x80a   : > { %1665 = vadd.xlane.f32.xlu1 %v7690_v33  ;;  %v7708_v33 = vld [vmem:[#allocation44_spill] sm:$0xff] }
 0x80e   : > { %984 = vadd.xlane.f32.xlu1 %v7691_v51  ;;  %v7711_v51 = vld [vmem:[#allocation45_spill] sm:$0xff] }
 0x812   : > { %1667 = vadd.xlane.f32.xlu1 %v7692_v23  ;;  %v7715_v23 = vld [vmem:[#allocation46_spill] sm:$0xff] }
 0x816   : > { %2348 = vadd.xlane.f32.xlu1 %v6940_v22  ;;  %v7699_v22 = vld [vmem:[#allocation6_spill] sm:$0xff] }
 0x81a   : > { %2979 = vmax.xlane.f32.xlu0 %v7283_v58  ;;  %2350 = vadd.xlane.f32.xlu1 %v6942_v26  ;;  %v7702_v26 = vld [vmem:[#allocation18_spill] sm:$0xff] }
 0x81e   : > { %986 = vadd.xlane.f32.xlu0 %v7694_v55  ;;  %1669 = vadd.xlane.f32.xlu1 %v7695_v4 }
 0x822   : > { %1671 = vadd.xlane.f32.xlu0 %v7696_v31  ;;  %988 = vadd.xlane.f32.xlu1 %v7697_v56  ;;  %v7718_v31 = vld [vmem:[#allocation26_spill] sm:$0xff]  ;;  %v7719_v56 = vld [vmem:[#allocation49_spill] sm:$0xff] }
 0x826   : > { %2352 = vadd.xlane.f32.xlu0 %v6990_v46  ;;  %2354 = vadd.xlane.f32.xlu1 %v6992_v43  ;;  %v7705_v46 = vld [vmem:[#allocation19_spill] sm:$0xff]  ;;  %v7706_v43 = vld [vmem:[#allocation20_spill] sm:$0xff] }
 0x82a   : > { %990 = vadd.xlane.f32.xlu0 %v7698_v6  ;;  %1673 = vadd.xlane.f32.xlu1 %v7699_v22 }
 0x82e   : > { %1675 = vadd.xlane.f32.xlu0 %v7700_v11  ;;  %992 = vadd.xlane.f32.xlu1 %v7701_v39  ;;  %v7720_v39 = vld [vmem:[#allocation50_spill] sm:$0xff] }
 0x832   : > { %2356 = vadd.xlane.f32.xlu0 %v7004_v29  ;;  %2358 = vadd.xlane.f32.xlu1 %v7006_v24  ;;  %v7709_v29 = vld [vmem:[#allocation21_spill] sm:$0xff]  ;;  %v7710_v24 = vld [vmem:[#allocation22_spill] sm:$0xff] }
 0x836   : > { %994 = vadd.xlane.f32.xlu0 %v7702_v26  ;;  %1677 = vadd.xlane.f32.xlu1 %v7703_v5 }
 0x83a   : > { %1679 = vadd.xlane.f32.xlu0 %v7704_v19  ;;  %996 = vadd.xlane.f32.xlu1 %v7705_v46 }
 0x83e   : > { %2360 = vadd.xlane.f32.xlu0 %v7012_v14  ;;  %2362 = vadd.xlane.f32.xlu1 %v7014_v48  ;;  %v7713_v14 = vld [vmem:[#allocation23_spill] sm:$0xff]  ;;  %v7714_v48 = vld [vmem:[#allocation24_spill] sm:$0xff] }
 0x842   : > { %998 = vadd.xlane.f32.xlu0 %v7706_v43  ;;  %1681 = vadd.xlane.f32.xlu1 %v7707_v28 }
 0x846   : > { %1683 = vadd.xlane.f32.xlu0 %v7708_v33  ;;  %1000 = vadd.xlane.f32.xlu1 %v7709_v29 }
 0x84a   : > { %2364 = vadd.xlane.f32.xlu0 %v7023_v34  ;;  %2366 = vadd.xlane.f32.xlu1 %v7025_v2  ;;  %v7717_v34 = vld [vmem:[#allocation25_spill] sm:$0xff] }
 0x84e   : > { %1002 = vadd.xlane.f32.xlu0 %v7710_v24  ;;  %1685 = vadd.xlane.f32.xlu1 %v7711_v51 }
 0x852   : > { %1687 = vadd.xlane.f32.xlu0 %v7712_v16  ;;  %1004 = vadd.xlane.f32.xlu1 %v7713_v14 }
 0x856   : > { %2368 = vadd.xlane.f32.xlu0 %v7039_v50  ;;  %2370 = vadd.xlane.f32.xlu1 %v7045_v9 }
 0x85a   : > { %1006 = vadd.xlane.f32.xlu0 %v7714_v48  ;;  %1689 = vadd.xlane.f32.xlu1 %v7715_v23 }
 0x85e   : > { %1691 = vadd.xlane.f32.xlu0 %v7716_v21  ;;  %1008 = vadd.xlane.f32.xlu1 %v7717_v34 }
 0x862   : > { %v2954_v2 = vpop.xlane.xlu0 %2953  ;;  %2372 = vadd.xlane.f32.xlu0 %v7055_v13  ;;  %2374 = vadd.xlane.f32.xlu1 %v7061_v53  ;;  %v7721_v53 = vld [vmem:[#allocation27_spill] sm:$0xff] }
 0x863   : > { %v2984_v38 = vsub.f32 %v7175_v7, %v2954_v2  ;;  %v2952_v55 = vpop.xlane.xlu1 %2951 }
 0x864   : > { %v2983_v50 = vsub.f32 %v7178_v8, %v2952_v55 }
 0x865   : > { %v3001_v4 = vmul.f32 1.442695, %v2984_v38 }
 0x866   : > { %v2999_v9 = vmul.f32 1.442695, %v2983_v50  ;;  %1010 = vadd.xlane.f32.xlu0 %v7718_v31  ;;  %1693 = vadd.xlane.f32.xlu1 %v7719_v56 }
 0x867   : > { %5423 = vpow2.f32 %v3001_v4  ;;  %v2958_v6 = vpop.xlane.xlu1 %2957 }
 0x868   : > { %5425 = vpow2.f32 %v2999_v9  ;;  %v2986_v22 = vsub.f32 %v7188_v63, %v2958_v6 }
 0x86a   : > { %v3005_v11 = vmul.f32 1.442695, %v2986_v22  ;;  %v2962_v13 = vpop.xlane.xlu0 %2961  ;;  %1695 = vadd.xlane.f32.xlu0 %v7720_v39  ;;  %1012 = vadd.xlane.f32.xlu1 %v7721_v53 }
 0x86b   : > { %v2988_v7 = vsub.f32 %v7196_v20, %v2962_v13  ;;  %v2956_v8 = vpop.xlane.xlu1 %2955 }
 0x86c   : > { %5427 = vpow2.f32 %v3005_v11  ;;  %v2985_v26 = vsub.f32 %v7198_v10, %v2956_v8 }
 0x86d   : > { %v3009_v5 = vmul.f32 1.442695, %v2988_v7 }
 0x86e   : > { %v3003_v19 = vmul.f32 1.442695, %v2985_v26  ;;  %2376 = vadd.xlane.f32.xlu0 %v7071_v35  ;;  %2378 = vadd.xlane.f32.xlu1 %v7077_v61 }
 0x86f   : > { %5429 = vpow2.f32 %v3009_v5  ;;  %v2960_v63 = vpop.xlane.xlu1 %2959 }
 0x870   : > { %5431 = vpow2.f32 %v3003_v19  ;;  %v2987_v46 = vsub.f32 %v7210_v32, %v2960_v63 }
 0x871   : > { %v5424_v43 = vpop.eup %5423 }
 0x872   : > { %v5426_v28 = vpop.eup %5425  ;;  %v3007_v33 = vmul.f32 1.442695, %v2987_v46  ;;  %v2970_v29 = vpop.xlane.xlu0 %2969  ;;  %3033 = vadd.xlane.f32.xlu1 %v5424_v43 }
 0x873   : > { %v2992_v20 = vsub.f32 %v7217_v41, %v2970_v29  ;;  %3031 = vadd.xlane.f32.xlu0 %v5426_v28  ;;  %4676 = vmatprep.mubr.f32.mxu0 %v5426_v28  ;;  %v2966_v10 = vpop.xlane.xlu1 %2965 }
 0x874   : > { %5433 = vpow2.f32 %v3007_v33  ;;  %v2990_v35 = vsub.f32 %v7219_v12, %v2966_v10 }
 0x875   : > { %v3017_v16 = vmul.f32 1.442695, %v2992_v20 }
 0x876   : > { %v5428_v24 = vpop.eup %5427  ;;  %v3013_v61 = vmul.f32 1.442695, %v2990_v35  ;;  %v5324_v51 = vpop.permute.xlu0 %5323 }
 0x877   : > { %v5326_v14 = vunpack.i.h.bf16 %v5324_v51  ;;  %v5325_v48 = vunpack.i.l.bf16 %v5324_v51  ;;  %3037 = vadd.xlane.f32.xlu1 %v5428_v24  ;;  %v2964_v32 = vpop.xlane.xlu1 %2963 }
 0x878   : > { %5435 = vpow2.f32 %v3013_v61  ;;  %v2989_v23 = vsub.f32 %v7227_v45, %v2964_v32  ;;  %v7722_v32 = vld [vmem:[#allocation29_spill] sm:$0xff] }
 0x879   : > { %v5430_v21 = vpop.eup %5429  ;;  %v5056_v34 = vpack.c.bf16 %v5326_v14, %v5325_v48  ;;  %5437 = vpow2.f32 %v3017_v16 }
 0x87a   : > { %v5432_v41 = vpop.eup %5431  ;;  %v3011_v2 = vmul.f32 1.442695, %v2989_v23 }
 0x87b   : > { %5057 = vmatprep.subr.bf16.mxu0 %v5056_v34  ;;  %5075 = vmatprep.subr.bf16.mxu1 %v5056_v34  ;;  %v2968_v38 = vpop.xlane.xlu1 %2967 }
 0x87c   : > { %5439 = vpow2.f32 %v3011_v2  ;;  %3041 = vadd.xlane.f32.xlu1 %v5430_v21  ;;  %3035 = vadd.xlane.f32.xlu0 %v5432_v41  ;;  %v2991_v12 = vsub.f32 %v7234_v30, %v2968_v38 }
 0x87d   : > { %5059 = vmatpush3.bf16.msra.mxu0 %v5056_v34  ;;  %5083 = vmatpush3.bf16.msra.mxu1 %v5056_v34 }
 0x87e   : > { %v5434_v55 = vpop.eup %5433  ;;  %v3015_v50 = vmul.f32 1.442695, %v2991_v12  ;;  %v7723_v12 = vld [vmem:[#allocation52_spill] sm:$0xff] }
 0x87f   : > { %v2974_v4 = vpop.xlane.xlu1 %2973 }
 0x880   : > { %5441 = vpow2.f32 %v3015_v50  ;;  %4677 = vmatmul.mubr.f32.vlgmr.msra.gmra.mrb[80].mxu0 %v5424_v43  ;;  %3039 = vadd.xlane.f32.xlu0 %v5434_v55  ;;  %v2994_v45 = vsub.f32 %v7241_v25, %v2974_v4 }
 0x881   : > { %4679 = vmatprep.mubr.f32.mxu0 %v5432_v41 }
 0x882   : > { %v5436_v9 = vpop.eup %5435  ;;  %v3021_v31 = vmul.f32 1.442695, %v2994_v45 }
 0x883   : > { %3045 = vadd.xlane.f32.xlu1 %v5436_v9  ;;  %v2972_v56 = vpop.xlane.xlu1 %2971  ;;  %v5438_v30 = vpop.eup %5437 }
 0x884   : > { %5443 = vpow2.f32 %v3021_v31  ;;  %4680 = vmatmul.mubr.f32.gmra.mrb[82].mxu0 %v5428_v24  ;;  %v2993_v6 = vsub.f32 %v7248_v1, %v2972_v56 }
 0x885   : > { %4682 = vmatprep.mubr.f32.mxu0 %v5434_v55 }
 0x886   : > { %v5440_v22 = vpop.eup %5439  ;;  %v3019_v11 = vmul.f32 1.442695, %v2993_v6 }
 0x887   : > { %3049 = vadd.xlane.f32.xlu1 %v5438_v30  ;;  %3043 = vadd.xlane.f32.xlu0 %v5440_v22  ;;  %v2976_v13 = vpop.xlane.xlu1 %2975 }
 0x888   : > { %5445 = vpow2.f32 %v3019_v11  ;;  %4683 = vmatmul.mubr.f32.gmra.mrb[84].mxu0 %v5430_v21  ;;  %4685 = vmatprep.mubr.f32.mxu1 %v5440_v22  ;;  %v2995_v25 = vsub.f32 %v7260_v36, %v2976_v13  ;;  %v7724_v22 = vld [vmem:[#allocation28_spill] sm:$0xff] }
 0x889   : > { %4686 = vmatmul.mubr.f32.vlgmr.msra.gmra.mrb[48].mxu1 %v5436_v9 }
 0x88a   : > { %v5442_v39 = vpop.eup %5441  ;;  %v3023_v53 = vmul.f32 1.442695, %v2995_v25 }
 0x88b   : > { %3047 = vadd.xlane.f32.xlu0 %v5442_v39  ;;  %4688 = vmatprep.mubr.f32.mxu1 %v5442_v39  ;;  %v2978_v7 = vpop.xlane.xlu1 %2977 }
 0x88c   : > { %5447 = vpow2.f32 %v3023_v53  ;;  %v2996_v1 = vsub.f32 %v7267_v27, %v2978_v7 }
 0x88d   : > { %4689 = vmatmul.mubr.f32.gmra.mrb[50].mxu1 %v5438_v30 }
 0x88e   : > { %v5444_v8 = vpop.eup %5443  ;;  %v3025_v26 = vmul.f32 1.442695, %v2996_v1  ;;  %v7725_v1 = vld [vmem:[#allocation51_spill] sm:$0xff] }
 0x88f   : > { %3053 = vadd.xlane.f32.xlu1 %v5444_v8  ;;  %v2982_v5 = vpop.xlane.xlu1 %2981 }
 0x890   : > { %5449 = vpow2.f32 %v3025_v26  ;;  %v2998_v19 = vsub.f32 %v7271_v3, %v2982_v5 }
 0x892   : > { %v5446_v63 = vpop.eup %5445  ;;  %v3029_v46 = vmul.f32 1.442695, %v2998_v19 }
 0x893   : > { %3051 = vadd.xlane.f32.xlu0 %v5446_v63  ;;  %4691 = vmatprep.mubr.f32.mxu1 %v5446_v63  ;;  %v983_v36 = vpop.xlane.xlu1 %982 }
 0x894   : > { %5451 = vpow2.f32 %v3029_v46  ;;  %4692 = vmatmul.mubr.f32.gmra.mrb[52].mxu1 %v5444_v8 }
 0x895   : > { %5453 = vrcp.f32 %v983_v36 }
 0x896   : > { %v5448_v43 = vpop.eup %5447 }
 0x897   : > { %3055 = vadd.xlane.f32.xlu0 %v5448_v43  ;;  %4694 = vmatprep.mubr.f32.mxu1 %v5448_v43  ;;  %v1666_v27 = vpop.xlane.xlu1 %1665 }
 0x898   : > { %5455 = vrcp.f32 %v1666_v27 }
 0x89a   : > { %v5450_v28 = vpop.eup %5449 }
 0x89b   : > { %3057 = vadd.xlane.f32.xlu1 %v5450_v28  ;;  %4695 = vmatmul.mubr.f32.gmra.mrb[54].mxu1 %v5450_v28  ;;  %v985_v33 = vpop.xlane.xlu1 %984 }
 0x89c   : > { %5457 = vrcp.f32 %v985_v33 }
 0x89e   : > { %v7344_v29 = vpop.eup %5451 }
 0x89f   : > { %v5454_v3 = vpop.eup %5453  ;;  %3061 = vadd.xlane.f32.xlu1 %v7344_v29  ;;  %v1668_v20 = vpop.xlane.xlu1 %1667 }
 0x8a0   : > { %v1030_v10 = vmul.f32 %v5454_v3, %v983_v36  ;;  %5459 = vrcp.f32 %v1668_v20 }
 0x8a2   : > { %v5456_v35 = vpop.eup %5455  ;;  %v1046_v24 = vsub.f32 2.0, %v1030_v10 }
 0x8a3   : > { %v1713_v61 = vmul.f32 %v5456_v35, %v1666_v27  ;;  %v2349_v51 = vpop.xlane.xlu1 %2348 }
 0x8a4   : > { %v1062_v16 = vmul.f32 %v5454_v3, %v1046_v24  ;;  %5461 = vrcp.f32 %v2349_v51 }
 0x8a5   : > { %v1729_v14 = vsub.f32 2.0, %v1713_v61 }
 0x8a6   : > { %v5458_v48 = vpop.eup %5457  ;;  %v1307_v23 = vmul.f32 %v7722_v32, %v1062_v16 }
 0x8a7   : > { %v1745_v21 = vmul.f32 %v5456_v35, %v1729_v14  ;;  %v1031_v34 = vmul.f32 %v5458_v48, %v985_v33  ;;  %v2980_v41 = vpop.xlane.xlu0 %2979  ;;  %v2351_v2 = vpop.xlane.xlu1 %2350 }
 0x8a8   : > { %v2997_v38 = vsub.f32 %v7283_v58, %v2980_v41  ;;  %5463 = vrcp.f32 %v2351_v2 }
 0x8a9   : > { %v1990_v55 = vmul.f32 %v7723_v12, %v1745_v21  ;;  %v1047_v50 = vsub.f32 2.0, %v1031_v34 }
 0x8aa   : > { %v5460_v4 = vpop.eup %5459  ;;  %v3027_v45 = vmul.f32 1.442695, %v2997_v38 }
 0x8ab   : > { %v1063_v9 = vmul.f32 %v5458_v48, %v1047_v50  ;;  %v1714_v31 = vmul.f32 %v5460_v4, %v1668_v20  ;;  %v987_v56 = vpop.xlane.xlu0 %986  ;;  %v1670_v6 = vpop.xlane.xlu1 %1669  ;;  %v2006_v30 = vadd.f32 %v1990_v55, %v1307_v23 }
 0x8ac   : > { %5465 = vpow2.f32 %v3027_v45 }
 0x8ad   : > { %v1308_v11 = vmul.f32 %v7724_v22, %v1063_v9  ;;  %v1730_v13 = vsub.f32 2.0, %v1714_v31  ;;  %5467 = vrcp.f32 %v987_v56  ;;  %v7727_v31 = vld [vmem:[#allocation54_spill] sm:$0xff] }
 0x8ae   : > { %v5462_v25 = vpop.eup %5461  ;;  %5469 = vrcp.f32 %v1670_v6 }
 0x8af   : > { %v1746_v39 = vmul.f32 %v5460_v4, %v1730_v13  ;;  %v2396_v58 = vmul.f32 %v5462_v25, %v2349_v51  ;;  %v1672_v53 = vpop.xlane.xlu0 %1671  ;;  %v989_v7 = vpop.xlane.xlu1 %988  ;;  %v7726_v4 = vld [vmem:[#allocation31_spill] sm:$0xff] }
 0x8b0   : > { %5471 = vrcp.f32 %v1672_v53 }
 0x8b1   : > { %v1991_v8 = vmul.f32 %v7725_v1, %v1746_v39  ;;  %v2412_v26 = vsub.f32 2.0, %v2396_v58  ;;  %5473 = vrcp.f32 %v989_v7  ;;  %v7728_v39 = vld [vmem:[#allocation53_spill] sm:$0xff] }
 0x8b2   : > { %v5464_v5 = vpop.eup %5463 }
 0x8b3   : > { %v2428_v19 = vmul.f32 %v5462_v25, %v2412_v26  ;;  %v2397_v63 = vmul.f32 %v5464_v5, %v2351_v2  ;;  %v2353_v46 = vpop.xlane.xlu0 %2352  ;;  %v2355_v36 = vpop.xlane.xlu1 %2354  ;;  %v2007_v43 = vadd.f32 %v1991_v8, %v1308_v11  ;;  %v7729_v8 = vld [vmem:[#allocation30_spill] sm:$0xff] }
 0x8b4   : > { %5475 = vrcp.f32 %v2353_v46 }
 0x8b5   : > { %v2673_v27 = vmul.f32 %v7134_v44, %v2428_v19  ;;  %v2413_v28 = vsub.f32 2.0, %v2397_v63  ;;  %5477 = vrcp.f32 %v2355_v36 }
 0x8b6   : > { %v5466_v33 = vpop.eup %5465 }
 0x8b7   : > { %v5468_v3 = vpop.eup %5467  ;;  %v2429_v20 = vmul.f32 %v5464_v5, %v2413_v28  ;;  %v991_v10 = vpop.xlane.xlu0 %990  ;;  %3059 = vadd.xlane.f32.xlu0 %v5466_v33  ;;  %4697 = vmatprep.mubr.f32.mxu1 %v5466_v33  ;;  %v7353_v24 = vadd.f32 %v2673_v27, %v2006_v30 }
 0x8b8   : > { %v1674_v35 = vpop.xlane.xlu1 %1673  ;;  %v5470_v61 = vpop.eup %5469  ;;  %v1032_v51 = vmul.f32 %v5468_v3, %v987_v56  ;;  %5479 = vrcp.f32 %v991_v10  ;;  %4698 = vmatmul.mubr.f32.gmra.mrb[56].mxu1 %v7344_v29 }
 0x8b9   : > { %v2674_v16 = vmul.f32 %v7132_v37, %v2429_v20  ;;  %v1715_v14 = vmul.f32 %v5470_v61, %v1670_v6  ;;  %5481 = vrcp.f32 %v1674_v35 }
 0x8ba   : > { %v5472_v44 = vpop.eup %5471  ;;  %v1048_v48 = vsub.f32 2.0, %v1032_v51 }
 0x8bb   : > { %v5474_v32 = vpop.eup %5473  ;;  %v1731_v23 = vsub.f32 2.0, %v1715_v14  ;;  %v1716_v21 = vmul.f32 %v5472_v44, %v1672_v53  ;;  %v1676_v34 = vpop.xlane.xlu0 %1675  ;;  %v7357_v2 = vadd.f32 %v2674_v16, %v2007_v43 }
 0x8bc   : > { %v993_v41 = vpop.xlane.xlu1 %992  ;;  %v1064_v38 = vmul.f32 %v5468_v3, %v1048_v48  ;;  %v1033_v12 = vmul.f32 %v5474_v32, %v989_v7  ;;  %5483 = vrcp.f32 %v1676_v34 }
 0x8bd   : > { %v1747_v55 = vmul.f32 %v5470_v61, %v1731_v23  ;;  %v1732_v50 = vsub.f32 2.0, %v1716_v21  ;;  %5485 = vrcp.f32 %v993_v41 }
 0x8be   : > { %v5476_v29 = vpop.eup %5475  ;;  %v1309_v37 = vmul.f32 %v7726_v4, %v1064_v38  ;;  %v1049_v45 = vsub.f32 2.0, %v1033_v12  ;;  %v7730_v12 = vld [vmem:[#allocation33_spill] sm:$0xff] }
 0x8bf   : > { %v5478_v9 = vpop.eup %5477  ;;  %v1992_v56 = vmul.f32 %v7727_v31, %v1747_v55  ;;  %v1748_v6 = vmul.f32 %v5472_v44, %v1732_v50  ;;  %v2398_v30 = vmul.f32 %v5476_v29, %v2353_v46  ;;  %v2357_v22 = vpop.xlane.xlu0 %2356 }
 0x8c0   : > { %v2359_v11 = vpop.xlane.xlu1 %2358  ;;  %v1065_v13 = vmul.f32 %v5474_v32, %v1049_v45  ;;  %v2399_v25 = vmul.f32 %v5478_v9, %v2355_v36  ;;  %5487 = vrcp.f32 %v2357_v22 }
 0x8c1   : > { %v1993_v58 = vmul.f32 %v7728_v39, %v1748_v6  ;;  %v2414_v53 = vsub.f32 2.0, %v2398_v30  ;;  %5489 = vrcp.f32 %v2359_v11  ;;  %v2008_v7 = vadd.f32 %v1992_v56, %v1309_v37  ;;  %v7732_v30 = vld [vmem:[#allocation55_spill] sm:$0xff] }
 0x8c2   : > { %v5480_v1 = vpop.eup %5479  ;;  %v1310_v26 = vmul.f32 %v7729_v8, %v1065_v13  ;;  %v2415_v5 = vsub.f32 2.0, %v2399_v25 }
 0x8c3   : > { %v5482_v19 = vpop.eup %5481  ;;  %v2430_v63 = vmul.f32 %v5476_v29, %v2414_v53  ;;  %v1034_v43 = vmul.f32 %v5480_v1, %v991_v10  ;;  %v995_v27 = vpop.xlane.xlu0 %994  ;;  %v7731_v29 = vld [vmem:[#allocation56_spill] sm:$0xff] }
 0x8c4   : > { %v1678_v28 = vpop.xlane.xlu1 %1677  ;;  %v2431_v46 = vmul.f32 %v5478_v9, %v2415_v5  ;;  %v1717_v33 = vmul.f32 %v5482_v19, %v1674_v35  ;;  %5491 = vrcp.f32 %v995_v27  ;;  %v2009_v3 = vadd.f32 %v1993_v58, %v1310_v26  ;;  %v7733_v58 = vld [vmem:[#allocation32_spill] sm:$0xff] }
 0x8c5   : > { %v2675_v36 = vmul.f32 %v7138_v49, %v2430_v63  ;;  %v1050_v20 = vsub.f32 2.0, %v1034_v43  ;;  %5493 = vrcp.f32 %v1678_v28 }
 0x8c6   : > { %v5484_v61 = vpop.eup %5483  ;;  %v2676_v51 = vmul.f32 %v7136_v42, %v2431_v46  ;;  %v1733_v16 = vsub.f32 2.0, %v1717_v33 }
 0x8c7   : > { %v5486_v14 = vpop.eup %5485  ;;  %v1066_v44 = vmul.f32 %v5480_v1, %v1050_v20  ;;  %v1718_v48 = vmul.f32 %v5484_v61, %v1676_v34  ;;  %v1680_v32 = vpop.xlane.xlu0 %1679  ;;  %v7365_v10 = vadd.f32 %v2675_v36, %v2008_v7  ;;  %v3388_v20 = vld [vmem:[%s7533_s3] sm:$0xff] }
 0x8c8   : > { %v997_v23 = vpop.xlane.xlu1 %996  ;;  %v1749_v21 = vmul.f32 %v5482_v19, %v1733_v16  ;;  %v1035_v38 = vmul.f32 %v5486_v14, %v993_v41  ;;  %5495 = vrcp.f32 %v1680_v32  ;;  %v7367_v35 = vadd.f32 %v2676_v51, %v2009_v3 }
 0x8c9   : > { %v1311_v49 = vmul.f32 %v7730_v12, %v1066_v44  ;;  %v1734_v55 = vsub.f32 2.0, %v1718_v48  ;;  %5497 = vrcp.f32 %v997_v23 }
 0x8ca   : > { %v5488_v50 = vpop.eup %5487  ;;  %v1994_v42 = vmul.f32 %v7731_v29, %v1749_v21  ;;  %v1051_v4 = vsub.f32 2.0, %v1035_v38  ;;  %v7734_v38 = vld [vmem:[#allocation35_spill] sm:$0xff] }
 0x8cb   : > { %v5490_v37 = vpop.eup %5489  ;;  %v1750_v45 = vmul.f32 %v5484_v61, %v1734_v55  ;;  %v2400_v34 = vmul.f32 %v5488_v50, %v2357_v22  ;;  %v2361_v9 = vpop.xlane.xlu0 %2360 }
 0x8cc   : > { %v2363_v31 = vpop.xlane.xlu1 %2362  ;;  %v1067_v56 = vmul.f32 %v5486_v14, %v1051_v4  ;;  %v2401_v6 = vmul.f32 %v5490_v37, %v2359_v11  ;;  %5499 = vrcp.f32 %v2361_v9  ;;  %v2010_v41 = vadd.f32 %v1994_v42, %v1311_v49 }
 0x8cd   : > { %v1995_v13 = vmul.f32 %v7732_v30, %v1750_v45  ;;  %v2416_v25 = vsub.f32 2.0, %v2400_v34  ;;  %5501 = vrcp.f32 %v2363_v31 }
 0x8ce   : > { %v5492_v39 = vpop.eup %5491  ;;  %v1312_v53 = vmul.f32 %v7733_v58, %v1067_v56  ;;  %v2417_v7 = vsub.f32 2.0, %v2401_v6  ;;  %v3391_v56 = vld [vmem:[%s7533_s3 + $0x18] sm:$0xff] }
 0x8cf   : > { %v5494_v1 = vpop.eup %5493  ;;  %v2432_v8 = vmul.f32 %v5488_v50, %v2416_v25  ;;  %v1036_v26 = vmul.f32 %v5492_v39, %v995_v27  ;;  %v999_v5 = vpop.xlane.xlu0 %998  ;;  %v3389_v27 = vld [vmem:[%s7533_s3 + $0x8] sm:$0xff]  ;;  %v7735_v50 = vld [vmem:[#allocation58_spill] sm:$0xff] }
 0x8d0   : > { %v1682_v19 = vpop.xlane.xlu1 %1681  ;;  %v2433_v22 = vmul.f32 %v5490_v37, %v2417_v7  ;;  %v1719_v63 = vmul.f32 %v5494_v1, %v1678_v28  ;;  %5503 = vrcp.f32 %v999_v5  ;;  %v2011_v43 = vadd.f32 %v1995_v13, %v1312_v53  ;;  %v7736_v13 = vld [vmem:[#allocation57_spill] sm:$0xff]  ;;  %v7737_v53 = vld [vmem:[#allocation34_spill] sm:$0xff] }
 0x8d1   : > { %v2677_v11 = vmul.f32 %v7142_v54, %v2432_v8  ;;  %v1052_v46 = vsub.f32 2.0, %v1036_v26  ;;  %5505 = vrcp.f32 %v1682_v19  ;;  %v5060_v54 = vpack.c.bf16 %v3389_v27, %v3388_v20 }
 0x8d2   : > { %v5496_v33 = vpop.eup %5495  ;;  %v2678_v3 = vmul.f32 %v7140_v47, %v2433_v22  ;;  %v1735_v36 = vsub.f32 2.0, %v1719_v63 }
 0x8d3   : > { %v5498_v61 = vpop.eup %5497  ;;  %v1068_v28 = vmul.f32 %v5492_v39, %v1052_v46  ;;  %v1720_v51 = vmul.f32 %v5496_v33, %v1680_v32  ;;  %v1684_v16 = vpop.xlane.xlu0 %1683  ;;  %v7381_v44 = vadd.f32 %v2677_v11, %v2010_v41  ;;  %5061 = vmatprep.subr.bf16.mxu1 %v5060_v54 }
 0x8d4   : > { %v1001_v14 = vpop.xlane.xlu1 %1000  ;;  %v1751_v48 = vmul.f32 %v5494_v1, %v1735_v36  ;;  %v1037_v21 = vmul.f32 %v5498_v61, %v997_v23  ;;  %5507 = vrcp.f32 %v1684_v16  ;;  %v7383_v47 = vadd.f32 %v2678_v3, %v2011_v43  ;;  %5063 = vmatpush3.bf16.msra.mxu1 %v5060_v54  ;;  %v3390_v23 = vld [vmem:[%s7533_s3 + $0x10] sm:$0xff] }
 0x8d5   : > { %v1313_v12 = vmul.f32 %v7734_v38, %v1068_v28  ;;  %v1736_v49 = vsub.f32 2.0, %v1720_v51  ;;  %5509 = vrcp.f32 %v1001_v14  ;;  %v5064_v30 = vpack.c.bf16 %v3391_v56, %v3390_v23 }
 0x8d6   : > { %v5500_v55 = vpop.eup %5499  ;;  %v1996_v29 = vmul.f32 %v7735_v50, %v1751_v48  ;;  %v1053_v42 = vsub.f32 2.0, %v1037_v21  ;;  %v7739_v50 = vld [vmem:[#allocation60_spill] sm:$0xff] }
 0x8d7   : > { %v5502_v32 = vpop.eup %5501  ;;  %v1752_v4 = vmul.f32 %v5496_v33, %v1736_v49  ;;  %v2402_v37 = vmul.f32 %v5500_v55, %v2361_v9  ;;  %v2365_v45 = vpop.xlane.xlu0 %2364  ;;  %5065 = vmatprep.subr.bf16.mxu1 %v5064_v30 }
 0x8d8   : > { %v2367_v34 = vpop.xlane.xlu1 %2366  ;;  %v1069_v6 = vmul.f32 %v5498_v61, %v1053_v42  ;;  %v2403_v41 = vmul.f32 %v5502_v32, %v2363_v31  ;;  %5511 = vrcp.f32 %v2365_v45  ;;  %v2012_v58 = vadd.f32 %v1996_v29, %v1313_v12  ;;  %5067 = vmatpush3.bf16.msra.mxu1 %v5064_v30  ;;  %v7738_v12 = vld [vmem:[#allocation37_spill] sm:$0xff] }
 0x8d9   : > { %v1997_v25 = vmul.f32 %v7736_v13, %v1752_v4  ;;  %v2418_v39 = vsub.f32 2.0, %v2402_v37  ;;  %5513 = vrcp.f32 %v2367_v34 }
 0x8da   : > { %v5504_v9 = vpop.eup %5503  ;;  %v1314_v7 = vmul.f32 %v7737_v53, %v1069_v6  ;;  %v2419_v1 = vsub.f32 2.0, %v2403_v41  ;;  %v7740_v6 = vld [vmem:[#allocation59_spill] sm:$0xff] }
 0x8db   : > { %v5506_v8 = vpop.eup %5505  ;;  %v2434_v26 = vmul.f32 %v5500_v55, %v2418_v39  ;;  %v1038_v22 = vmul.f32 %v5504_v9, %v999_v5  ;;  %v1003_v63 = vpop.xlane.xlu0 %1002 }
 0x8dc   : > { %v1686_v43 = vpop.xlane.xlu1 %1685  ;;  %v2435_v11 = vmul.f32 %v5502_v32, %v2419_v1  ;;  %v1721_v31 = vmul.f32 %v5506_v8, %v1682_v19  ;;  %5515 = vrcp.f32 %v1003_v63  ;;  %v2013_v46 = vadd.f32 %v1997_v25, %v1314_v7  ;;  %v7741_v25 = vld [vmem:[#allocation36_spill] sm:$0xff] }
 0x8dd   : > { %v2679_v33 = vmul.f32 %v7146_v59, %v2434_v26  ;;  %v1054_v3 = vsub.f32 2.0, %v1038_v22  ;;  %5517 = vrcp.f32 %v1686_v43 }
 0x8de   : > { %v5508_v36 = vpop.eup %5507  ;;  %v2680_v20 = vmul.f32 %v7144_v52, %v2435_v11  ;;  %v1737_v27 = vsub.f32 2.0, %v1721_v31 }
 0x8df   : > { %v5510_v61 = vpop.eup %5509  ;;  %v1070_v28 = vmul.f32 %v5504_v9, %v1054_v3  ;;  %v1722_v51 = vmul.f32 %v5508_v36, %v1684_v16  ;;  %v1688_v54 = vpop.xlane.xlu0 %1687  ;;  %v7397_v48 = vadd.f32 %v2679_v33, %v2012_v58 }
 0x8e0   : > { %v1005_v5 = vpop.xlane.xlu1 %1004  ;;  %v1753_v21 = vmul.f32 %v5506_v8, %v1737_v27  ;;  %v1039_v38 = vmul.f32 %v5510_v61, %v1001_v14  ;;  %5519 = vrcp.f32 %v1688_v54  ;;  %v7399_v19 = vadd.f32 %v2680_v20, %v2013_v46 }
 0x8e1   : > { %v1315_v59 = vmul.f32 %v7738_v12, %v1070_v28  ;;  %v1738_v49 = vsub.f32 2.0, %v1722_v51  ;;  %5521 = vrcp.f32 %v1005_v5 }
 0x8e2   : > { %v5512_v55 = vpop.eup %5511  ;;  %v1998_v52 = vmul.f32 %v7739_v50, %v1753_v21  ;;  %v1055_v29 = vsub.f32 2.0, %v1039_v38  ;;  %v7742_v21 = vld [vmem:[#allocation39_spill] sm:$0xff] }
 0x8e3   : > { %v5514_v42 = vpop.eup %5513  ;;  %v1754_v32 = vmul.f32 %v5508_v36, %v1738_v49  ;;  %v2404_v16 = vmul.f32 %v5512_v55, %v2365_v45  ;;  %v2369_v4 = vpop.xlane.xlu0 %2368 }
 0x8e4   : > { %v2371_v37 = vpop.xlane.xlu1 %2370  ;;  %v1071_v23 = vmul.f32 %v5510_v61, %v1055_v29  ;;  %v2405_v56 = vmul.f32 %v5514_v42, %v2367_v34  ;;  %5523 = vrcp.f32 %v2369_v4  ;;  %v2014_v14 = vadd.f32 %v1998_v52, %v1315_v59  ;;  %v7743_v59 = vld [vmem:[#allocation62_spill] sm:$0xff] }
 0x8e5   : > { %v1999_v41 = vmul.f32 %v7740_v6, %v1754_v32  ;;  %v2420_v30 = vsub.f32 2.0, %v2404_v16  ;;  %5525 = vrcp.f32 %v2371_v37  ;;  %v7744_v16 = vld [vmem:[#allocation61_spill] sm:$0xff]  ;;  %v7745_v6 = vld [vmem:[#allocation38_spill] sm:$0xff] }
 0x8e6   : > { %v5516_v13 = vpop.eup %5515  ;;  %v1316_v39 = vmul.f32 %v7741_v25, %v1071_v23  ;;  %v2421_v58 = vsub.f32 2.0, %v2405_v56 }
 0x8e7   : > { %v5518_v9 = vpop.eup %5517  ;;  %v2436_v53 = vmul.f32 %v5512_v55, %v2420_v30  ;;  %v1040_v7 = vmul.f32 %v5516_v13, %v1003_v63  ;;  %v1007_v1 = vpop.xlane.xlu0 %1006 }
 0x8e8   : > { %v1690_v8 = vpop.xlane.xlu1 %1689  ;;  %v2437_v45 = vmul.f32 %v5514_v42, %v2421_v58  ;;  %v1723_v26 = vmul.f32 %v5518_v9, %v1686_v43  ;;  %5527 = vrcp.f32 %v1007_v1  ;;  %v2015_v22 = vadd.f32 %v1999_v41, %v1316_v39 }
 0x8e9   : > { %v2681_v34 = vmul.f32 %v7150_v0, %v2436_v53  ;;  %v1056_v11 = vsub.f32 2.0, %v1040_v7  ;;  %5529 = vrcp.f32 %v1690_v8 }
 0x8ea   : > { %v5520_v31 = vpop.eup %5519  ;;  %v2682_v46 = vmul.f32 %v7148_v57, %v2437_v45  ;;  %v1739_v33 = vsub.f32 2.0, %v1723_v26 }
 0x8eb   : > { %v5522_v3 = vpop.eup %5521  ;;  %v1072_v36 = vmul.f32 %v5516_v13, %v1056_v11  ;;  %v1724_v20 = vmul.f32 %v5520_v31, %v1688_v54  ;;  %v1692_v27 = vpop.xlane.xlu0 %1691  ;;  %v7407_v63 = vadd.f32 %v2681_v34, %v2014_v14 }
 0x8ec   : > { %v1009_v61 = vpop.xlane.xlu1 %1008  ;;  %v1755_v28 = vmul.f32 %v5518_v9, %v1739_v33  ;;  %v1041_v51 = vmul.f32 %v5522_v3, %v1005_v5  ;;  %5531 = vrcp.f32 %v1692_v27  ;;  %v7409_v43 = vadd.f32 %v2682_v46, %v2015_v22 }
 0x8ed   : > { %v1317_v0 = vmul.f32 %v7742_v21, %v1072_v36  ;;  %v1740_v38 = vsub.f32 2.0, %v1724_v20  ;;  %5533 = vrcp.f32 %v1009_v61 }
 0x8ee   : > { %v5524_v12 = vpop.eup %5523  ;;  %v2000_v57 = vmul.f32 %v7743_v59, %v1755_v28  ;;  %v1057_v49 = vsub.f32 2.0, %v1041_v51  ;;  %v7746_v28 = vld [vmem:[#allocation41_spill] sm:$0xff] }
 0x8ef   : > { %v5526_v55 = vpop.eup %5525  ;;  %v1756_v50 = vmul.f32 %v5520_v31, %v1740_v38  ;;  %v2406_v54 = vmul.f32 %v5524_v12, %v2369_v4  ;;  %v2373_v52 = vpop.xlane.xlu0 %2372 }
 0x8f0   : > { %v2375_v29 = vpop.xlane.xlu1 %2374  ;;  %v1073_v42 = vmul.f32 %v5522_v3, %v1057_v49  ;;  %v2407_v32 = vmul.f32 %v5526_v55, %v2371_v37  ;;  %5535 = vrcp.f32 %v2373_v52  ;;  %v2016_v5 = vadd.f32 %v2000_v57, %v1317_v0  ;;  %v7747_v0 = vld [vmem:[#allocation64_spill] sm:$0xff] }
 0x8f1   : > { %v2001_v23 = vmul.f32 %v7744_v16, %v1756_v50  ;;  %v2422_v56 = vsub.f32 2.0, %v2406_v54  ;;  %5537 = vrcp.f32 %v2375_v29  ;;  %v7748_v54 = vld [vmem:[#allocation63_spill] sm:$0xff]  ;;  %v7749_v16 = vld [vmem:[#allocation40_spill] sm:$0xff] }
 0x8f2   : > { %v5528_v14 = vpop.eup %5527  ;;  %v1318_v41 = vmul.f32 %v7745_v6, %v1073_v42  ;;  %v2423_v30 = vsub.f32 2.0, %v2407_v32 }
 0x8f3   : > { %v5530_v13 = vpop.eup %5529  ;;  %v2438_v25 = vmul.f32 %v5524_v12, %v2422_v56  ;;  %v1042_v39 = vmul.f32 %v5528_v14, %v1007_v1  ;;  %v1011_v58 = vpop.xlane.xlu0 %1010 }
 0x8f4   : > { %v1694_v9 = vpop.xlane.xlu1 %1693  ;;  %v2439_v4 = vmul.f32 %v5526_v55, %v2423_v30  ;;  %v1725_v53 = vmul.f32 %v5530_v13, %v1690_v8  ;;  %5539 = vrcp.f32 %v1011_v58  ;;  %v2017_v7 = vadd.f32 %v2001_v23, %v1318_v41 }
 0x8f5   : > { %v2683_v37 = vmul.f32 %v7154_v60, %v2438_v25  ;;  %v1058_v45 = vsub.f32 2.0, %v1042_v39  ;;  %5541 = vrcp.f32 %v1694_v9 }
 0x8f6   : > { %v5532_v26 = vpop.eup %5531  ;;  %v2684_v22 = vmul.f32 %v7152_v17, %v2439_v4  ;;  %v1741_v34 = vsub.f32 2.0, %v1725_v53 }
 0x8f7   : > { %v5534_v11 = vpop.eup %5533  ;;  %v1074_v31 = vmul.f32 %v5528_v14, %v1058_v45  ;;  %v1726_v46 = vmul.f32 %v5532_v26, %v1692_v27  ;;  %v1696_v33 = vpop.xlane.xlu0 %1695  ;;  %v7417_v1 = vadd.f32 %v2683_v37, %v2016_v5 }
 0x8f8   : > { %v1013_v3 = vpop.xlane.xlu1 %1012  ;;  %v1757_v36 = vmul.f32 %v5530_v13, %v1741_v34  ;;  %v1043_v20 = vmul.f32 %v5534_v11, %v1009_v61  ;;  %5543 = vrcp.f32 %v1696_v33  ;;  %v7419_v8 = vadd.f32 %v2684_v22, %v2017_v7 }
 0x8f9   : > { %v1319_v60 = vmul.f32 %v7746_v28, %v1074_v31  ;;  %v1742_v51 = vsub.f32 2.0, %v1726_v46  ;;  %5545 = vrcp.f32 %v1013_v3 }
 0x8fa   : > { %v5536_v21 = vpop.eup %5535  ;;  %v2002_v17 = vmul.f32 %v7747_v0, %v1757_v36  ;;  %v1059_v38 = vsub.f32 2.0, %v1043_v20  ;;  %v7751_v36 = vld [vmem:[#allocation66_spill] sm:$0xff] }
 0x8fb   : > { %v5538_v12 = vpop.eup %5537  ;;  %v1758_v59 = vmul.f32 %v5532_v26, %v1742_v51  ;;  %v2408_v27 = vmul.f32 %v5536_v21, %v2373_v52  ;;  %v2377_v57 = vpop.xlane.xlu0 %2376 }
 0x8fc   : > { %v2379_v49 = vpop.xlane.xlu1 %2378  ;;  %v1075_v55 = vmul.f32 %v5534_v11, %v1059_v38  ;;  %v2409_v50 = vmul.f32 %v5538_v12, %v2375_v29  ;;  %5547 = vrcp.f32 %v2377_v57  ;;  %v2018_v61 = vadd.f32 %v2002_v17, %v1319_v60 }
 0x8fd   : > { %v2003_v42 = vmul.f32 %v7748_v54, %v1758_v59  ;;  %v2424_v32 = vsub.f32 2.0, %v2408_v27  ;;  %5549 = vrcp.f32 %v2379_v49 }
 0x8fe   : > { %v5540_v5 = vpop.eup %5539  ;;  %v1320_v23 = vmul.f32 %v7749_v16, %v1075_v55  ;;  %v2425_v56 = vsub.f32 2.0, %v2409_v50 }
 0x8ff   : > { %v5542_v14 = vpop.eup %5541  ;;  %v2440_v6 = vmul.f32 %v5536_v21, %v2424_v32  ;;  %v1044_v41 = vmul.f32 %v5540_v5, %v1011_v58  ;;  %v7750_v58 = vld [vmem:[#allocation43_spill] sm:$0xff] }
 0x900   : > { %v2441_v30 = vmul.f32 %v5538_v12, %v2425_v56  ;;  %v1727_v13 = vmul.f32 %v5542_v14, %v1694_v9  ;;  %v2019_v52 = vadd.f32 %v2003_v42, %v1320_v23  ;;  %v7753_v12 = vld [vmem:[#allocation42_spill] sm:$0xff] }
 0x901   : > { %v2685_v25 = vmul.f32 %v7158_v40, %v2440_v6  ;;  %v1060_v39 = vsub.f32 2.0, %v1044_v41 }
 0x902   : > { %v5544_v29 = vpop.eup %5543  ;;  %v2686_v4 = vmul.f32 %v7156_v18, %v2441_v30  ;;  %v1743_v53 = vsub.f32 2.0, %v1727_v13 }
 0x903   : > { %v5546_v7 = vpop.eup %5545  ;;  %v1076_v37 = vmul.f32 %v5540_v5, %v1060_v39  ;;  %v1728_v45 = vmul.f32 %v5544_v29, %v1696_v33  ;;  %v7427_v26 = vadd.f32 %v2685_v25, %v2018_v61  ;;  %v7752_v33 = vld [vmem:[#allocation65_spill] sm:$0xff] }
 0x904   : > { %v1759_v22 = vmul.f32 %v5542_v14, %v1743_v53  ;;  %v1045_v34 = vmul.f32 %v5546_v7, %v1013_v3  ;;  %v7429_v11 = vadd.f32 %v2686_v4, %v2019_v52 }
 0x905   : > { %v1321_v31 = vmul.f32 %v7750_v58, %v1076_v37  ;;  %v1744_v9 = vsub.f32 2.0, %v1728_v45 }
 0x906   : > { %v5548_v46 = vpop.eup %5547  ;;  %v2004_v40 = vmul.f32 %v7751_v36, %v1759_v22  ;;  %v1061_v20 = vsub.f32 2.0, %v1045_v34 }
 0x907   : > { %v5550_v28 = vpop.eup %5549  ;;  %v1760_v60 = vmul.f32 %v5544_v29, %v1744_v9  ;;  %v2410_v18 = vmul.f32 %v5548_v46, %v2377_v57  ;;  %v3034_v57 = vpop.xlane.xlu1 %3033 }
 0x908   : > { %v1077_v51 = vmul.f32 %v5546_v7, %v1061_v20  ;;  %v2411_v21 = vmul.f32 %v5550_v28, %v2379_v49  ;;  %v2020_v0 = vadd.f32 %v2004_v40, %v1321_v31  ;;  %v3032_v49 = vpop.xlane.xlu0 %3031  ;;  %5551 = vrcp.f32 %v3034_v57 }
 0x909   : > { %v2005_v17 = vmul.f32 %v7752_v33, %v1760_v60  ;;  %v2426_v38 = vsub.f32 2.0, %v2410_v18  ;;  %5553 = vrcp.f32 %v3032_v49 }
 0x90a   : > { %v1322_v3 = vmul.f32 %v7753_v12, %v1077_v51  ;;  %v2427_v59 = vsub.f32 2.0, %v2411_v21 }
 0x90b   : > { %v2442_v27 = vmul.f32 %v5548_v46, %v2426_v38  ;;  %v3038_v5 = vpop.xlane.xlu1 %3037 }
 0x90c   : > { %v2443_v55 = vmul.f32 %v5550_v28, %v2427_v59  ;;  %v2021_v50 = vadd.f32 %v2005_v17, %v1322_v3  ;;  %v3036_v16 = vpop.xlane.xlu0 %3035  ;;  %5555 = vrcp.f32 %v3038_v5 }
 0x90d   : > { %v2687_v61 = vmul.f32 %v7168_v15, %v2442_v27  ;;  %5557 = vrcp.f32 %v3036_v16 }
 0x90e   : > { %v2688_v54 = vmul.f32 %v7166_v62, %v2443_v55 }
 0x90f   : > { %v7437_v42 = vadd.f32 %v2687_v61, %v2020_v0  ;;  %v3042_v23 = vpop.xlane.xlu1 %3041 }
 0x910   : > { %v7439_v32 = vadd.f32 %v2688_v54, %v2021_v50  ;;  %v3040_v56 = vpop.xlane.xlu0 %3039  ;;  %5559 = vrcp.f32 %v3042_v23 }
 0x911   : > { %5561 = vrcp.f32 %v3040_v56 }
 0x912   : > { %v5552_v15 = vpop.eup %5551 }
 0x913   : > { %v3046_v14 = vpop.xlane.xlu1 %3045  ;;  %v5554_v41 = vpop.eup %5553  ;;  %v3080_v13 = vmul.f32 %v5552_v15, %v3034_v57 }
 0x914   : > { %v3044_v6 = vpop.xlane.xlu0 %3043  ;;  %5563 = vrcp.f32 %v3046_v14  ;;  %v3079_v39 = vmul.f32 %v5554_v41, %v3032_v49 }
 0x915   : > { %5565 = vrcp.f32 %v3044_v6  ;;  %v3096_v29 = vsub.f32 2.0, %v3080_v13 }
 0x916   : > { %v5556_v52 = vpop.eup %5555  ;;  %v3095_v22 = vsub.f32 2.0, %v3079_v39 }
 0x917   : > { %v3050_v62 = vpop.xlane.xlu1 %3049  ;;  %v5558_v25 = vpop.eup %5557  ;;  %v3082_v53 = vmul.f32 %v5556_v52, %v3038_v5  ;;  %v3112_v9 = vmul.f32 %v5552_v15, %v3096_v29 }
 0x918   : > { %v3048_v30 = vpop.xlane.xlu0 %3047  ;;  %5567 = vrcp.f32 %v3050_v62  ;;  %v3081_v7 = vmul.f32 %v5558_v25, %v3036_v16  ;;  %v3111_v18 = vmul.f32 %v5554_v41, %v3095_v22 }
 0x919   : > { %5569 = vrcp.f32 %v3048_v30  ;;  %v3098_v46 = vsub.f32 2.0, %v3082_v53 }
 0x91a   : > { %v5560_v4 = vpop.eup %5559  ;;  %v3097_v36 = vsub.f32 2.0, %v3081_v7 }
 0x91b   : > { %v5562_v45 = vpop.eup %5561  ;;  %v3084_v40 = vmul.f32 %v5560_v4, %v3042_v23  ;;  %v3114_v55 = vmul.f32 %v5556_v52, %v3098_v46 }
 0x91c   : > { %v3054_v37 = vpop.xlane.xlu1 %3053  ;;  %v3083_v20 = vmul.f32 %v5562_v45, %v3040_v56  ;;  %v3113_v50 = vmul.f32 %v5558_v25, %v3097_v36 }
 0x91d   : > { %5571 = vrcp.f32 %v3054_v37  ;;  %v3100_v3 = vsub.f32 2.0, %v3084_v40 }
 0x91e   : > { %v5564_v58 = vpop.eup %5563  ;;  %v3099_v61 = vsub.f32 2.0, %v3083_v20 }
 0x91f   : > { %v5566_v31 = vpop.eup %5565  ;;  %v3086_v28 = vmul.f32 %v5564_v58, %v3046_v14 }
 0x920   : > { %v3052_v34 = vpop.xlane.xlu0 %3051  ;;  %v3085_v21 = vmul.f32 %v5566_v31, %v3044_v6  ;;  %v3115_v52 = vmul.f32 %v5562_v45, %v3099_v61 }
 0x921   : > { %5573 = vrcp.f32 %v3052_v34  ;;  %v3102_v54 = vsub.f32 2.0, %v3086_v28 }
 0x922   : > { %v5568_v51 = vpop.eup %5567  ;;  %v3101_v16 = vsub.f32 2.0, %v3085_v21 }
 0x923   : > { %v5570_v17 = vpop.eup %5569  ;;  %v3088_v57 = vmul.f32 %v5568_v51, %v3050_v62  ;;  %v3118_v25 = vmul.f32 %v5564_v58, %v3102_v54 }
 0x924   : > { %v3056_v59 = vpop.xlane.xlu0 %3055  ;;  %v3087_v23 = vmul.f32 %v5570_v17, %v3048_v30  ;;  %v3117_v22 = vmul.f32 %v5566_v31, %v3101_v16 }
 0x925   : > { %v3104_v13 = vsub.f32 2.0, %v3088_v57 }
 0x926   : > { %v3103_v39 = vsub.f32 2.0, %v3087_v23 }
 0x927   : > { %v5572_v41 = vpop.eup %5571  ;;  %v3120_v20 = vmul.f32 %v5568_v51, %v3104_v13 }
 0x928   : > { %v3058_v38 = vpop.xlane.xlu1 %3057 }
 0x929   : > { %5575 = vrcp.f32 %v3058_v38 }
 0x92a   : > { %5577 = vrcp.f32 %v3056_v59 }
 0x92b   : > { %v5574_v30 = vpop.eup %5573 }
 0x953   : > { %v4678_v60 = vpop.f32.mrb[80].mxu0 }
 0x954   : > { %v3357_v0 = vmul.f32 %v4678_v60, %v3112_v9  ;;  %v3277_v33 = vpop.f32.mrb[81].mxu0  ;;  %v3119_v60 = vmul.f32 %v5570_v17, %v3103_v39 }
 0x955   : > { %v3356_v12 = vmul.f32 %v3277_v33, %v3111_v18 }
 0x956   : > { %v3373_v27 = vadd.f32 %v3357_v0, %v7357_v2  ;;  %v3116_v2 = vmul.f32 %v5560_v4, %v3100_v3 }
 0x957   : > { %v3372_v49 = vadd.f32 %v3356_v12, %v7353_v24  ;;  %v4681_v5 = vpop.f32.mrb[82].mxu0 }
 0x958   : > { %v3359_v56 = vmul.f32 %v4681_v5, %v3114_v55  ;;  %v3287_v14 = vpop.f32.mrb[83].mxu0 }
 0x959   : > { %v3358_v6 = vmul.f32 %v3287_v14, %v3113_v50  ;;  %4708 = vmatprep.mubr.msk.f32.mxu1 %vm365_vm0, %v3372_v49 }
 0x95a   : > { %v3375_v15 = vadd.f32 %v3359_v56, %v7367_v35  ;;  %4709 = vmatmul.mubr.msk.f32.vlgmr.msra.gmra.mrb[58].mxu1 %vm365_vm0, %v3373_v27  ;;  %v3090_v35 = vmul.f32 %v5572_v41, %v3054_v37  ;;  %v5576_v37 = vpop.eup %5575  ;;  %v3062_v56 = vpop.xlane.xlu1 %3061 }
 0x95b   : > { %v3374_v62 = vadd.f32 %v3358_v6, %v7365_v10  ;;  %v4684_v24 = vpop.f32.mrb[84].mxu0  ;;  %v3089_v10 = vmul.f32 %v5574_v30, %v3052_v34  ;;  %v5578_v33 = vpop.eup %5577  ;;  %5579 = vrcp.f32 %v3062_v56 }
 0x95c   : > { %v3361_v29 = vmul.f32 %v4684_v24, %v3116_v2  ;;  %v3297_v53 = vpop.f32.mrb[85].mxu0  ;;  %v4687_v7 = vpop.f32.mrb[48].mxu1  ;;  %v3106_v0 = vsub.f32 2.0, %v3090_v35  ;;  %v3091_v51 = vmul.f32 %v5578_v33, %v3056_v59 }
 0x95d   : > { %v3360_v9 = vmul.f32 %v3297_v53, %v3115_v52  ;;  %v3363_v46 = vmul.f32 %v4687_v7, %v3118_v25  ;;  %v3307_v36 = vpop.f32.mrb[49].mxu1  ;;  %4711 = vmatprep.mubr.msk.f32.mxu1 %vm365_vm0, %v3374_v62  ;;  %v3105_v34 = vsub.f32 2.0, %v3089_v10 }
 0x95e   : > { %v3377_v4 = vadd.f32 %v3361_v29, %v7383_v47  ;;  %v3362_v40 = vmul.f32 %v3307_v36, %v3117_v22  ;;  %4712 = vmatmul.mubr.msk.f32.gmra.mrb[60].mxu1 %vm365_vm0, %v3375_v15  ;;  %v3122_v17 = vmul.f32 %v5572_v41, %v3106_v0  ;;  %v3107_v54 = vsub.f32 2.0, %v3091_v51  ;;  %v3904_v29 = vld [vmem:[%s7534_s4] ss:$0 sm:$0xff] }
 0x95f   : > { %v3376_v45 = vadd.f32 %v3360_v9, %v7381_v44  ;;  %v3379_v58 = vadd.f32 %v3363_v46, %v7399_v19  ;;  %v3121_v3 = vmul.f32 %v5574_v30, %v3105_v34 }
 0x960   : > { %v3378_v28 = vadd.f32 %v3362_v40, %v7397_v48  ;;  %v4690_v31 = vpop.f32.mrb[50].mxu1  ;;  %v3092_v48 = vmul.f32 %v5576_v37, %v3058_v38  ;;  %v3123_v57 = vmul.f32 %v5578_v33, %v3107_v54 }
 0x961   : > { %v3365_v18 = vmul.f32 %v4690_v31, %v3120_v20  ;;  %v3317_v21 = vpop.f32.mrb[51].mxu1  ;;  %4714 = vmatprep.mubr.msk.f32.mxu1 %vm365_vm0, %v3376_v45 }
 0x962   : > { %v3364_v47 = vmul.f32 %v3317_v21, %v3119_v60  ;;  %4715 = vmatmul.mubr.msk.f32.gmra.mrb[62].mxu1 %vm365_vm0, %v3377_v4  ;;  %v3108_v50 = vsub.f32 2.0, %v3092_v48 }
 0x963   : > { %v3381_v44 = vadd.f32 %v3365_v18, %v7409_v43  ;;  %4717 = vmatprep.mubr.msk.f32.mxu1 %vm365_vm0, %v3378_v28 }
 0x964   : > { %v3380_v19 = vadd.f32 %v3364_v47, %v7407_v63  ;;  %v3124_v38 = vmul.f32 %v5576_v37, %v3108_v50 }
 0x966   : > { %4718 = vmatmul.mubr.msk.f32.gmra.mrb[64].mxu1 %vm365_vm0, %v3379_v58 }
 0x967   : > { %4720 = vmatprep.mubr.msk.f32.mxu1 %vm365_vm0, %v3380_v19  ;;  %v4693_v12 = vpop.f32.mrb[52].mxu1 }
 0x968   : > { %v3367_v27 = vmul.f32 %v4693_v12, %v3122_v17  ;;  %v3327_v55 = vpop.f32.mrb[53].mxu1 }
 0x969   : > { %v3366_v61 = vmul.f32 %v3327_v55, %v3121_v3 }
 0x96a   : > { %v3383_v43 = vadd.f32 %v3367_v27, %v7419_v8  ;;  %4721 = vmatmul.mubr.msk.f32.gmra.mrb[66].mxu1 %vm365_vm0, %v3381_v44  ;;  %v3060_v8 = vpop.xlane.xlu0 %3059 }
 0x96b   : > { %v3382_v63 = vadd.f32 %v3366_v61, %v7417_v1  ;;  %5581 = vrcp.f32 %v3060_v8  ;;  %v5580_v1 = vpop.eup %5579 }
 0x96c   : > { %v3094_v15 = vmul.f32 %v5580_v1, %v3062_v56 }
 0x96d   : > { %4723 = vmatprep.mubr.msk.f32.mxu1 %vm365_vm0, %v3382_v63 }
 0x96e   : > { %v4696_v59 = vpop.f32.mrb[54].mxu1  ;;  %4724 = vmatmul.mubr.msk.f32.gmra.mrb[68].mxu1 %vm365_vm0, %v3383_v43  ;;  %v3110_v41 = vsub.f32 2.0, %v3094_v15 }
 0x96f   : > { %v3369_v49 = vmul.f32 %v4696_v59, %v3124_v38  ;;  %v3337_v5 = vpop.f32.mrb[55].mxu1 }
 0x970   : > { %v3368_v16 = vmul.f32 %v3337_v5, %v3123_v57  ;;  %v3126_v62 = vmul.f32 %v5580_v1, %v3110_v41 }
 0x971   : > { %v3385_v23 = vadd.f32 %v3369_v49, %v7429_v11 }
 0x972   : > { %v3384_v14 = vadd.f32 %v3368_v16, %v7427_v26 }
 0x974   : > { %4726 = vmatprep.mubr.msk.f32.mxu1 %vm365_vm0, %v3384_v14 }
 0x975   : > { %4727 = vmatmul.mubr.msk.f32.gmra.mrb[70].mxu1 %vm365_vm0, %v3385_v23  ;;  %v5582_v6 = vpop.eup %5581 }
 0x976   : > { %v3093_v2 = vmul.f32 %v5582_v6, %v3060_v8 }
 0x978   : > { %v3109_v13 = vsub.f32 2.0, %v3093_v2 }
 0x97a   : > { %v3125_v11 = vmul.f32 %v5582_v6, %v3109_v13 }
 0x98b   : > { %v4699_v24 = vpop.f32.mrb[56].mxu1 }
 0x98c   : > { %v3371_v52 = vmul.f32 %v4699_v24, %v3126_v62  ;;  %v3347_v25 = vpop.f32.mrb[57].mxu1 }
 0x98d   : > { %v3370_v26 = vmul.f32 %v3347_v25, %v3125_v11 }
 0x98e   : > { %v3387_v30 = vadd.f32 %v3371_v52, %v7439_v32 }
 0x98f   : > { %v3386_v39 = vadd.f32 %v3370_v26, %v7437_v42 }
 0x991   : > { %4729 = vmatprep.mubr.msk.f32.mxu1 %vm365_vm0, %v3386_v39 }
 0x992   : > { %4730 = vmatmul.mubr.msk.f32.gmra.mrb[72].mxu1 %vm365_vm0, %v3387_v30 }
 0xa2d   : > { %v4710_v32 = vpop.f32.mrb[58].mxu1 }
 0xa2e   : > { %v3519_v42 = vadd.f32 %v4710_v32, %v3904_v29  ;;  %v3513_v53 = vpop.f32.mrb[59].mxu1 }
 0xa2f   : > { %v3514_v7 = vadd.f32 %v3904_v29, %v3513_v53 }
 0xa30   : > { %3593 = vst.msk [vmem:[%s7481_s8 + $0x8] sm:$0xff] %vm365_vm0, %v3519_v42 }
 0xa31   : > { %3592 = vst.msk [vmem:[%s7481_s8] sm:$0xff] %vm365_vm0, %v3514_v7  ;;  %v4713_v22 = vpop.f32.mrb[60].mxu1 }
 0xa32   : > { %v3529_v9 = vadd.f32 %v4713_v22, %v3904_v29  ;;  %v3523_v46 = vpop.f32.mrb[61].mxu1 }
 0xa33   : > { %v3524_v36 = vadd.f32 %v3904_v29, %v3523_v46 }
 0xa34   : > { %3595 = vst.msk [vmem:[%s7481_s8 + $0x18] sm:$0xff] %vm365_vm0, %v3529_v9 }
 0xa35   : > { %3594 = vst.msk [vmem:[%s7481_s8 + $0x10] sm:$0xff] %vm365_vm0, %v3524_v36  ;;  %v4716_v35 = vpop.f32.mrb[62].mxu1 }
 0xa36   : > { %v3539_v4 = vadd.f32 %v4716_v35, %v3904_v29  ;;  %v3533_v40 = vpop.f32.mrb[63].mxu1 }
 0xa37   : > { %v3534_v10 = vadd.f32 %v3904_v29, %v3533_v40 }
 0xa38   : > { %3597 = vst.msk [vmem:[%s7481_s8 + $0x28] sm:$0xff] %vm365_vm0, %v3539_v4 }
 0xa39   : > { %3596 = vst.msk [vmem:[%s7481_s8 + $0x20] sm:$0xff] %vm365_vm0, %v3534_v10  ;;  %v4719_v45 = vpop.f32.mrb[64].mxu1 }
 0xa3a   : > { %v3549_v58 = vadd.f32 %v4719_v45, %v3904_v29  ;;  %v3543_v20 = vpop.f32.mrb[65].mxu1 }
 0xa3b   : > { %v3544_v28 = vadd.f32 %v3904_v29, %v3543_v20 }
 0xa3c   : > { %3599 = vst.msk [vmem:[%s7481_s8 + $0x38] sm:$0xff] %vm365_vm0, %v3549_v58 }
 0xa3d   : > { %3598 = vst.msk [vmem:[%s7481_s8 + $0x30] sm:$0xff] %vm365_vm0, %v3544_v28  ;;  %v4722_v31 = vpop.f32.mrb[66].mxu1 }
 0xa3e   : > { %v3559_v60 = vadd.f32 %v4722_v31, %v3904_v29  ;;  %v3553_v18 = vpop.f32.mrb[67].mxu1 }
 0xa3f   : > { %v3554_v21 = vadd.f32 %v3904_v29, %v3553_v18 }
 0xa40   : > { %3601 = vst.msk [vmem:[%s7481_s8 + $0x48] sm:$0xff] %vm365_vm0, %v3559_v60 }
 0xa41   : > { %3600 = vst.msk [vmem:[%s7481_s8 + $0x40] sm:$0xff] %vm365_vm0, %v3554_v21  ;;  %v4725_v37 = vpop.f32.mrb[68].mxu1 }
 0xa42   : > { %v3569_v0 = vadd.f32 %v4725_v37, %v3904_v29  ;;  %v3563_v47 = vpop.f32.mrb[69].mxu1 }
 0xa43   : > { %v3564_v33 = vadd.f32 %v3904_v29, %v3563_v47 }
 0xa44   : > { %3603 = vst.msk [vmem:[%s7481_s8 + $0x58] sm:$0xff] %vm365_vm0, %v3569_v0 }
 0xa45   : > { %3602 = vst.msk [vmem:[%s7481_s8 + $0x50] sm:$0xff] %vm365_vm0, %v3564_v33 }
 0xa48   : > { %v4728_v34 = vpop.f32.mrb[70].mxu1 }
 0xa49   : > { %v3579_v44 = vadd.f32 %v4728_v34, %v3904_v29  ;;  %v3573_v19 = vpop.f32.mrb[71].mxu1 }
 0xa4a   : > { %v3574_v48 = vadd.f32 %v3904_v29, %v3573_v19 }
 0xa4b   : > { %3605 = vst.msk [vmem:[%s7481_s8 + $0x68] sm:$0xff] %vm365_vm0, %v3579_v44 }
 0xa4c   : > { %3604 = vst.msk [vmem:[%s7481_s8 + $0x60] sm:$0xff] %vm365_vm0, %v3574_v48 }
 0xa65   : > { %v4731_v51 = vpop.f32.mrb[72].mxu1 }
 0xa66   : > { %v3589_v17 = vadd.f32 %v4731_v51, %v3904_v29  ;;  %v3583_v12 = vpop.f32.mrb[73].mxu1 }
 0xa67   : > { %v3584_v3 = vadd.f32 %v3904_v29, %v3583_v12 }
 0xa68   : > { %3607 = vst.msk [vmem:[%s7481_s8 + $0x78] sm:$0xff] %vm365_vm0, %v3589_v17 }
 0xa69   : > { %3606 = vst.msk [vmem:[%s7481_s8 + $0x70] sm:$0xff] %vm365_vm0, %v3584_v3 }
 0xa6a PF: > { %s17_s28 = sadd.s32 1, %s5637_s28   ;;  %s7754_s24 = smov %s5629_s26 }
 0xa6b   : > { %p14_p7 = scmp.ge.s32.totalorder %s17_s28, 6   ;;  %s7755_s25 = smov %s5633_s27 }
 0xa6c   : > { %s7756_s26 = smov %s7759_s29  ;;  %s7757_s27 = smov %s7763_s30 }
 0xa6d   :  { %16 = sbr.rel (!%p14_p7) target bundleno = 3 (0x3), region = 84 }

</bundles_post_ra>
